<compile_context>
chip_gen: v6e
topology: v6e:2x2x1
jax: 0.10.0
libtpu: 0.0.40
codegen_flags: <defaults>
</compile_context>

<pallas_src>
import functools

import jax
import jax.numpy as jnp
from jax.experimental import pallas as pl
from jax.experimental.pallas import tpu as pltpu


def _round_up(x, m):
    return (x + m - 1) // m * m


def _vmem_limit_bytes():
    """Scoped-VMEM limit: above the 16/32 MiB defaults, below physical VMEM."""
    try:
        cap = pltpu.get_tpu_info().vmem_capacity_bytes
        return int(cap * 3 // 4)          # ~96 MiB on v5e/v6e, ~48 MiB on v7x
    except Exception:
        return 48 * 1024 * 1024


def _pick_batch_tile(Bp):
    """Largest multiple-of-8 batch tile <= 128 dividing Bp; prefer >= 2 tiles
    when the batch allows it (keeps both v7x TensorCores busy)."""
    cands = [t for t in range(8, min(Bp, 128) + 1, 8) if Bp % t == 0]
    best = cands[-1]
    if Bp >= 16:
        two = [t for t in cands if Bp // t >= 2]
        if two:
            best = two[-1]
    return best


def _derive_time_tile(S, tb, K_max, Hp, w_bytes, budget):
    """Largest time-block (<= 32) whose VMEM working set fits the budget."""
    G = 4 * Hp

    def use(ts):
        rows = ts * tb
        u = 2 * rows * K_max * 4                 # x blocks (double-buffered)
        u += 2 * rows * Hp * 4                   # y blocks (double-buffered)
        u += 2 * (K_max + Hp) * G * w_bytes      # W_ih + W_hh (double-buffered)
        u += 2 * G * 4                           # bias
        u += 4 * tb * Hp * 4                     # h0 / c0 blocks
        u += 2 * tb * Hp * 4                     # h / c scratch
        u += rows * G * 4                        # per-block pregates scratch
        return u

    ts = max(1, min(32, S))
    while ts > 4 and use(ts) > budget:
        ts //= 2
    return ts


# ----------------------------------------------------------------------------
# Kernel 1: row-tiled dense  y = x @ w + b  (FC head; lane-dense output cols)
# ----------------------------------------------------------------------------
def _dense_kernel(x_ref, w_ref, b_ref, o_ref):
    o_ref[...] = (jnp.dot(x_ref[...].astype(w_ref.dtype), w_ref[...],
                          preferred_element_type=jnp.float32)
                  + b_ref[...]).astype(o_ref.dtype)


def dense(x2d, w, b, *, tile_rows=512, vmem_limit=None):
    """x2d: (N, K) f32, w: (K, M) [f32|bf16], b: (1, M) f32 -> (N, M) f32.
    Row-tiled; W/bias stay resident; M must be a multiple of 128 (lane-dense)."""
    N, K = x2d.shape
    M = w.shape[-1]
    tn = min(tile_rows, _round_up(N, 8))
    Np = _round_up(N, tn)
    if Np != N:
        x2d = jnp.pad(x2d, ((0, Np - N), (0, 0)))
    out = pl.pallas_call(
        _dense_kernel,
        out_shape=jax.ShapeDtypeStruct((Np, M), jnp.float32),
        grid_spec=pltpu.PrefetchScalarGridSpec(
            num_scalar_prefetch=0,
            grid=(Np // tn,),
            in_specs=[
                pl.BlockSpec((tn, K), lambda i: (i, 0)),   # row tile of x
                pl.BlockSpec((K, M), lambda i: (0, 0)),    # W stays resident
                pl.BlockSpec((1, M), lambda i: (0, 0)),    # bias stays resident
            ],
            out_specs=pl.BlockSpec((tn, M), lambda i: (i, 0)),
        ),
        compiler_params=pltpu.CompilerParams(
            dimension_semantics=("parallel",),
            vmem_limit_bytes=vmem_limit),
        cost_estimate=pl.CostEstimate(
            flops=2 * Np * K * M, transcendentals=0,
            bytes_accessed=(Np * K * 4 + K * M * w.dtype.itemsize
                            + M * 4 + Np * M * 4)),
    )(x2d, w, b)
    return out[:N]


# ----------------------------------------------------------------------------
# Kernel 2: fused LSTM layer over a block of timesteps.
#   Input projection for the whole time-block is one big MXU matmul into VMEM
#   scratch; only h_prev @ W_hh^T remains inside the time loop.  h/c state is
#   carried in VMEM scratch across time blocks ("arbitrary" axis); the batch
#   tile axis is "parallel".
# ----------------------------------------------------------------------------
def _lstm_fused_kernel(x_ref, wih_ref, whh_ref, bias_ref, h0_ref, c0_ref,
                       y_ref, h_sc, c_sc, pg_sc, *, tb, unroll):
    t_blk = pl.program_id(1)

    @pl.when(t_blk == 0)
    def _():
        h_sc[...] = h0_ref[...]
        c_sc[...] = c0_ref[...]

    Hp = h_sc.shape[-1]              # lane-padded hidden size (multiple of 128)
    ts = x_ref.shape[0] // tb        # static timesteps in this block

    # Whole-time-block input projection: a single (ts*tb, K) x (K, 4Hp) MXU
    # matmul staged in VMEM scratch -- pregates never round-trip HBM.
    pg_sc[...] = (jnp.dot(x_ref[...].astype(wih_ref.dtype), wih_ref[...],
                          preferred_element_type=jnp.float32)
                  + bias_ref[...])

    # TODO(synk): interleave two independent batch sub-tiles in the step body
    # to hide MXU<->EUP dependency latency when tb and Hp are very small.
    def step(t, carry):
        h_prev, c_prev = carry
        row0 = pl.multiple_of(t * tb, tb)
        gates = (pg_sc[pl.ds(row0, tb), :]
                 + jnp.dot(h_prev.astype(whh_ref.dtype), whh_ref[...],
                           preferred_element_type=jnp.float32))
        i_g = jax.nn.sigmoid(gates[:, 0 * Hp:1 * Hp])
        f_g = jax.nn.sigmoid(gates[:, 1 * Hp:2 * Hp])
        g_g = jnp.tanh(gates[:, 2 * Hp:3 * Hp])
        o_g = jax.nn.sigmoid(gates[:, 3 * Hp:4 * Hp])
        c_new = f_g * c_prev + i_g * g_g
        h_new = o_g * jnp.tanh(c_new)
        y_ref[pl.ds(row0, tb), :] = h_new.astype(y_ref.dtype)
        return (h_new, c_new)

    h_fin, c_fin = jax.lax.fori_loop(0, ts, step, (h_sc[...], c_sc[...]),
                                     unroll=unroll)
    h_sc[...] = h_fin
    c_sc[...] = c_fin


def lstm_layer(x_rows, w_ih, w_hh, bias, h0, c0, *, nb, nt, ts, tb,
               unroll, vmem_limit):
    """x_rows: (nb*Sp*tb, K) batch-grouped time-major rows; returns the hidden
    trace in the same row layout, (nb*Sp*tb, Hp) f32."""
    K = x_rows.shape[-1]
    Hp = w_hh.shape[0]
    G = 4 * Hp
    rows = x_rows.shape[0]
    return pl.pallas_call(
        functools.partial(_lstm_fused_kernel, tb=tb, unroll=unroll),
        out_shape=jax.ShapeDtypeStruct((rows, Hp), jnp.float32),
        grid_spec=pltpu.PrefetchScalarGridSpec(
            num_scalar_prefetch=0,
            grid=(nb, nt),
            in_specs=[
                pl.BlockSpec((ts * tb, K), lambda b, t: (b * nt + t, 0)),
                pl.BlockSpec((K, G), lambda b, t: (0, 0)),     # W_ih resident
                pl.BlockSpec((Hp, G), lambda b, t: (0, 0)),    # W_hh resident
                pl.BlockSpec((1, G), lambda b, t: (0, 0)),     # bias resident
                pl.BlockSpec((tb, Hp), lambda b, t: (b, 0)),   # h0
                pl.BlockSpec((tb, Hp), lambda b, t: (b, 0)),   # c0
            ],
            out_specs=pl.BlockSpec((ts * tb, Hp), lambda b, t: (b * nt + t, 0)),
            scratch_shapes=[
                pltpu.VMEM((tb, Hp), jnp.float32),        # h state
                pltpu.VMEM((tb, Hp), jnp.float32),        # c state
                pltpu.VMEM((ts * tb, G), jnp.float32),    # per-block pregates
            ],
        ),
        compiler_params=pltpu.CompilerParams(
            dimension_semantics=("parallel", "arbitrary"),
            vmem_limit_bytes=vmem_limit),
        cost_estimate=pl.CostEstimate(
            flops=2 * rows * (K + Hp) * G,
            transcendentals=5 * rows * Hp,
            bytes_accessed=(rows * K * 4 + rows * Hp * 4
                            + (K + Hp) * G * w_hh.dtype.itemsize
                            + 4 * nb * tb * Hp * 4)),
    )(x_rows, w_ih, w_hh, bias, h0, c0)


# ----------------------------------------------------------------------------
# Padding helpers + parameter preparation (done ONCE, outside the jit).
# All pads are mathematically inert: padded hidden lanes stay exactly zero,
# padded batch rows / trailing timesteps are independent and sliced away.
# ----------------------------------------------------------------------------
def _pad_gate_cols(w, H, Hp):
    """Zero-pad the 4H gate axis per-gate: (..., 4H) -> (..., 4Hp)."""
    lead = w.shape[:-1]
    w4 = w.reshape(lead + (4, H))
    pad = [(0, 0)] * (len(lead) + 1) + [(0, Hp - H)]
    return jnp.pad(w4, pad).reshape(lead + (4 * Hp,))


def prepare_params(params, mxu_dtype=jnp.bfloat16):
    """Pad (lane-align per gate) and cast the large weights once.  bf16 MXU
    operands are the production default; use float32 for bit-accurate checks."""
    H = params["h_bias"].shape[-1]
    Hp = _round_up(H, 128)
    O = params["fc_b"].shape[-1]
    Op = _round_up(O, 128)
    n_layers = len(params["w_ih"])
    prep = {"w_ih": [], "w_hh": [], "bias": []}
    for l in range(n_layers):
        w_ih = _pad_gate_cols(params["w_ih"][l], H, Hp)
        if l > 0:    # inputs of layers > 0 are the Hp-padded hidden states
            w_ih = jnp.pad(w_ih, ((0, Hp - H), (0, 0)))
        w_hh = jnp.pad(_pad_gate_cols(params["w_hh"][l], H, Hp),
                       ((0, Hp - H), (0, 0)))
        prep["w_ih"].append(w_ih.astype(mxu_dtype))
        prep["w_hh"].append(w_hh.astype(mxu_dtype))
        prep["bias"].append(
            _pad_gate_cols(params["bias"][l], H, Hp).astype(jnp.float32))
    prep["fc_w"] = jnp.pad(params["fc_w"],
                           ((0, Hp - H), (0, Op - O))).astype(mxu_dtype)
    prep["fc_b"] = params["fc_b"].astype(jnp.float32)      # (1, O), padded in fwd
    prep["h_bias"] = params["h_bias"].astype(jnp.float32)  # (L, 1, H)
    prep["c_bias"] = params["c_bias"].astype(jnp.float32)
    return prep


# ----------------------------------------------------------------------------
# Parameter construction (deterministic, mirrors reset_parameters scheme)
# ----------------------------------------------------------------------------
def init_params(key, n_inputs, n_outputs, n_hidden, n_layers):
    params = {"w_ih": [], "w_hh": [], "bias": []}
    stdev = 5.0 / jnp.sqrt(float(n_inputs + n_hidden))
    for l in range(n_layers):
        in_dim = n_inputs if l == 0 else n_hidden
        key, k1, k2 = jax.random.split(key, 3)
        # torch stores (4H, in); we store transposed (in, 4H) for x @ W^T form.
        w_ih = jax.random.uniform(k1, (in_dim, 4 * n_hidden), jnp.float32,
                                  -stdev, stdev)
        w_hh = jax.random.uniform(k2, (n_hidden, 4 * n_hidden), jnp.float32,
                                  -stdev, stdev)
        # reset_parameters sets all 1-D LSTM params (b_ih, b_hh) to 0.
        bias = jnp.zeros((1, 4 * n_hidden), jnp.float32)
        params["w_ih"].append(w_ih)
        params["w_hh"].append(w_hh)
        params["bias"].append(bias)

    key, k3, k4, k5, k6 = jax.random.split(key, 5)
    limit = jnp.sqrt(6.0 / float(n_hidden + n_outputs))      # xavier_uniform
    fc_w = jax.random.uniform(k3, (n_hidden, n_outputs), jnp.float32,
                              -limit, limit)                 # stored as weight^T
    fc_b = 0.01 * jax.random.normal(k4, (1, n_outputs), jnp.float32)
    h_bias = 0.05 * jax.random.normal(k5, (n_layers, 1, n_hidden), jnp.float32)
    c_bias = 0.05 * jax.random.normal(k6, (n_layers, 1, n_hidden), jnp.float32)
    params["fc_w"] = fc_w
    params["fc_b"] = fc_b
    params["h_bias"] = h_bias
    params["c_bias"] = c_bias
    return params


# ----------------------------------------------------------------------------
# Full forward: many-to-many LSTM + Linear (matches LSTM.forward semantics)
# ----------------------------------------------------------------------------
@jax.jit
def lstm_forward(x, prep):
    """x: (B, S, n_inputs) batch-first -> (B, S, n_outputs) f32."""
    B, S, K_in = x.shape
    H = prep["h_bias"].shape[-1]
    Hp = prep["w_hh"][0].shape[0]
    O = prep["fc_b"].shape[-1]
    Op = prep["fc_w"].shape[-1]
    n_layers = len(prep["w_hh"])
    w_bytes = prep["w_hh"][0].dtype.itemsize

    # --- tiling, derived against an explicit per-generation VMEM budget -----
    Bp = _round_up(B, 8)
    tb = _pick_batch_tile(Bp)
    nb = Bp // tb
    vmem_limit = _vmem_limit_bytes()
    ts = _derive_time_tile(S, tb, max(K_in, Hp), Hp, w_bytes,
                           int(vmem_limit * 0.9))
    Sp = _round_up(S, ts)
    nt = Sp // ts
    unroll = ts if Hp <= 256 else min(8, ts)   # full unroll only for small Hp

    # --- batch-grouped, time-major 2-D row layout ----------------------------
    # row (g, t, j) -> g*Sp*tb + t*tb + j  holds batch g*tb+j at timestep t.
    xp = jnp.pad(x.astype(jnp.float32), ((0, Bp - B), (0, 0), (0, 0)))
    xg = xp.reshape(nb, tb, S, K_in).transpose(0, 2, 1, 3)        # (nb,S,tb,K)
    xg = jnp.pad(xg, ((0, 0), (0, Sp - S), (0, 0), (0, 0)))       # (nb,Sp,tb,K)
    layer_rows = xg.reshape(nb * Sp * tb, K_in)

    for l in range(n_layers):
        h0 = jnp.pad(jnp.broadcast_to(prep["h_bias"][l], (B, H)),
                     ((0, Bp - B), (0, Hp - H)))                  # (Bp, Hp)
        c0 = jnp.pad(jnp.broadcast_to(prep["c_bias"][l], (B, H)),
                     ((0, Bp - B), (0, Hp - H)))
        layer_rows = lstm_layer(layer_rows, prep["w_ih"][l], prep["w_hh"][l],
                                prep["bias"][l], h0, c0,
                                nb=nb, nt=nt, ts=ts, tb=tb,
                                unroll=unroll, vmem_limit=vmem_limit)

    # --- FC head (lane-dense padded columns), then un-group the small result --
    fc_b = jnp.pad(prep["fc_b"], ((0, 0), (0, Op - O)))
    y2d = dense(layer_rows, prep["fc_w"], fc_b, tile_rows=512,
                vmem_limit=vmem_limit)                            # (rows, Op)
    y = y2d[:, :O].reshape(nb, Sp, tb, O).transpose(0, 2, 1, 3)   # (nb,tb,Sp,O)
    return y.reshape(Bp, Sp, O)[:B, :S]                           # (B, S, O)


# ----------------------------------------------------------------------------
# Pure-JAX reference (for sanity check)
# ----------------------------------------------------------------------------
def lstm_forward_ref(x, params, n_layers):
    B, S, _ = x.shape
    H = params["h_bias"].shape[-1]
    layer_in = x.astype(jnp.float32)
    for l in range(n_layers):
        h = jnp.broadcast_to(params["h_bias"][l], (B, H))
        c = jnp.broadcast_to(params["c_bias"][l], (B, H))
        outs = []
        for t in range(S):
            gates = (layer_in[:, t] @ params["w_ih"][l]
                     + h @ params["w_hh"][l] + params["bias"][l])
            i_g = jax.nn.sigmoid(gates[:, 0 * H:1 * H])
            f_g = jax.nn.sigmoid(gates[:, 1 * H:2 * H])
            g_g = jnp.tanh(gates[:, 2 * H:3 * H])
            o_g = jax.nn.sigmoid(gates[:, 3 * H:4 * H])
            c = f_g * c + i_g * g_g
            h = o_g * jnp.tanh(c)
            outs.append(h)
        layer_in = jnp.stack(outs, axis=1)
    return layer_in @ params["fc_w"] + params["fc_b"]


if __name__ == "__main__":
    # Small shapes consistent with the module: many-to-many sequence mapping.
    B, S = 2, 8
    n_inputs, n_outputs, n_hidden, n_layers = 16, 8, 32, 2

    key = jax.random.PRNGKey(0)
    k_x, k_p = jax.random.split(key)
    x = jax.random.normal(k_x, (B, S, n_inputs), jnp.float32)
    params = init_params(k_p, n_inputs, n_outputs, n_hidden, n_layers)

    y_ref = lstm_forward_ref(x, params, n_layers)

    # 1) f32 MXU path: strict check of the kernel algorithm / tiling / padding.
    y32 = jax.block_until_ready(
        lstm_forward(x, prepare_params(params, mxu_dtype=jnp.float32)))
    assert y32.shape == (B, S, n_outputs), y32.shape
    err32 = float(jnp.max(jnp.abs(y32 - y_ref)))
    assert jnp.allclose(y32, y_ref, atol=1e-4, rtol=1e-4), err32

    # 2) bf16 MXU-operand path (production default): coarse sanity bound only,
    #    since bf16 weight rounding accumulates through the recurrence.
    y16 = jax.block_until_ready(lstm_forward(x, prepare_params(params)))
    assert y16.shape == (B, S, n_outputs), y16.shape
    err16 = float(jnp.max(jnp.abs(y16 - y_ref)))
    assert jnp.isfinite(err16) and err16 < 0.25, err16

    print("KERNEL_OK")
</pallas_src>

<mosaic_0001>
module attributes {stable_mosaic.version = 11 : i64} {
  func.func @_dense_kernel(%arg0: i32, %arg1: memref<64x128xf32, #tpu.memory_space<vmem>>, %arg2: memref<128x128xf32, #tpu.memory_space<vmem>>, %arg3: memref<1x128xf32, #tpu.memory_space<vmem>>, %arg4: memref<64x128xf32, #tpu.memory_space<vmem>>) attributes {dimension_semantics = [#tpu.dimension_semantics<parallel>], iteration_bounds = array<i64: 1>, scalar_prefetch = 0 : i64, scratch_operands = 0 : i64, tpu.core_type = #tpu.core_type<tc>, window_params = [{transform_indices = @transform_0, window_bounds = array<i64: 64, 128>}, {pipeline_mode = #tpu.pipeline_mode<synchronous>, transform_indices = @transform_1, window_bounds = array<i64: 128, 128>}, {pipeline_mode = #tpu.pipeline_mode<synchronous>, transform_indices = @transform_2, window_bounds = array<i64: 1, 128>}, {transform_indices = @transform_3, window_bounds = array<i64: 64, 128>}]} {
    %c0 = arith.constant 0 : index
    %c0_0 = arith.constant 0 : index
    %0 = vector.load %arg1[%c0, %c0_0] : memref<64x128xf32, #tpu.memory_space<vmem>>, vector<64x128xf32>
    %c0_1 = arith.constant 0 : index
    %c0_2 = arith.constant 0 : index
    %1 = vector.load %arg2[%c0_1, %c0_2] : memref<128x128xf32, #tpu.memory_space<vmem>>, vector<128x128xf32>
    %cst = arith.constant dense<0.000000e+00> : vector<64x128xf32>
    %2 = tpu.matmul %0, %1, %cst {dimension_numbers = #tpu.dot_dimension_numbers<[1], [0], [0], [1], [0, 0, 1, 1], [], []>} : vector<64x128xf32>, vector<128x128xf32>, vector<64x128xf32> -> vector<64x128xf32>
    %c0_3 = arith.constant 0 : index
    %c0_4 = arith.constant 0 : index
    %3 = vector.load %arg3[%c0_3, %c0_4] : memref<1x128xf32, #tpu.memory_space<vmem>>, vector<1x128xf32>
    %4 = vector.broadcast %3 : vector<1x128xf32> to vector<64x128xf32>
    %5 = arith.addf %2, %4 : vector<64x128xf32>
    %c0_5 = arith.constant 0 : index
    %c0_6 = arith.constant 0 : index
    %6 = vector.load %arg4[%c0_5, %c0_6] : memref<64x128xf32, #tpu.memory_space<vmem>>, vector<64x128xf32>
    tpu.vector_store %arg4[%c0_5, %c0_6], %5 {strides = array<i32>} : memref<64x128xf32, #tpu.memory_space<vmem>>, vector<64x128xf32>,
    return
  }
  func.func @transform_0(%arg0: i32) -> (i32, i32) {
    %c0_i32 = arith.constant 0 : i32
    %c0_i32_0 = arith.constant 0 : i32
    return %arg0, %c0_i32 : i32, i32
  }
  func.func @transform_1(%arg0: i32) -> (i32, i32) {
    %c0_i32 = arith.constant 0 : i32
    %c0_i32_0 = arith.constant 0 : i32
    %c0_i32_1 = arith.constant 0 : i32
    return %c0_i32, %c0_i32_0 : i32, i32
  }
  func.func @transform_2(%arg0: i32) -> (i32, i32) {
    %c0_i32 = arith.constant 0 : i32
    %c0_i32_0 = arith.constant 0 : i32
    %c0_i32_1 = arith.constant 0 : i32
    return %c0_i32, %c0_i32_0 : i32, i32
  }
  func.func @transform_3(%arg0: i32) -> (i32, i32) {
    %c0_i32 = arith.constant 0 : i32
    %c0_i32_0 = arith.constant 0 : i32
    return %arg0, %c0_i32 : i32, i32
  }
}

module attributes {stable_mosaic.version = 11 : i64} {
  func.func @_lstm_fused_kernel(%arg0: i32, %arg1: i32, %arg2: memref<64x16xf32, #tpu.memory_space<vmem>>, %arg3: memref<16x512xf32, #tpu.memory_space<vmem>>, %arg4: memref<128x512xf32, #tpu.memory_space<vmem>>, %arg5: memref<1x512xf32, #tpu.memory_space<vmem>>, %arg6: memref<8x128xf32, #tpu.memory_space<vmem>>, %arg7: memref<8x128xf32, #tpu.memory_space<vmem>>, %arg8: memref<64x128xf32, #tpu.memory_space<vmem>>, %arg9: memref<8x128xf32, #tpu.memory_space<vmem>>, %arg10: memref<8x128xf32, #tpu.memory_space<vmem>>, %arg11: memref<64x512xf32, #tpu.memory_space<vmem>>) attributes {dimension_semantics = [#tpu.dimension_semantics<parallel>, #tpu.dimension_semantics<arbitrary>], iteration_bounds = array<i64: 1, 1>, scalar_prefetch = 0 : i64, scratch_operands = 3 : i64, tpu.core_type = #tpu.core_type<tc>, window_params = [{transform_indices = @transform_0, window_bounds = array<i64: 64, 16>}, {pipeline_mode = #tpu.pipeline_mode<synchronous>, transform_indices = @transform_1, window_bounds = array<i64: 16, 512>}, {pipeline_mode = #tpu.pipeline_mode<synchronous>, transform_indices = @transform_2, window_bounds = array<i64: 128, 512>}, {pipeline_mode = #tpu.pipeline_mode<synchronous>, transform_indices = @transform_3, window_bounds = array<i64: 1, 512>}, {transform_indices = @transform_4, window_bounds = array<i64: 8, 128>}, {transform_indices = @transform_5, window_bounds = array<i64: 8, 128>}, {transform_indices = @transform_6, window_bounds = array<i64: 64, 128>}]} {
    %c0_i32 = arith.constant 0 : i32
    %0 = arith.cmpi eq, %arg1, %c0_i32 : i32
    %1 = arith.extui %0 : i1 to i32
    %c0_i32_0 = arith.constant 0 : i32
    %2 = arith.cmpi ne, %1, %c0_i32_0 : i32
    scf.if %2 {
      %c0_89 = arith.constant 0 : index
      %c0_90 = arith.constant 0 : index
      %286 = vector.load %arg6[%c0_89, %c0_90] : memref<8x128xf32, #tpu.memory_space<vmem>>, vector<8x128xf32>
      %c0_91 = arith.constant 0 : index
      %c0_92 = arith.constant 0 : index
      %287 = vector.load %arg9[%c0_91, %c0_92] : memref<8x128xf32, #tpu.memory_space<vmem>>, vector<8x128xf32>
      tpu.vector_store %arg9[%c0_91, %c0_92], %286 {strides = array<i32>} : memref<8x128xf32, #tpu.memory_space<vmem>>, vector<8x128xf32>,
      %c0_93 = arith.constant 0 : index
      %c0_94 = arith.constant 0 : index
      %288 = vector.load %arg7[%c0_93, %c0_94] : memref<8x128xf32, #tpu.memory_space<vmem>>, vector<8x128xf32>
      %c0_95 = arith.constant 0 : index
      %c0_96 = arith.constant 0 : index
      %289 = vector.load %arg10[%c0_95, %c0_96] : memref<8x128xf32, #tpu.memory_space<vmem>>, vector<8x128xf32>
      tpu.vector_store %arg10[%c0_95, %c0_96], %288 {strides = array<i32>} : memref<8x128xf32, #tpu.memory_space<vmem>>, vector<8x128xf32>,
    } else {
    }
    %c0 = arith.constant 0 : index
    %c0_1 = arith.constant 0 : index
    %3 = vector.load %arg2[%c0, %c0_1] : memref<64x16xf32, #tpu.memory_space<vmem>>, vector<64x16xf32>
    %c0_2 = arith.constant 0 : index
    %c0_3 = arith.constant 0 : index
    %4 = vector.load %arg3[%c0_2, %c0_3] : memref<16x512xf32, #tpu.memory_space<vmem>>, vector<16x512xf32>
    %cst = arith.constant dense<0.000000e+00> : vector<64x512xf32>
    %5 = tpu.matmul %3, %4, %cst {dimension_numbers = #tpu.dot_dimension_numbers<[1], [0], [0], [1], [0, 0, 1, 1], [], []>} : vector<64x16xf32>, vector<16x512xf32>, vector<64x512xf32> -> vector<64x512xf32>
    %c0_4 = arith.constant 0 : index
    %c0_5 = arith.constant 0 : index
    %6 = vector.load %arg5[%c0_4, %c0_5] : memref<1x512xf32, #tpu.memory_space<vmem>>, vector<1x512xf32>
    %7 = vector.broadcast %6 : vector<1x512xf32> to vector<64x512xf32>
    %8 = arith.addf %5, %7 : vector<64x512xf32>
    %c0_6 = arith.constant 0 : index
    %c0_7 = arith.constant 0 : index
    %9 = vector.load %arg11[%c0_6, %c0_7] : memref<64x512xf32, #tpu.memory_space<vmem>>, vector<64x512xf32>
    tpu.vector_store %arg11[%c0_6, %c0_7], %8 {strides = array<i32>} : memref<64x512xf32, #tpu.memory_space<vmem>>, vector<64x512xf32>,
    %c0_8 = arith.constant 0 : index
    %c0_9 = arith.constant 0 : index
    %10 = vector.load %arg9[%c0_8, %c0_9] : memref<8x128xf32, #tpu.memory_space<vmem>>, vector<8x128xf32>
    %c0_10 = arith.constant 0 : index
    %c0_11 = arith.constant 0 : index
    %11 = vector.load %arg10[%c0_10, %c0_11] : memref<8x128xf32, #tpu.memory_space<vmem>>, vector<8x128xf32>
    %c0_i32_12 = arith.constant 0 : i32
    %c8_i32 = arith.constant 8 : i32
    %12 = arith.muli %c0_i32_12, %c8_i32 : i32
    %13 = tpu.assume_multiple %12, 8 : i32
    %14 = arith.index_cast %13 : i32 to index
    %c0_13 = arith.constant 0 : index
    %15 = vector.load %arg11[%14, %c0_13] : memref<64x512xf32, #tpu.memory_space<vmem>>, vector<8x512xf32>
    %c0_14 = arith.constant 0 : index
    %c0_15 = arith.constant 0 : index
    %16 = vector.load %arg4[%c0_14, %c0_15] : memref<128x512xf32, #tpu.memory_space<vmem>>, vector<128x512xf32>
    %cst_16 = arith.constant dense<0.000000e+00> : vector<8x512xf32>
    %17 = tpu.matmul %10, %16, %cst_16 {dimension_numbers = #tpu.dot_dimension_numbers<[1], [0], [0], [1], [0, 0, 1, 1], [], []>} : vector<8x128xf32>, vector<128x512xf32>, vector<8x512xf32> -> vector<8x512xf32>
    %18 = arith.addf %15, %17 : vector<8x512xf32>
    %19 = vector.extract_strided_slice %18 {offsets = [0, 0], sizes = [8, 128], strides = [1, 1]} : vector<8x512xf32> to vector<8x128xf32>
    %20 = arith.negf %19 : vector<8x128xf32>
    %21 = math.exp %20 : vector<8x128xf32>
    %cst_17 = arith.constant 1.000000e+00 : f32
    %22 = vector.broadcast %cst_17 : f32 to vector<8x128xf32>
    %23 = arith.addf %22, %21 : vector<8x128xf32>
    %24 = arith.divf %22, %23 : vector<8x128xf32>
    %25 = vector.extract_strided_slice %18 {offsets = [0, 128], sizes = [8, 128], strides = [1, 1]} : vector<8x512xf32> to vector<8x128xf32>
    %26 = arith.negf %25 : vector<8x128xf32>
    %27 = math.exp %26 : vector<8x128xf32>
    %cst_18 = arith.constant 1.000000e+00 : f32
    %28 = vector.broadcast %cst_18 : f32 to vector<8x128xf32>
    %29 = arith.addf %28, %27 : vector<8x128xf32>
    %30 = arith.divf %28, %29 : vector<8x128xf32>
    %31 = vector.extract_strided_slice %18 {offsets = [0, 256], sizes = [8, 128], strides = [1, 1]} : vector<8x512xf32> to vector<8x128xf32>
    %32 = math.tanh %31 : vector<8x128xf32>
    %33 = vector.extract_strided_slice %18 {offsets = [0, 384], sizes = [8, 128], strides = [1, 1]} : vector<8x512xf32> to vector<8x128xf32>
    %34 = arith.negf %33 : vector<8x128xf32>
    %35 = math.exp %34 : vector<8x128xf32>
    %cst_19 = arith.constant 1.000000e+00 : f32
    %36 = vector.broadcast %cst_19 : f32 to vector<8x128xf32>
    %37 = arith.addf %36, %35 : vector<8x128xf32>
    %38 = arith.divf %36, %37 : vector<8x128xf32>
    %39 = arith.mulf %30, %11 : vector<8x128xf32>
    %40 = arith.mulf %24, %32 : vector<8x128xf32>
    %41 = arith.addf %39, %40 : vector<8x128xf32>
    %42 = math.tanh %41 : vector<8x128xf32>
    %43 = arith.mulf %38, %42 : vector<8x128xf32>
    %44 = arith.index_cast %13 : i32 to index
    %c0_20 = arith.constant 0 : index
    %45 = vector.load %arg8[%44, %c0_20] : memref<64x128xf32, #tpu.memory_space<vmem>>, vector<8x128xf32>
    tpu.vector_store %arg8[%44, %c0_20], %43 {strides = array<i32>} : memref<64x128xf32, #tpu.memory_space<vmem>>, vector<8x128xf32>,
    %c1_i32 = arith.constant 1 : i32
    %c8_i32_21 = arith.constant 8 : i32
    %46 = arith.muli %c1_i32, %c8_i32_21 : i32
    %47 = tpu.assume_multiple %46, 8 : i32
    %48 = arith.index_cast %47 : i32 to index
    %c0_22 = arith.constant 0 : index
    %49 = vector.load %arg11[%48, %c0_22] : memref<64x512xf32, #tpu.memory_space<vmem>>, vector<8x512xf32>
    %c0_23 = arith.constant 0 : index
    %c0_24 = arith.constant 0 : index
    %50 = vector.load %arg4[%c0_23, %c0_24] : memref<128x512xf32, #tpu.memory_space<vmem>>, vector<128x512xf32>
    %cst_25 = arith.constant dense<0.000000e+00> : vector<8x512xf32>
    %51 = tpu.matmul %43, %50, %cst_25 {dimension_numbers = #tpu.dot_dimension_numbers<[1], [0], [0], [1], [0, 0, 1, 1], [], []>} : vector<8x128xf32>, vector<128x512xf32>, vector<8x512xf32> -> vector<8x512xf32>
    %52 = arith.addf %49, %51 : vector<8x512xf32>
    %53 = vector.extract_strided_slice %52 {offsets = [0, 0], sizes = [8, 128], strides = [1, 1]} : vector<8x512xf32> to vector<8x128xf32>
    %54 = arith.negf %53 : vector<8x128xf32>
    %55 = math.exp %54 : vector<8x128xf32>
    %cst_26 = arith.constant 1.000000e+00 : f32
    %56 = vector.broadcast %cst_26 : f32 to vector<8x128xf32>
    %57 = arith.addf %56, %55 : vector<8x128xf32>
    %58 = arith.divf %56, %57 : vector<8x128xf32>
    %59 = vector.extract_strided_slice %52 {offsets = [0, 128], sizes = [8, 128], strides = [1, 1]} : vector<8x512xf32> to vector<8x128xf32>
    %60 = arith.negf %59 : vector<8x128xf32>
    %61 = math.exp %60 : vector<8x128xf32>
    %cst_27 = arith.constant 1.000000e+00 : f32
    %62 = vector.broadcast %cst_27 : f32 to vector<8x128xf32>
    %63 = arith.addf %62, %61 : vector<8x128xf32>
    %64 = arith.divf %62, %63 : vector<8x128xf32>
    %65 = vector.extract_strided_slice %52 {offsets = [0, 256], sizes = [8, 128], strides = [1, 1]} : vector<8x512xf32> to vector<8x128xf32>
    %66 = math.tanh %65 : vector<8x128xf32>
    %67 = vector.extract_strided_slice %52 {offsets = [0, 384], sizes = [8, 128], strides = [1, 1]} : vector<8x512xf32> to vector<8x128xf32>
    %68 = arith.negf %67 : vector<8x128xf32>
    %69 = math.exp %68 : vector<8x128xf32>
    %cst_28 = arith.constant 1.000000e+00 : f32
    %70 = vector.broadcast %cst_28 : f32 to vector<8x128xf32>
    %71 = arith.addf %70, %69 : vector<8x128xf32>
    %72 = arith.divf %70, %71 : vector<8x128xf32>
    %73 = arith.mulf %64, %41 : vector<8x128xf32>
    %74 = arith.mulf %58, %66 : vector<8x128xf32>
    %75 = arith.addf %73, %74 : vector<8x128xf32>
    %76 = math.tanh %75 : vector<8x128xf32>
    %77 = arith.mulf %72, %76 : vector<8x128xf32>
    %78 = arith.index_cast %47 : i32 to index
    %c0_29 = arith.constant 0 : index
    %79 = vector.load %arg8[%78, %c0_29] : memref<64x128xf32, #tpu.memory_space<vmem>>, vector<8x128xf32>
    tpu.vector_store %arg8[%78, %c0_29], %77 {strides = array<i32>} : memref<64x128xf32, #tpu.memory_space<vmem>>, vector<8x128xf32>,
    %c2_i32 = arith.constant 2 : i32
    %c8_i32_30 = arith.constant 8 : i32
    %80 = arith.muli %c2_i32, %c8_i32_30 : i32
    %81 = tpu.assume_multiple %80, 8 : i32
    %82 = arith.index_cast %81 : i32 to index
    %c0_31 = arith.constant 0 : index
    %83 = vector.load %arg11[%82, %c0_31] : memref<64x512xf32, #tpu.memory_space<vmem>>, vector<8x512xf32>
    %c0_32 = arith.constant 0 : index
    %c0_33 = arith.constant 0 : index
    %84 = vector.load %arg4[%c0_32, %c0_33] : memref<128x512xf32, #tpu.memory_space<vmem>>, vector<128x512xf32>
    %cst_34 = arith.constant dense<0.000000e+00> : vector<8x512xf32>
    %85 = tpu.matmul %77, %84, %cst_34 {dimension_numbers = #tpu.dot_dimension_numbers<[1], [0], [0], [1], [0, 0, 1, 1], [], []>} : vector<8x128xf32>, vector<128x512xf32>, vector<8x512xf32> -> vector<8x512xf32>
    %86 = arith.addf %83, %85 : vector<8x512xf32>
    %87 = vector.extract_strided_slice %86 {offsets = [0, 0], sizes = [8, 128], strides = [1, 1]} : vector<8x512xf32> to vector<8x128xf32>
    %88 = arith.negf %87 : vector<8x128xf32>
    %89 = math.exp %88 : vector<8x128xf32>
    %cst_35 = arith.constant 1.000000e+00 : f32
    %90 = vector.broadcast %cst_35 : f32 to vector<8x128xf32>
    %91 = arith.addf %90, %89 : vector<8x128xf32>
    %92 = arith.divf %90, %91 : vector<8x128xf32>
    %93 = vector.extract_strided_slice %86 {offsets = [0, 128], sizes = [8, 128], strides = [1, 1]} : vector<8x512xf32> to vector<8x128xf32>
    %94 = arith.negf %93 : vector<8x128xf32>
    %95 = math.exp %94 : vector<8x128xf32>
    %cst_36 = arith.constant 1.000000e+00 : f32
    %96 = vector.broadcast %cst_36 : f32 to vector<8x128xf32>
    %97 = arith.addf %96, %95 : vector<8x128xf32>
    %98 = arith.divf %96, %97 : vector<8x128xf32>
    %99 = vector.extract_strided_slice %86 {offsets = [0, 256], sizes = [8, 128], strides = [1, 1]} : vector<8x512xf32> to vector<8x128xf32>
    %100 = math.tanh %99 : vector<8x128xf32>
    %101 = vector.extract_strided_slice %86 {offsets = [0, 384], sizes = [8, 128], strides = [1, 1]} : vector<8x512xf32> to vector<8x128xf32>
    %102 = arith.negf %101 : vector<8x128xf32>
    %103 = math.exp %102 : vector<8x128xf32>
    %cst_37 = arith.constant 1.000000e+00 : f32
    %104 = vector.broadcast %cst_37 : f32 to vector<8x128xf32>
    %105 = arith.addf %104, %103 : vector<8x128xf32>
    %106 = arith.divf %104, %105 : vector<8x128xf32>
    %107 = arith.mulf %98, %75 : vector<8x128xf32>
    %108 = arith.mulf %92, %100 : vector<8x128xf32>
    %109 = arith.addf %107, %108 : vector<8x128xf32>
    %110 = math.tanh %109 : vector<8x128xf32>
    %111 = arith.mulf %106, %110 : vector<8x128xf32>
    %112 = arith.index_cast %81 : i32 to index
    %c0_38 = arith.constant 0 : index
    %113 = vector.load %arg8[%112, %c0_38] : memref<64x128xf32, #tpu.memory_space<vmem>>, vector<8x128xf32>
    tpu.vector_store %arg8[%112, %c0_38], %111 {strides = array<i32>} : memref<64x128xf32, #tpu.memory_space<vmem>>, vector<8x128xf32>,
    %c3_i32 = arith.constant 3 : i32
    %c8_i32_39 = arith.constant 8 : i32
    %114 = arith.muli %c3_i32, %c8_i32_39 : i32
    %115 = tpu.assume_multiple %114, 8 : i32
    %116 = arith.index_cast %115 : i32 to index
    %c0_40 = arith.constant 0 : index
    %117 = vector.load %arg11[%116, %c0_40] : memref<64x512xf32, #tpu.memory_space<vmem>>, vector<8x512xf32>
    %c0_41 = arith.constant 0 : index
    %c0_42 = arith.constant 0 : index
    %118 = vector.load %arg4[%c0_41, %c0_42] : memref<128x512xf32, #tpu.memory_space<vmem>>, vector<128x512xf32>
    %cst_43 = arith.constant dense<0.000000e+00> : vector<8x512xf32>
    %119 = tpu.matmul %111, %118, %cst_43 {dimension_numbers = #tpu.dot_dimension_numbers<[1], [0], [0], [1], [0, 0, 1, 1], [], []>} : vector<8x128xf32>, vector<128x512xf32>, vector<8x512xf32> -> vector<8x512xf32>
    %120 = arith.addf %117, %119 : vector<8x512xf32>
    %121 = vector.extract_strided_slice %120 {offsets = [0, 0], sizes = [8, 128], strides = [1, 1]} : vector<8x512xf32> to vector<8x128xf32>
    %122 = arith.negf %121 : vector<8x128xf32>
    %123 = math.exp %122 : vector<8x128xf32>
    %cst_44 = arith.constant 1.000000e+00 : f32
    %124 = vector.broadcast %cst_44 : f32 to vector<8x128xf32>
    %125 = arith.addf %124, %123 : vector<8x128xf32>
    %126 = arith.divf %124, %125 : vector<8x128xf32>
    %127 = vector.extract_strided_slice %120 {offsets = [0, 128], sizes = [8, 128], strides = [1, 1]} : vector<8x512xf32> to vector<8x128xf32>
    %128 = arith.negf %127 : vector<8x128xf32>
    %129 = math.exp %128 : vector<8x128xf32>
    %cst_45 = arith.constant 1.000000e+00 : f32
    %130 = vector.broadcast %cst_45 : f32 to vector<8x128xf32>
    %131 = arith.addf %130, %129 : vector<8x128xf32>
    %132 = arith.divf %130, %131 : vector<8x128xf32>
    %133 = vector.extract_strided_slice %120 {offsets = [0, 256], sizes = [8, 128], strides = [1, 1]} : vector<8x512xf32> to vector<8x128xf32>
    %134 = math.tanh %133 : vector<8x128xf32>
    %135 = vector.extract_strided_slice %120 {offsets = [0, 384], sizes = [8, 128], strides = [1, 1]} : vector<8x512xf32> to vector<8x128xf32>
    %136 = arith.negf %135 : vector<8x128xf32>
    %137 = math.exp %136 : vector<8x128xf32>
    %cst_46 = arith.constant 1.000000e+00 : f32
    %138 = vector.broadcast %cst_46 : f32 to vector<8x128xf32>
    %139 = arith.addf %138, %137 : vector<8x128xf32>
    %140 = arith.divf %138, %139 : vector<8x128xf32>
    %141 = arith.mulf %132, %109 : vector<8x128xf32>
    %142 = arith.mulf %126, %134 : vector<8x128xf32>
    %143 = arith.addf %141, %142 : vector<8x128xf32>
    %144 = math.tanh %143 : vector<8x128xf32>
    %145 = arith.mulf %140, %144 : vector<8x128xf32>
    %146 = arith.index_cast %115 : i32 to index
    %c0_47 = arith.constant 0 : index
    %147 = vector.load %arg8[%146, %c0_47] : memref<64x128xf32, #tpu.memory_space<vmem>>, vector<8x128xf32>
    tpu.vector_store %arg8[%146, %c0_47], %145 {strides = array<i32>} : memref<64x128xf32, #tpu.memory_space<vmem>>, vector<8x128xf32>,
    %c4_i32 = arith.constant 4 : i32
    %c8_i32_48 = arith.constant 8 : i32
    %148 = arith.muli %c4_i32, %c8_i32_48 : i32
    %149 = tpu.assume_multiple %148, 8 : i32
    %150 = arith.index_cast %149 : i32 to index
    %c0_49 = arith.constant 0 : index
    %151 = vector.load %arg11[%150, %c0_49] : memref<64x512xf32, #tpu.memory_space<vmem>>, vector<8x512xf32>
    %c0_50 = arith.constant 0 : index
    %c0_51 = arith.constant 0 : index
    %152 = vector.load %arg4[%c0_50, %c0_51] : memref<128x512xf32, #tpu.memory_space<vmem>>, vector<128x512xf32>
    %cst_52 = arith.constant dense<0.000000e+00> : vector<8x512xf32>
    %153 = tpu.matmul %145, %152, %cst_52 {dimension_numbers = #tpu.dot_dimension_numbers<[1], [0], [0], [1], [0, 0, 1, 1], [], []>} : vector<8x128xf32>, vector<128x512xf32>, vector<8x512xf32> -> vector<8x512xf32>
    %154 = arith.addf %151, %153 : vector<8x512xf32>
    %155 = vector.extract_strided_slice %154 {offsets = [0, 0], sizes = [8, 128], strides = [1, 1]} : vector<8x512xf32> to vector<8x128xf32>
    %156 = arith.negf %155 : vector<8x128xf32>
    %157 = math.exp %156 : vector<8x128xf32>
    %cst_53 = arith.constant 1.000000e+00 : f32
    %158 = vector.broadcast %cst_53 : f32 to vector<8x128xf32>
    %159 = arith.addf %158, %157 : vector<8x128xf32>
    %160 = arith.divf %158, %159 : vector<8x128xf32>
    %161 = vector.extract_strided_slice %154 {offsets = [0, 128], sizes = [8, 128], strides = [1, 1]} : vector<8x512xf32> to vector<8x128xf32>
    %162 = arith.negf %161 : vector<8x128xf32>
    %163 = math.exp %162 : vector<8x128xf32>
    %cst_54 = arith.constant 1.000000e+00 : f32
    %164 = vector.broadcast %cst_54 : f32 to vector<8x128xf32>
    %165 = arith.addf %164, %163 : vector<8x128xf32>
    %166 = arith.divf %164, %165 : vector<8x128xf32>
    %167 = vector.extract_strided_slice %154 {offsets = [0, 256], sizes = [8, 128], strides = [1, 1]} : vector<8x512xf32> to vector<8x128xf32>
    %168 = math.tanh %167 : vector<8x128xf32>
    %169 = vector.extract_strided_slice %154 {offsets = [0, 384], sizes = [8, 128], strides = [1, 1]} : vector<8x512xf32> to vector<8x128xf32>
    %170 = arith.negf %169 : vector<8x128xf32>
    %171 = math.exp %170 : vector<8x128xf32>
    %cst_55 = arith.constant 1.000000e+00 : f32
    %172 = vector.broadcast %cst_55 : f32 to vector<8x128xf32>
    %173 = arith.addf %172, %171 : vector<8x128xf32>
    %174 = arith.divf %172, %173 : vector<8x128xf32>
    %175 = arith.mulf %166, %143 : vector<8x128xf32>
    %176 = arith.mulf %160, %168 : vector<8x128xf32>
    %177 = arith.addf %175, %176 : vector<8x128xf32>
    %178 = math.tanh %177 : vector<8x128xf32>
    %179 = arith.mulf %174, %178 : vector<8x128xf32>
    %180 = arith.index_cast %149 : i32 to index
    %c0_56 = arith.constant 0 : index
    %181 = vector.load %arg8[%180, %c0_56] : memref<64x128xf32, #tpu.memory_space<vmem>>, vector<8x128xf32>
    tpu.vector_store %arg8[%180, %c0_56], %179 {strides = array<i32>} : memref<64x128xf32, #tpu.memory_space<vmem>>, vector<8x128xf32>,
    %c5_i32 = arith.constant 5 : i32
    %c8_i32_57 = arith.constant 8 : i32
    %182 = arith.muli %c5_i32, %c8_i32_57 : i32
    %183 = tpu.assume_multiple %182, 8 : i32
    %184 = arith.index_cast %183 : i32 to index
    %c0_58 = arith.constant 0 : index
    %185 = vector.load %arg11[%184, %c0_58] : memref<64x512xf32, #tpu.memory_space<vmem>>, vector<8x512xf32>
    %c0_59 = arith.constant 0 : index
    %c0_60 = arith.constant 0 : index
    %186 = vector.load %arg4[%c0_59, %c0_60] : memref<128x512xf32, #tpu.memory_space<vmem>>, vector<128x512xf32>
    %cst_61 = arith.constant dense<0.000000e+00> : vector<8x512xf32>
    %187 = tpu.matmul %179, %186, %cst_61 {dimension_numbers = #tpu.dot_dimension_numbers<[1], [0], [0], [1], [0, 0, 1, 1], [], []>} : vector<8x128xf32>, vector<128x512xf32>, vector<8x512xf32> -> vector<8x512xf32>
    %188 = arith.addf %185, %187 : vector<8x512xf32>
    %189 = vector.extract_strided_slice %188 {offsets = [0, 0], sizes = [8, 128], strides = [1, 1]} : vector<8x512xf32> to vector<8x128xf32>
    %190 = arith.negf %189 : vector<8x128xf32>
    %191 = math.exp %190 : vector<8x128xf32>
    %cst_62 = arith.constant 1.000000e+00 : f32
    %192 = vector.broadcast %cst_62 : f32 to vector<8x128xf32>
    %193 = arith.addf %192, %191 : vector<8x128xf32>
    %194 = arith.divf %192, %193 : vector<8x128xf32>
    %195 = vector.extract_strided_slice %188 {offsets = [0, 128], sizes = [8, 128], strides = [1, 1]} : vector<8x512xf32> to vector<8x128xf32>
    %196 = arith.negf %195 : vector<8x128xf32>
    %197 = math.exp %196 : vector<8x128xf32>
    %cst_63 = arith.constant 1.000000e+00 : f32
    %198 = vector.broadcast %cst_63 : f32 to vector<8x128xf32>
    %199 = arith.addf %198, %197 : vector<8x128xf32>
    %200 = arith.divf %198, %199 : vector<8x128xf32>
    %201 = vector.extract_strided_slice %188 {offsets = [0, 256], sizes = [8, 128], strides = [1, 1]} : vector<8x512xf32> to vector<8x128xf32>
    %202 = math.tanh %201 : vector<8x128xf32>
    %203 = vector.extract_strided_slice %188 {offsets = [0, 384], sizes = [8, 128], strides = [1, 1]} : vector<8x512xf32> to vector<8x128xf32>
    %204 = arith.negf %203 : vector<8x128xf32>
    %205 = math.exp %204 : vector<8x128xf32>
    %cst_64 = arith.constant 1.000000e+00 : f32
    %206 = vector.broadcast %cst_64 : f32 to vector<8x128xf32>
    %207 = arith.addf %206, %205 : vector<8x128xf32>
    %208 = arith.divf %206, %207 : vector<8x128xf32>
    %209 = arith.mulf %200, %177 : vector<8x128xf32>
    %210 = arith.mulf %194, %202 : vector<8x128xf32>
    %211 = arith.addf %209, %210 : vector<8x128xf32>
    %212 = math.tanh %211 : vector<8x128xf32>
    %213 = arith.mulf %208, %212 : vector<8x128xf32>
    %214 = arith.index_cast %183 : i32 to index
    %c0_65 = arith.constant 0 : index
    %215 = vector.load %arg8[%214, %c0_65] : memref<64x128xf32, #tpu.memory_space<vmem>>, vector<8x128xf32>
    tpu.vector_store %arg8[%214, %c0_65], %213 {strides = array<i32>} : memref<64x128xf32, #tpu.memory_space<vmem>>, vector<8x128xf32>,
    %c6_i32 = arith.constant 6 : i32
    %c8_i32_66 = arith.constant 8 : i32
    %216 = arith.muli %c6_i32, %c8_i32_66 : i32
    %217 = tpu.assume_multiple %216, 8 : i32
    %218 = arith.index_cast %217 : i32 to index
    %c0_67 = arith.constant 0 : index
    %219 = vector.load %arg11[%218, %c0_67] : memref<64x512xf32, #tpu.memory_space<vmem>>, vector<8x512xf32>
    %c0_68 = arith.constant 0 : index
    %c0_69 = arith.constant 0 : index
    %220 = vector.load %arg4[%c0_68, %c0_69] : memref<128x512xf32, #tpu.memory_space<vmem>>, vector<128x512xf32>
    %cst_70 = arith.constant dense<0.000000e+00> : vector<8x512xf32>
    %221 = tpu.matmul %213, %220, %cst_70 {dimension_numbers = #tpu.dot_dimension_numbers<[1], [0], [0], [1], [0, 0, 1, 1], [], []>} : vector<8x128xf32>, vector<128x512xf32>, vector<8x512xf32> -> vector<8x512xf32>
    %222 = arith.addf %219, %221 : vector<8x512xf32>
    %223 = vector.extract_strided_slice %222 {offsets = [0, 0], sizes = [8, 128], strides = [1, 1]} : vector<8x512xf32> to vector<8x128xf32>
    %224 = arith.negf %223 : vector<8x128xf32>
    %225 = math.exp %224 : vector<8x128xf32>
    %cst_71 = arith.constant 1.000000e+00 : f32
    %226 = vector.broadcast %cst_71 : f32 to vector<8x128xf32>
    %227 = arith.addf %226, %225 : vector<8x128xf32>
    %228 = arith.divf %226, %227 : vector<8x128xf32>
    %229 = vector.extract_strided_slice %222 {offsets = [0, 128], sizes = [8, 128], strides = [1, 1]} : vector<8x512xf32> to vector<8x128xf32>
    %230 = arith.negf %229 : vector<8x128xf32>
    %231 = math.exp %230 : vector<8x128xf32>
    %cst_72 = arith.constant 1.000000e+00 : f32
    %232 = vector.broadcast %cst_72 : f32 to vector<8x128xf32>
    %233 = arith.addf %232, %231 : vector<8x128xf32>
    %234 = arith.divf %232, %233 : vector<8x128xf32>
    %235 = vector.extract_strided_slice %222 {offsets = [0, 256], sizes = [8, 128], strides = [1, 1]} : vector<8x512xf32> to vector<8x128xf32>
    %236 = math.tanh %235 : vector<8x128xf32>
    %237 = vector.extract_strided_slice %222 {offsets = [0, 384], sizes = [8, 128], strides = [1, 1]} : vector<8x512xf32> to vector<8x128xf32>
    %238 = arith.negf %237 : vector<8x128xf32>
    %239 = math.exp %238 : vector<8x128xf32>
    %cst_73 = arith.constant 1.000000e+00 : f32
    %240 = vector.broadcast %cst_73 : f32 to vector<8x128xf32>
    %241 = arith.addf %240, %239 : vector<8x128xf32>
    %242 = arith.divf %240, %241 : vector<8x128xf32>
    %243 = arith.mulf %234, %211 : vector<8x128xf32>
    %244 = arith.mulf %228, %236 : vector<8x128xf32>
    %245 = arith.addf %243, %244 : vector<8x128xf32>
    %246 = math.tanh %245 : vector<8x128xf32>
    %247 = arith.mulf %242, %246 : vector<8x128xf32>
    %248 = arith.index_cast %217 : i32 to index
    %c0_74 = arith.constant 0 : index
    %249 = vector.load %arg8[%248, %c0_74] : memref<64x128xf32, #tpu.memory_space<vmem>>, vector<8x128xf32>
    tpu.vector_store %arg8[%248, %c0_74], %247 {strides = array<i32>} : memref<64x128xf32, #tpu.memory_space<vmem>>, vector<8x128xf32>,
    %c7_i32 = arith.constant 7 : i32
    %c8_i32_75 = arith.constant 8 : i32
    %250 = arith.muli %c7_i32, %c8_i32_75 : i32
    %251 = tpu.assume_multiple %250, 8 : i32
    %252 = arith.index_cast %251 : i32 to index
    %c0_76 = arith.constant 0 : index
    %253 = vector.load %arg11[%252, %c0_76] : memref<64x512xf32, #tpu.memory_space<vmem>>, vector<8x512xf32>
    %c0_77 = arith.constant 0 : index
    %c0_78 = arith.constant 0 : index
    %254 = vector.load %arg4[%c0_77, %c0_78] : memref<128x512xf32, #tpu.memory_space<vmem>>, vector<128x512xf32>
    %cst_79 = arith.constant dense<0.000000e+00> : vector<8x512xf32>
    %255 = tpu.matmul %247, %254, %cst_79 {dimension_numbers = #tpu.dot_dimension_numbers<[1], [0], [0], [1], [0, 0, 1, 1], [], []>} : vector<8x128xf32>, vector<128x512xf32>, vector<8x512xf32> -> vector<8x512xf32>
    %256 = arith.addf %253, %255 : vector<8x512xf32>
    %257 = vector.extract_strided_slice %256 {offsets = [0, 0], sizes = [8, 128], strides = [1, 1]} : vector<8x512xf32> to vector<8x128xf32>
    %258 = arith.negf %257 : vector<8x128xf32>
    %259 = math.exp %258 : vector<8x128xf32>
    %cst_80 = arith.constant 1.000000e+00 : f32
    %260 = vector.broadcast %cst_80 : f32 to vector<8x128xf32>
    %261 = arith.addf %260, %259 : vector<8x128xf32>
    %262 = arith.divf %260, %261 : vector<8x128xf32>
    %263 = vector.extract_strided_slice %256 {offsets = [0, 128], sizes = [8, 128], strides = [1, 1]} : vector<8x512xf32> to vector<8x128xf32>
    %264 = arith.negf %263 : vector<8x128xf32>
    %265 = math.exp %264 : vector<8x128xf32>
    %cst_81 = arith.constant 1.000000e+00 : f32
    %266 = vector.broadcast %cst_81 : f32 to vector<8x128xf32>
    %267 = arith.addf %266, %265 : vector<8x128xf32>
    %268 = arith.divf %266, %267 : vector<8x128xf32>
    %269 = vector.extract_strided_slice %256 {offsets = [0, 256], sizes = [8, 128], strides = [1, 1]} : vector<8x512xf32> to vector<8x128xf32>
    %270 = math.tanh %269 : vector<8x128xf32>
    %271 = vector.extract_strided_slice %256 {offsets = [0, 384], sizes = [8, 128], strides = [1, 1]} : vector<8x512xf32> to vector<8x128xf32>
    %272 = arith.negf %271 : vector<8x128xf32>
    %273 = math.exp %272 : vector<8x128xf32>
    %cst_82 = arith.constant 1.000000e+00 : f32
    %274 = vector.broadcast %cst_82 : f32 to vector<8x128xf32>
    %275 = arith.addf %274, %273 : vector<8x128xf32>
    %276 = arith.divf %274, %275 : vector<8x128xf32>
    %277 = arith.mulf %268, %245 : vector<8x128xf32>
    %278 = arith.mulf %262, %270 : vector<8x128xf32>
    %279 = arith.addf %277, %278 : vector<8x128xf32>
    %280 = math.tanh %279 : vector<8x128xf32>
    %281 = arith.mulf %276, %280 : vector<8x128xf32>
    %282 = arith.index_cast %251 : i32 to index
    %c0_83 = arith.constant 0 : index
    %283 = vector.load %arg8[%282, %c0_83] : memref<64x128xf32, #tpu.memory_space<vmem>>, vector<8x128xf32>
    tpu.vector_store %arg8[%282, %c0_83], %281 {strides = array<i32>} : memref<64x128xf32, #tpu.memory_space<vmem>>, vector<8x128xf32>,
    %c8_i32_84 = arith.constant 8 : i32
    %c0_85 = arith.constant 0 : index
    %c0_86 = arith.constant 0 : index
    %284 = vector.load %arg9[%c0_85, %c0_86] : memref<8x128xf32, #tpu.memory_space<vmem>>, vector<8x128xf32>
    tpu.vector_store %arg9[%c0_85, %c0_86], %281 {strides = array<i32>} : memref<8x128xf32, #tpu.memory_space<vmem>>, vector<8x128xf32>,
    %c0_87 = arith.constant 0 : index
    %c0_88 = arith.constant 0 : index
    %285 = vector.load %arg10[%c0_87, %c0_88] : memref<8x128xf32, #tpu.memory_space<vmem>>, vector<8x128xf32>
    tpu.vector_store %arg10[%c0_87, %c0_88], %279 {strides = array<i32>} : memref<8x128xf32, #tpu.memory_space<vmem>>, vector<8x128xf32>,
    return
  }
  func.func @transform_0(%arg0: i32, %arg1: i32) -> (i32, i32) {
    %c1_i32 = arith.constant 1 : i32
    %0 = arith.muli %arg0, %c1_i32 : i32
    %1 = arith.addi %0, %arg1 : i32
    %c0_i32 = arith.constant 0 : i32
    %c0_i32_0 = arith.constant 0 : i32
    return %1, %c0_i32 : i32, i32
  }
  func.func @transform_1(%arg0: i32, %arg1: i32) -> (i32, i32) {
    %c0_i32 = arith.constant 0 : i32
    %c0_i32_0 = arith.constant 0 : i32
    %c0_i32_1 = arith.constant 0 : i32
    return %c0_i32, %c0_i32_0 : i32, i32
  }
  func.func @transform_2(%arg0: i32, %arg1: i32) -> (i32, i32) {
    %c0_i32 = arith.constant 0 : i32
    %c0_i32_0 = arith.constant 0 : i32
    %c0_i32_1 = arith.constant 0 : i32
    return %c0_i32, %c0_i32_0 : i32, i32
  }
  func.func @transform_3(%arg0: i32, %arg1: i32) -> (i32, i32) {
    %c0_i32 = arith.constant 0 : i32
    %c0_i32_0 = arith.constant 0 : i32
    %c0_i32_1 = arith.constant 0 : i32
    return %c0_i32, %c0_i32_0 : i32, i32
  }
  func.func @transform_4(%arg0: i32, %arg1: i32) -> (i32, i32) {
    %c0_i32 = arith.constant 0 : i32
    %c0_i32_0 = arith.constant 0 : i32
    return %arg0, %c0_i32 : i32, i32
  }
  func.func @transform_5(%arg0: i32, %arg1: i32) -> (i32, i32) {
    %c0_i32 = arith.constant 0 : i32
    %c0_i32_0 = arith.constant 0 : i32
    return %arg0, %c0_i32 : i32, i32
  }
  func.func @transform_6(%arg0: i32, %arg1: i32) -> (i32, i32) {
    %c1_i32 = arith.constant 1 : i32
    %0 = arith.muli %arg0, %c1_i32 : i32
    %1 = arith.addi %0, %arg1 : i32
    %c0_i32 = arith.constant 0 : i32
    %c0_i32_0 = arith.constant 0 : i32
    return %1, %c0_i32 : i32, i32
  }
}

module attributes {stable_mosaic.version = 11 : i64} {
  func.func @_lstm_fused_kernel(%arg0: i32, %arg1: i32, %arg2: memref<64x128xf32, #tpu.memory_space<vmem>>, %arg3: memref<128x512xf32, #tpu.memory_space<vmem>>, %arg4: memref<128x512xf32, #tpu.memory_space<vmem>>, %arg5: memref<1x512xf32, #tpu.memory_space<vmem>>, %arg6: memref<8x128xf32, #tpu.memory_space<vmem>>, %arg7: memref<8x128xf32, #tpu.memory_space<vmem>>, %arg8: memref<64x128xf32, #tpu.memory_space<vmem>>, %arg9: memref<8x128xf32, #tpu.memory_space<vmem>>, %arg10: memref<8x128xf32, #tpu.memory_space<vmem>>, %arg11: memref<64x512xf32, #tpu.memory_space<vmem>>) attributes {dimension_semantics = [#tpu.dimension_semantics<parallel>, #tpu.dimension_semantics<arbitrary>], iteration_bounds = array<i64: 1, 1>, scalar_prefetch = 0 : i64, scratch_operands = 3 : i64, tpu.core_type = #tpu.core_type<tc>, window_params = [{transform_indices = @transform_0, window_bounds = array<i64: 64, 128>}, {pipeline_mode = #tpu.pipeline_mode<synchronous>, transform_indices = @transform_1, window_bounds = array<i64: 128, 512>}, {pipeline_mode = #tpu.pipeline_mode<synchronous>, transform_indices = @transform_2, window_bounds = array<i64: 128, 512>}, {pipeline_mode = #tpu.pipeline_mode<synchronous>, transform_indices = @transform_3, window_bounds = array<i64: 1, 512>}, {transform_indices = @transform_4, window_bounds = array<i64: 8, 128>}, {transform_indices = @transform_5, window_bounds = array<i64: 8, 128>}, {transform_indices = @transform_6, window_bounds = array<i64: 64, 128>}]} {
    %c0_i32 = arith.constant 0 : i32
    %0 = arith.cmpi eq, %arg1, %c0_i32 : i32
    %1 = arith.extui %0 : i1 to i32
    %c0_i32_0 = arith.constant 0 : i32
    %2 = arith.cmpi ne, %1, %c0_i32_0 : i32
    scf.if %2 {
      %c0_89 = arith.constant 0 : index
      %c0_90 = arith.constant 0 : index
      %286 = vector.load %arg6[%c0_89, %c0_90] : memref<8x128xf32, #tpu.memory_space<vmem>>, vector<8x128xf32>
      %c0_91 = arith.constant 0 : index
      %c0_92 = arith.constant 0 : index
      %287 = vector.load %arg9[%c0_91, %c0_92] : memref<8x128xf32, #tpu.memory_space<vmem>>, vector<8x128xf32>
      tpu.vector_store %arg9[%c0_91, %c0_92], %286 {strides = array<i32>} : memref<8x128xf32, #tpu.memory_space<vmem>>, vector<8x128xf32>,
      %c0_93 = arith.constant 0 : index
      %c0_94 = arith.constant 0 : index
      %288 = vector.load %arg7[%c0_93, %c0_94] : memref<8x128xf32, #tpu.memory_space<vmem>>, vector<8x128xf32>
      %c0_95 = arith.constant 0 : index
      %c0_96 = arith.constant 0 : index
      %289 = vector.load %arg10[%c0_95, %c0_96] : memref<8x128xf32, #tpu.memory_space<vmem>>, vector<8x128xf32>
      tpu.vector_store %arg10[%c0_95, %c0_96], %288 {strides = array<i32>} : memref<8x128xf32, #tpu.memory_space<vmem>>, vector<8x128xf32>,
    } else {
    }
    %c0 = arith.constant 0 : index
    %c0_1 = arith.constant 0 : index
    %3 = vector.load %arg2[%c0, %c0_1] : memref<64x128xf32, #tpu.memory_space<vmem>>, vector<64x128xf32>
    %c0_2 = arith.constant 0 : index
    %c0_3 = arith.constant 0 : index
    %4 = vector.load %arg3[%c0_2, %c0_3] : memref<128x512xf32, #tpu.memory_space<vmem>>, vector<128x512xf32>
    %cst = arith.constant dense<0.000000e+00> : vector<64x512xf32>
    %5 = tpu.matmul %3, %4, %cst {dimension_numbers = #tpu.dot_dimension_numbers<[1], [0], [0], [1], [0, 0, 1, 1], [], []>} : vector<64x128xf32>, vector<128x512xf32>, vector<64x512xf32> -> vector<64x512xf32>
    %c0_4 = arith.constant 0 : index
    %c0_5 = arith.constant 0 : index
    %6 = vector.load %arg5[%c0_4, %c0_5] : memref<1x512xf32, #tpu.memory_space<vmem>>, vector<1x512xf32>
    %7 = vector.broadcast %6 : vector<1x512xf32> to vector<64x512xf32>
    %8 = arith.addf %5, %7 : vector<64x512xf32>
    %c0_6 = arith.constant 0 : index
    %c0_7 = arith.constant 0 : index
    %9 = vector.load %arg11[%c0_6, %c0_7] : memref<64x512xf32, #tpu.memory_space<vmem>>, vector<64x512xf32>
    tpu.vector_store %arg11[%c0_6, %c0_7], %8 {strides = array<i32>} : memref<64x512xf32, #tpu.memory_space<vmem>>, vector<64x512xf32>,
    %c0_8 = arith.constant 0 : index
    %c0_9 = arith.constant 0 : index
    %10 = vector.load %arg9[%c0_8, %c0_9] : memref<8x128xf32, #tpu.memory_space<vmem>>, vector<8x128xf32>
    %c0_10 = arith.constant 0 : index
    %c0_11 = arith.constant 0 : index
    %11 = vector.load %arg10[%c0_10, %c0_11] : memref<8x128xf32, #tpu.memory_space<vmem>>, vector<8x128xf32>
    %c0_i32_12 = arith.constant 0 : i32
    %c8_i32 = arith.constant 8 : i32
    %12 = arith.muli %c0_i32_12, %c8_i32 : i32
    %13 = tpu.assume_multiple %12, 8 : i32
    %14 = arith.index_cast %13 : i32 to index
    %c0_13 = arith.constant 0 : index
    %15 = vector.load %arg11[%14, %c0_13] : memref<64x512xf32, #tpu.memory_space<vmem>>, vector<8x512xf32>
    %c0_14 = arith.constant 0 : index
    %c0_15 = arith.constant 0 : index
    %16 = vector.load %arg4[%c0_14, %c0_15] : memref<128x512xf32, #tpu.memory_space<vmem>>, vector<128x512xf32>
    %cst_16 = arith.constant dense<0.000000e+00> : vector<8x512xf32>
    %17 = tpu.matmul %10, %16, %cst_16 {dimension_numbers = #tpu.dot_dimension_numbers<[1], [0], [0], [1], [0, 0, 1, 1], [], []>} : vector<8x128xf32>, vector<128x512xf32>, vector<8x512xf32> -> vector<8x512xf32>
    %18 = arith.addf %15, %17 : vector<8x512xf32>
    %19 = vector.extract_strided_slice %18 {offsets = [0, 0], sizes = [8, 128], strides = [1, 1]} : vector<8x512xf32> to vector<8x128xf32>
    %20 = arith.negf %19 : vector<8x128xf32>
    %21 = math.exp %20 : vector<8x128xf32>
    %cst_17 = arith.constant 1.000000e+00 : f32
    %22 = vector.broadcast %cst_17 : f32 to vector<8x128xf32>
    %23 = arith.addf %22, %21 : vector<8x128xf32>
    %24 = arith.divf %22, %23 : vector<8x128xf32>
    %25 = vector.extract_strided_slice %18 {offsets = [0, 128], sizes = [8, 128], strides = [1, 1]} : vector<8x512xf32> to vector<8x128xf32>
    %26 = arith.negf %25 : vector<8x128xf32>
    %27 = math.exp %26 : vector<8x128xf32>
    %cst_18 = arith.constant 1.000000e+00 : f32
    %28 = vector.broadcast %cst_18 : f32 to vector<8x128xf32>
    %29 = arith.addf %28, %27 : vector<8x128xf32>
    %30 = arith.divf %28, %29 : vector<8x128xf32>
    %31 = vector.extract_strided_slice %18 {offsets = [0, 256], sizes = [8, 128], strides = [1, 1]} : vector<8x512xf32> to vector<8x128xf32>
    %32 = math.tanh %31 : vector<8x128xf32>
    %33 = vector.extract_strided_slice %18 {offsets = [0, 384], sizes = [8, 128], strides = [1, 1]} : vector<8x512xf32> to vector<8x128xf32>
    %34 = arith.negf %33 : vector<8x128xf32>
    %35 = math.exp %34 : vector<8x128xf32>
    %cst_19 = arith.constant 1.000000e+00 : f32
    %36 = vector.broadcast %cst_19 : f32 to vector<8x128xf32>
    %37 = arith.addf %36, %35 : vector<8x128xf32>
    %38 = arith.divf %36, %37 : vector<8x128xf32>
    %39 = arith.mulf %30, %11 : vector<8x128xf32>
    %40 = arith.mulf %24, %32 : vector<8x128xf32>
    %41 = arith.addf %39, %40 : vector<8x128xf32>
    %42 = math.tanh %41 : vector<8x128xf32>
    %43 = arith.mulf %38, %42 : vector<8x128xf32>
    %44 = arith.index_cast %13 : i32 to index
    %c0_20 = arith.constant 0 : index
    %45 = vector.load %arg8[%44, %c0_20] : memref<64x128xf32, #tpu.memory_space<vmem>>, vector<8x128xf32>
    tpu.vector_store %arg8[%44, %c0_20], %43 {strides = array<i32>} : memref<64x128xf32, #tpu.memory_space<vmem>>, vector<8x128xf32>,
    %c1_i32 = arith.constant 1 : i32
    %c8_i32_21 = arith.constant 8 : i32
    %46 = arith.muli %c1_i32, %c8_i32_21 : i32
    %47 = tpu.assume_multiple %46, 8 : i32
    %48 = arith.index_cast %47 : i32 to index
    %c0_22 = arith.constant 0 : index
    %49 = vector.load %arg11[%48, %c0_22] : memref<64x512xf32, #tpu.memory_space<vmem>>, vector<8x512xf32>
    %c0_23 = arith.constant 0 : index
    %c0_24 = arith.constant 0 : index
    %50 = vector.load %arg4[%c0_23, %c0_24] : memref<128x512xf32, #tpu.memory_space<vmem>>, vector<128x512xf32>
    %cst_25 = arith.constant dense<0.000000e+00> : vector<8x512xf32>
    %51 = tpu.matmul %43, %50, %cst_25 {dimension_numbers = #tpu.dot_dimension_numbers<[1], [0], [0], [1], [0, 0, 1, 1], [], []>} : vector<8x128xf32>, vector<128x512xf32>, vector<8x512xf32> -> vector<8x512xf32>
    %52 = arith.addf %49, %51 : vector<8x512xf32>
    %53 = vector.extract_strided_slice %52 {offsets = [0, 0], sizes = [8, 128], strides = [1, 1]} : vector<8x512xf32> to vector<8x128xf32>
    %54 = arith.negf %53 : vector<8x128xf32>
    %55 = math.exp %54 : vector<8x128xf32>
    %cst_26 = arith.constant 1.000000e+00 : f32
    %56 = vector.broadcast %cst_26 : f32 to vector<8x128xf32>
    %57 = arith.addf %56, %55 : vector<8x128xf32>
    %58 = arith.divf %56, %57 : vector<8x128xf32>
    %59 = vector.extract_strided_slice %52 {offsets = [0, 128], sizes = [8, 128], strides = [1, 1]} : vector<8x512xf32> to vector<8x128xf32>
    %60 = arith.negf %59 : vector<8x128xf32>
    %61 = math.exp %60 : vector<8x128xf32>
    %cst_27 = arith.constant 1.000000e+00 : f32
    %62 = vector.broadcast %cst_27 : f32 to vector<8x128xf32>
    %63 = arith.addf %62, %61 : vector<8x128xf32>
    %64 = arith.divf %62, %63 : vector<8x128xf32>
    %65 = vector.extract_strided_slice %52 {offsets = [0, 256], sizes = [8, 128], strides = [1, 1]} : vector<8x512xf32> to vector<8x128xf32>
    %66 = math.tanh %65 : vector<8x128xf32>
    %67 = vector.extract_strided_slice %52 {offsets = [0, 384], sizes = [8, 128], strides = [1, 1]} : vector<8x512xf32> to vector<8x128xf32>
    %68 = arith.negf %67 : vector<8x128xf32>
    %69 = math.exp %68 : vector<8x128xf32>
    %cst_28 = arith.constant 1.000000e+00 : f32
    %70 = vector.broadcast %cst_28 : f32 to vector<8x128xf32>
    %71 = arith.addf %70, %69 : vector<8x128xf32>
    %72 = arith.divf %70, %71 : vector<8x128xf32>
    %73 = arith.mulf %64, %41 : vector<8x128xf32>
    %74 = arith.mulf %58, %66 : vector<8x128xf32>
    %75 = arith.addf %73, %74 : vector<8x128xf32>
    %76 = math.tanh %75 : vector<8x128xf32>
    %77 = arith.mulf %72, %76 : vector<8x128xf32>
    %78 = arith.index_cast %47 : i32 to index
    %c0_29 = arith.constant 0 : index
    %79 = vector.load %arg8[%78, %c0_29] : memref<64x128xf32, #tpu.memory_space<vmem>>, vector<8x128xf32>
    tpu.vector_store %arg8[%78, %c0_29], %77 {strides = array<i32>} : memref<64x128xf32, #tpu.memory_space<vmem>>, vector<8x128xf32>,
    %c2_i32 = arith.constant 2 : i32
    %c8_i32_30 = arith.constant 8 : i32
    %80 = arith.muli %c2_i32, %c8_i32_30 : i32
    %81 = tpu.assume_multiple %80, 8 : i32
    %82 = arith.index_cast %81 : i32 to index
    %c0_31 = arith.constant 0 : index
    %83 = vector.load %arg11[%82, %c0_31] : memref<64x512xf32, #tpu.memory_space<vmem>>, vector<8x512xf32>
    %c0_32 = arith.constant 0 : index
    %c0_33 = arith.constant 0 : index
    %84 = vector.load %arg4[%c0_32, %c0_33] : memref<128x512xf32, #tpu.memory_space<vmem>>, vector<128x512xf32>
    %cst_34 = arith.constant dense<0.000000e+00> : vector<8x512xf32>
    %85 = tpu.matmul %77, %84, %cst_34 {dimension_numbers = #tpu.dot_dimension_numbers<[1], [0], [0], [1], [0, 0, 1, 1], [], []>} : vector<8x128xf32>, vector<128x512xf32>, vector<8x512xf32> -> vector<8x512xf32>
    %86 = arith.addf %83, %85 : vector<8x512xf32>
    %87 = vector.extract_strided_slice %86 {offsets = [0, 0], sizes = [8, 128], strides = [1, 1]} : vector<8x512xf32> to vector<8x128xf32>
    %88 = arith.negf %87 : vector<8x128xf32>
    %89 = math.exp %88 : vector<8x128xf32>
    %cst_35 = arith.constant 1.000000e+00 : f32
    %90 = vector.broadcast %cst_35 : f32 to vector<8x128xf32>
    %91 = arith.addf %90, %89 : vector<8x128xf32>
    %92 = arith.divf %90, %91 : vector<8x128xf32>
    %93 = vector.extract_strided_slice %86 {offsets = [0, 128], sizes = [8, 128], strides = [1, 1]} : vector<8x512xf32> to vector<8x128xf32>
    %94 = arith.negf %93 : vector<8x128xf32>
    %95 = math.exp %94 : vector<8x128xf32>
    %cst_36 = arith.constant 1.000000e+00 : f32
    %96 = vector.broadcast %cst_36 : f32 to vector<8x128xf32>
    %97 = arith.addf %96, %95 : vector<8x128xf32>
    %98 = arith.divf %96, %97 : vector<8x128xf32>
    %99 = vector.extract_strided_slice %86 {offsets = [0, 256], sizes = [8, 128], strides = [1, 1]} : vector<8x512xf32> to vector<8x128xf32>
    %100 = math.tanh %99 : vector<8x128xf32>
    %101 = vector.extract_strided_slice %86 {offsets = [0, 384], sizes = [8, 128], strides = [1, 1]} : vector<8x512xf32> to vector<8x128xf32>
    %102 = arith.negf %101 : vector<8x128xf32>
    %103 = math.exp %102 : vector<8x128xf32>
    %cst_37 = arith.constant 1.000000e+00 : f32
    %104 = vector.broadcast %cst_37 : f32 to vector<8x128xf32>
    %105 = arith.addf %104, %103 : vector<8x128xf32>
    %106 = arith.divf %104, %105 : vector<8x128xf32>
    %107 = arith.mulf %98, %75 : vector<8x128xf32>
    %108 = arith.mulf %92, %100 : vector<8x128xf32>
    %109 = arith.addf %107, %108 : vector<8x128xf32>
    %110 = math.tanh %109 : vector<8x128xf32>
    %111 = arith.mulf %106, %110 : vector<8x128xf32>
    %112 = arith.index_cast %81 : i32 to index
    %c0_38 = arith.constant 0 : index
    %113 = vector.load %arg8[%112, %c0_38] : memref<64x128xf32, #tpu.memory_space<vmem>>, vector<8x128xf32>
    tpu.vector_store %arg8[%112, %c0_38], %111 {strides = array<i32>} : memref<64x128xf32, #tpu.memory_space<vmem>>, vector<8x128xf32>,
    %c3_i32 = arith.constant 3 : i32
    %c8_i32_39 = arith.constant 8 : i32
    %114 = arith.muli %c3_i32, %c8_i32_39 : i32
    %115 = tpu.assume_multiple %114, 8 : i32
    %116 = arith.index_cast %115 : i32 to index
    %c0_40 = arith.constant 0 : index
    %117 = vector.load %arg11[%116, %c0_40] : memref<64x512xf32, #tpu.memory_space<vmem>>, vector<8x512xf32>
    %c0_41 = arith.constant 0 : index
    %c0_42 = arith.constant 0 : index
    %118 = vector.load %arg4[%c0_41, %c0_42] : memref<128x512xf32, #tpu.memory_space<vmem>>, vector<128x512xf32>
    %cst_43 = arith.constant dense<0.000000e+00> : vector<8x512xf32>
    %119 = tpu.matmul %111, %118, %cst_43 {dimension_numbers = #tpu.dot_dimension_numbers<[1], [0], [0], [1], [0, 0, 1, 1], [], []>} : vector<8x128xf32>, vector<128x512xf32>, vector<8x512xf32> -> vector<8x512xf32>
    %120 = arith.addf %117, %119 : vector<8x512xf32>
    %121 = vector.extract_strided_slice %120 {offsets = [0, 0], sizes = [8, 128], strides = [1, 1]} : vector<8x512xf32> to vector<8x128xf32>
    %122 = arith.negf %121 : vector<8x128xf32>
    %123 = math.exp %122 : vector<8x128xf32>
    %cst_44 = arith.constant 1.000000e+00 : f32
    %124 = vector.broadcast %cst_44 : f32 to vector<8x128xf32>
    %125 = arith.addf %124, %123 : vector<8x128xf32>
    %126 = arith.divf %124, %125 : vector<8x128xf32>
    %127 = vector.extract_strided_slice %120 {offsets = [0, 128], sizes = [8, 128], strides = [1, 1]} : vector<8x512xf32> to vector<8x128xf32>
    %128 = arith.negf %127 : vector<8x128xf32>
    %129 = math.exp %128 : vector<8x128xf32>
    %cst_45 = arith.constant 1.000000e+00 : f32
    %130 = vector.broadcast %cst_45 : f32 to vector<8x128xf32>
    %131 = arith.addf %130, %129 : vector<8x128xf32>
    %132 = arith.divf %130, %131 : vector<8x128xf32>
    %133 = vector.extract_strided_slice %120 {offsets = [0, 256], sizes = [8, 128], strides = [1, 1]} : vector<8x512xf32> to vector<8x128xf32>
    %134 = math.tanh %133 : vector<8x128xf32>
    %135 = vector.extract_strided_slice %120 {offsets = [0, 384], sizes = [8, 128], strides = [1, 1]} : vector<8x512xf32> to vector<8x128xf32>
    %136 = arith.negf %135 : vector<8x128xf32>
    %137 = math.exp %136 : vector<8x128xf32>
    %cst_46 = arith.constant 1.000000e+00 : f32
    %138 = vector.broadcast %cst_46 : f32 to vector<8x128xf32>
    %139 = arith.addf %138, %137 : vector<8x128xf32>
    %140 = arith.divf %138, %139 : vector<8x128xf32>
    %141 = arith.mulf %132, %109 : vector<8x128xf32>
    %142 = arith.mulf %126, %134 : vector<8x128xf32>
    %143 = arith.addf %141, %142 : vector<8x128xf32>
    %144 = math.tanh %143 : vector<8x128xf32>
    %145 = arith.mulf %140, %144 : vector<8x128xf32>
    %146 = arith.index_cast %115 : i32 to index
    %c0_47 = arith.constant 0 : index
    %147 = vector.load %arg8[%146, %c0_47] : memref<64x128xf32, #tpu.memory_space<vmem>>, vector<8x128xf32>
    tpu.vector_store %arg8[%146, %c0_47], %145 {strides = array<i32>} : memref<64x128xf32, #tpu.memory_space<vmem>>, vector<8x128xf32>,
    %c4_i32 = arith.constant 4 : i32
    %c8_i32_48 = arith.constant 8 : i32
    %148 = arith.muli %c4_i32, %c8_i32_48 : i32
    %149 = tpu.assume_multiple %148, 8 : i32
    %150 = arith.index_cast %149 : i32 to index
    %c0_49 = arith.constant 0 : index
    %151 = vector.load %arg11[%150, %c0_49] : memref<64x512xf32, #tpu.memory_space<vmem>>, vector<8x512xf32>
    %c0_50 = arith.constant 0 : index
    %c0_51 = arith.constant 0 : index
    %152 = vector.load %arg4[%c0_50, %c0_51] : memref<128x512xf32, #tpu.memory_space<vmem>>, vector<128x512xf32>
    %cst_52 = arith.constant dense<0.000000e+00> : vector<8x512xf32>
    %153 = tpu.matmul %145, %152, %cst_52 {dimension_numbers = #tpu.dot_dimension_numbers<[1], [0], [0], [1], [0, 0, 1, 1], [], []>} : vector<8x128xf32>, vector<128x512xf32>, vector<8x512xf32> -> vector<8x512xf32>
    %154 = arith.addf %151, %153 : vector<8x512xf32>
    %155 = vector.extract_strided_slice %154 {offsets = [0, 0], sizes = [8, 128], strides = [1, 1]} : vector<8x512xf32> to vector<8x128xf32>
    %156 = arith.negf %155 : vector<8x128xf32>
    %157 = math.exp %156 : vector<8x128xf32>
    %cst_53 = arith.constant 1.000000e+00 : f32
    %158 = vector.broadcast %cst_53 : f32 to vector<8x128xf32>
    %159 = arith.addf %158, %157 : vector<8x128xf32>
    %160 = arith.divf %158, %159 : vector<8x128xf32>
    %161 = vector.extract_strided_slice %154 {offsets = [0, 128], sizes = [8, 128], strides = [1, 1]} : vector<8x512xf32> to vector<8x128xf32>
    %162 = arith.negf %161 : vector<8x128xf32>
    %163 = math.exp %162 : vector<8x128xf32>
    %cst_54 = arith.constant 1.000000e+00 : f32
    %164 = vector.broadcast %cst_54 : f32 to vector<8x128xf32>
    %165 = arith.addf %164, %163 : vector<8x128xf32>
    %166 = arith.divf %164, %165 : vector<8x128xf32>
    %167 = vector.extract_strided_slice %154 {offsets = [0, 256], sizes = [8, 128], strides = [1, 1]} : vector<8x512xf32> to vector<8x128xf32>
    %168 = math.tanh %167 : vector<8x128xf32>
    %169 = vector.extract_strided_slice %154 {offsets = [0, 384], sizes = [8, 128], strides = [1, 1]} : vector<8x512xf32> to vector<8x128xf32>
    %170 = arith.negf %169 : vector<8x128xf32>
    %171 = math.exp %170 : vector<8x128xf32>
    %cst_55 = arith.constant 1.000000e+00 : f32
    %172 = vector.broadcast %cst_55 : f32 to vector<8x128xf32>
    %173 = arith.addf %172, %171 : vector<8x128xf32>
    %174 = arith.divf %172, %173 : vector<8x128xf32>
    %175 = arith.mulf %166, %143 : vector<8x128xf32>
    %176 = arith.mulf %160, %168 : vector<8x128xf32>
    %177 = arith.addf %175, %176 : vector<8x128xf32>
    %178 = math.tanh %177 : vector<8x128xf32>
    %179 = arith.mulf %174, %178 : vector<8x128xf32>
    %180 = arith.index_cast %149 : i32 to index
    %c0_56 = arith.constant 0 : index
    %181 = vector.load %arg8[%180, %c0_56] : memref<64x128xf32, #tpu.memory_space<vmem>>, vector<8x128xf32>
    tpu.vector_store %arg8[%180, %c0_56], %179 {strides = array<i32>} : memref<64x128xf32, #tpu.memory_space<vmem>>, vector<8x128xf32>,
    %c5_i32 = arith.constant 5 : i32
    %c8_i32_57 = arith.constant 8 : i32
    %182 = arith.muli %c5_i32, %c8_i32_57 : i32
    %183 = tpu.assume_multiple %182, 8 : i32
    %184 = arith.index_cast %183 : i32 to index
    %c0_58 = arith.constant 0 : index
    %185 = vector.load %arg11[%184, %c0_58] : memref<64x512xf32, #tpu.memory_space<vmem>>, vector<8x512xf32>
    %c0_59 = arith.constant 0 : index
    %c0_60 = arith.constant 0 : index
    %186 = vector.load %arg4[%c0_59, %c0_60] : memref<128x512xf32, #tpu.memory_space<vmem>>, vector<128x512xf32>
    %cst_61 = arith.constant dense<0.000000e+00> : vector<8x512xf32>
    %187 = tpu.matmul %179, %186, %cst_61 {dimension_numbers = #tpu.dot_dimension_numbers<[1], [0], [0], [1], [0, 0, 1, 1], [], []>} : vector<8x128xf32>, vector<128x512xf32>, vector<8x512xf32> -> vector<8x512xf32>
    %188 = arith.addf %185, %187 : vector<8x512xf32>
    %189 = vector.extract_strided_slice %188 {offsets = [0, 0], sizes = [8, 128], strides = [1, 1]} : vector<8x512xf32> to vector<8x128xf32>
    %190 = arith.negf %189 : vector<8x128xf32>
    %191 = math.exp %190 : vector<8x128xf32>
    %cst_62 = arith.constant 1.000000e+00 : f32
    %192 = vector.broadcast %cst_62 : f32 to vector<8x128xf32>
    %193 = arith.addf %192, %191 : vector<8x128xf32>
    %194 = arith.divf %192, %193 : vector<8x128xf32>
    %195 = vector.extract_strided_slice %188 {offsets = [0, 128], sizes = [8, 128], strides = [1, 1]} : vector<8x512xf32> to vector<8x128xf32>
    %196 = arith.negf %195 : vector<8x128xf32>
    %197 = math.exp %196 : vector<8x128xf32>
    %cst_63 = arith.constant 1.000000e+00 : f32
    %198 = vector.broadcast %cst_63 : f32 to vector<8x128xf32>
    %199 = arith.addf %198, %197 : vector<8x128xf32>
    %200 = arith.divf %198, %199 : vector<8x128xf32>
    %201 = vector.extract_strided_slice %188 {offsets = [0, 256], sizes = [8, 128], strides = [1, 1]} : vector<8x512xf32> to vector<8x128xf32>
    %202 = math.tanh %201 : vector<8x128xf32>
    %203 = vector.extract_strided_slice %188 {offsets = [0, 384], sizes = [8, 128], strides = [1, 1]} : vector<8x512xf32> to vector<8x128xf32>
    %204 = arith.negf %203 : vector<8x128xf32>
    %205 = math.exp %204 : vector<8x128xf32>
    %cst_64 = arith.constant 1.000000e+00 : f32
    %206 = vector.broadcast %cst_64 : f32 to vector<8x128xf32>
    %207 = arith.addf %206, %205 : vector<8x128xf32>
    %208 = arith.divf %206, %207 : vector<8x128xf32>
    %209 = arith.mulf %200, %177 : vector<8x128xf32>
    %210 = arith.mulf %194, %202 : vector<8x128xf32>
    %211 = arith.addf %209, %210 : vector<8x128xf32>
    %212 = math.tanh %211 : vector<8x128xf32>
    %213 = arith.mulf %208, %212 : vector<8x128xf32>
    %214 = arith.index_cast %183 : i32 to index
    %c0_65 = arith.constant 0 : index
    %215 = vector.load %arg8[%214, %c0_65] : memref<64x128xf32, #tpu.memory_space<vmem>>, vector<8x128xf32>
    tpu.vector_store %arg8[%214, %c0_65], %213 {strides = array<i32>} : memref<64x128xf32, #tpu.memory_space<vmem>>, vector<8x128xf32>,
    %c6_i32 = arith.constant 6 : i32
    %c8_i32_66 = arith.constant 8 : i32
    %216 = arith.muli %c6_i32, %c8_i32_66 : i32
    %217 = tpu.assume_multiple %216, 8 : i32
    %218 = arith.index_cast %217 : i32 to index
    %c0_67 = arith.constant 0 : index
    %219 = vector.load %arg11[%218, %c0_67] : memref<64x512xf32, #tpu.memory_space<vmem>>, vector<8x512xf32>
    %c0_68 = arith.constant 0 : index
    %c0_69 = arith.constant 0 : index
    %220 = vector.load %arg4[%c0_68, %c0_69] : memref<128x512xf32, #tpu.memory_space<vmem>>, vector<128x512xf32>
    %cst_70 = arith.constant dense<0.000000e+00> : vector<8x512xf32>
    %221 = tpu.matmul %213, %220, %cst_70 {dimension_numbers = #tpu.dot_dimension_numbers<[1], [0], [0], [1], [0, 0, 1, 1], [], []>} : vector<8x128xf32>, vector<128x512xf32>, vector<8x512xf32> -> vector<8x512xf32>
    %222 = arith.addf %219, %221 : vector<8x512xf32>
    %223 = vector.extract_strided_slice %222 {offsets = [0, 0], sizes = [8, 128], strides = [1, 1]} : vector<8x512xf32> to vector<8x128xf32>
    %224 = arith.negf %223 : vector<8x128xf32>
    %225 = math.exp %224 : vector<8x128xf32>
    %cst_71 = arith.constant 1.000000e+00 : f32
    %226 = vector.broadcast %cst_71 : f32 to vector<8x128xf32>
    %227 = arith.addf %226, %225 : vector<8x128xf32>
    %228 = arith.divf %226, %227 : vector<8x128xf32>
    %229 = vector.extract_strided_slice %222 {offsets = [0, 128], sizes = [8, 128], strides = [1, 1]} : vector<8x512xf32> to vector<8x128xf32>
    %230 = arith.negf %229 : vector<8x128xf32>
    %231 = math.exp %230 : vector<8x128xf32>
    %cst_72 = arith.constant 1.000000e+00 : f32
    %232 = vector.broadcast %cst_72 : f32 to vector<8x128xf32>
    %233 = arith.addf %232, %231 : vector<8x128xf32>
    %234 = arith.divf %232, %233 : vector<8x128xf32>
    %235 = vector.extract_strided_slice %222 {offsets = [0, 256], sizes = [8, 128], strides = [1, 1]} : vector<8x512xf32> to vector<8x128xf32>
    %236 = math.tanh %235 : vector<8x128xf32>
    %237 = vector.extract_strided_slice %222 {offsets = [0, 384], sizes = [8, 128], strides = [1, 1]} : vector<8x512xf32> to vector<8x128xf32>
    %238 = arith.negf %237 : vector<8x128xf32>
    %239 = math.exp %238 : vector<8x128xf32>
    %cst_73 = arith.constant 1.000000e+00 : f32
    %240 = vector.broadcast %cst_73 : f32 to vector<8x128xf32>
    %241 = arith.addf %240, %239 : vector<8x128xf32>
    %242 = arith.divf %240, %241 : vector<8x128xf32>
    %243 = arith.mulf %234, %211 : vector<8x128xf32>
    %244 = arith.mulf %228, %236 : vector<8x128xf32>
    %245 = arith.addf %243, %244 : vector<8x128xf32>
    %246 = math.tanh %245 : vector<8x128xf32>
    %247 = arith.mulf %242, %246 : vector<8x128xf32>
    %248 = arith.index_cast %217 : i32 to index
    %c0_74 = arith.constant 0 : index
    %249 = vector.load %arg8[%248, %c0_74] : memref<64x128xf32, #tpu.memory_space<vmem>>, vector<8x128xf32>
    tpu.vector_store %arg8[%248, %c0_74], %247 {strides = array<i32>} : memref<64x128xf32, #tpu.memory_space<vmem>>, vector<8x128xf32>,
    %c7_i32 = arith.constant 7 : i32
    %c8_i32_75 = arith.constant 8 : i32
    %250 = arith.muli %c7_i32, %c8_i32_75 : i32
    %251 = tpu.assume_multiple %250, 8 : i32
    %252 = arith.index_cast %251 : i32 to index
    %c0_76 = arith.constant 0 : index
    %253 = vector.load %arg11[%252, %c0_76] : memref<64x512xf32, #tpu.memory_space<vmem>>, vector<8x512xf32>
    %c0_77 = arith.constant 0 : index
    %c0_78 = arith.constant 0 : index
    %254 = vector.load %arg4[%c0_77, %c0_78] : memref<128x512xf32, #tpu.memory_space<vmem>>, vector<128x512xf32>
    %cst_79 = arith.constant dense<0.000000e+00> : vector<8x512xf32>
    %255 = tpu.matmul %247, %254, %cst_79 {dimension_numbers = #tpu.dot_dimension_numbers<[1], [0], [0], [1], [0, 0, 1, 1], [], []>} : vector<8x128xf32>, vector<128x512xf32>, vector<8x512xf32> -> vector<8x512xf32>
    %256 = arith.addf %253, %255 : vector<8x512xf32>
    %257 = vector.extract_strided_slice %256 {offsets = [0, 0], sizes = [8, 128], strides = [1, 1]} : vector<8x512xf32> to vector<8x128xf32>
    %258 = arith.negf %257 : vector<8x128xf32>
    %259 = math.exp %258 : vector<8x128xf32>
    %cst_80 = arith.constant 1.000000e+00 : f32
    %260 = vector.broadcast %cst_80 : f32 to vector<8x128xf32>
    %261 = arith.addf %260, %259 : vector<8x128xf32>
    %262 = arith.divf %260, %261 : vector<8x128xf32>
    %263 = vector.extract_strided_slice %256 {offsets = [0, 128], sizes = [8, 128], strides = [1, 1]} : vector<8x512xf32> to vector<8x128xf32>
    %264 = arith.negf %263 : vector<8x128xf32>
    %265 = math.exp %264 : vector<8x128xf32>
    %cst_81 = arith.constant 1.000000e+00 : f32
    %266 = vector.broadcast %cst_81 : f32 to vector<8x128xf32>
    %267 = arith.addf %266, %265 : vector<8x128xf32>
    %268 = arith.divf %266, %267 : vector<8x128xf32>
    %269 = vector.extract_strided_slice %256 {offsets = [0, 256], sizes = [8, 128], strides = [1, 1]} : vector<8x512xf32> to vector<8x128xf32>
    %270 = math.tanh %269 : vector<8x128xf32>
    %271 = vector.extract_strided_slice %256 {offsets = [0, 384], sizes = [8, 128], strides = [1, 1]} : vector<8x512xf32> to vector<8x128xf32>
    %272 = arith.negf %271 : vector<8x128xf32>
    %273 = math.exp %272 : vector<8x128xf32>
    %cst_82 = arith.constant 1.000000e+00 : f32
    %274 = vector.broadcast %cst_82 : f32 to vector<8x128xf32>
    %275 = arith.addf %274, %273 : vector<8x128xf32>
    %276 = arith.divf %274, %275 : vector<8x128xf32>
    %277 = arith.mulf %268, %245 : vector<8x128xf32>
    %278 = arith.mulf %262, %270 : vector<8x128xf32>
    %279 = arith.addf %277, %278 : vector<8x128xf32>
    %280 = math.tanh %279 : vector<8x128xf32>
    %281 = arith.mulf %276, %280 : vector<8x128xf32>
    %282 = arith.index_cast %251 : i32 to index
    %c0_83 = arith.constant 0 : index
    %283 = vector.load %arg8[%282, %c0_83] : memref<64x128xf32, #tpu.memory_space<vmem>>, vector<8x128xf32>
    tpu.vector_store %arg8[%282, %c0_83], %281 {strides = array<i32>} : memref<64x128xf32, #tpu.memory_space<vmem>>, vector<8x128xf32>,
    %c8_i32_84 = arith.constant 8 : i32
    %c0_85 = arith.constant 0 : index
    %c0_86 = arith.constant 0 : index
    %284 = vector.load %arg9[%c0_85, %c0_86] : memref<8x128xf32, #tpu.memory_space<vmem>>, vector<8x128xf32>
    tpu.vector_store %arg9[%c0_85, %c0_86], %281 {strides = array<i32>} : memref<8x128xf32, #tpu.memory_space<vmem>>, vector<8x128xf32>,
    %c0_87 = arith.constant 0 : index
    %c0_88 = arith.constant 0 : index
    %285 = vector.load %arg10[%c0_87, %c0_88] : memref<8x128xf32, #tpu.memory_space<vmem>>, vector<8x128xf32>
    tpu.vector_store %arg10[%c0_87, %c0_88], %279 {strides = array<i32>} : memref<8x128xf32, #tpu.memory_space<vmem>>, vector<8x128xf32>,
    return
  }
  func.func @transform_0(%arg0: i32, %arg1: i32) -> (i32, i32) {
    %c1_i32 = arith.constant 1 : i32
    %0 = arith.muli %arg0, %c1_i32 : i32
    %1 = arith.addi %0, %arg1 : i32
    %c0_i32 = arith.constant 0 : i32
    %c0_i32_0 = arith.constant 0 : i32
    return %1, %c0_i32 : i32, i32
  }
  func.func @transform_1(%arg0: i32, %arg1: i32) -> (i32, i32) {
    %c0_i32 = arith.constant 0 : i32
    %c0_i32_0 = arith.constant 0 : i32
    %c0_i32_1 = arith.constant 0 : i32
    return %c0_i32, %c0_i32_0 : i32, i32
  }
  func.func @transform_2(%arg0: i32, %arg1: i32) -> (i32, i32) {
    %c0_i32 = arith.constant 0 : i32
    %c0_i32_0 = arith.constant 0 : i32
    %c0_i32_1 = arith.constant 0 : i32
    return %c0_i32, %c0_i32_0 : i32, i32
  }
  func.func @transform_3(%arg0: i32, %arg1: i32) -> (i32, i32) {
    %c0_i32 = arith.constant 0 : i32
    %c0_i32_0 = arith.constant 0 : i32
    %c0_i32_1 = arith.constant 0 : i32
    return %c0_i32, %c0_i32_0 : i32, i32
  }
  func.func @transform_4(%arg0: i32, %arg1: i32) -> (i32, i32) {
    %c0_i32 = arith.constant 0 : i32
    %c0_i32_0 = arith.constant 0 : i32
    return %arg0, %c0_i32 : i32, i32
  }
  func.func @transform_5(%arg0: i32, %arg1: i32) -> (i32, i32) {
    %c0_i32 = arith.constant 0 : i32
    %c0_i32_0 = arith.constant 0 : i32
    return %arg0, %c0_i32 : i32, i32
  }
  func.func @transform_6(%arg0: i32, %arg1: i32) -> (i32, i32) {
    %c1_i32 = arith.constant 1 : i32
    %0 = arith.muli %arg0, %c1_i32 : i32
    %1 = arith.addi %0, %arg1 : i32
    %c0_i32 = arith.constant 0 : i32
    %c0_i32_0 = arith.constant 0 : i32
    return %1, %c0_i32 : i32, i32
  }
}

</mosaic_0001>

<bundles_post_ra>
// kernel: lstm_forward.5
= control target key start
LH: loop header
LB: loop body
LE: loop exit
PB: predicated region body
PF: predicated region fallthrough
CT: control target
= control target key end

     0   :  { %s382_s1 = inlined_call_operand.vmem [shape: f32[128,128], index: 1, kind: input, shape index: {}]   ;;  %s383_s0 = inlined_call_operand.vmem [shape: f32[64,128], index: 0, kind: input, shape index: {}]   ;;  %s384_s2 = inlined_call_operand.vmem [shape: f32[1,128], index: 2, kind: input, shape index: {}]   ;;  %s385_s3 = inlined_call_operand.vmem [shape: f32[64,128], index: 3, kind: output, shape index: {}]  }
   0x1   :  { %v37_v0 = vld [vmem:[%s382_s1 + $0x78] sm:$0xff]  ;;  %v36_v1 = vld [vmem:[%s382_s1 + $0x70] sm:$0xff]  ;;  %v35_v2 = vld [vmem:[%s382_s1 + $0x68] sm:$0xff] }
   0x2   :  { %187 = vmatprep.subr.mxu0 %v37_v0  ;;  %231 = vmatprep.subr.mxu1 %v37_v0  ;;  %v34_v3 = vld [vmem:[%s382_s1 + $0x60] sm:$0xff]  ;;  %v33_v4 = vld [vmem:[%s382_s1 + $0x58] sm:$0xff]  ;;  %v32_v5 = vld [vmem:[%s382_s1 + $0x50] sm:$0xff] }
   0x3   :  { %188 = vmatpush3.msra.mxu0 %v37_v0  ;;  %247 = vmatpush3.msra.mxu1 %v37_v0  ;;  %v31_v6 = vld [vmem:[%s382_s1 + $0x48] sm:$0xff]  ;;  %v30_v7 = vld [vmem:[%s382_s1 + $0x40] sm:$0xff]  ;;  %v29_v8 = vld [vmem:[%s382_s1 + $0x38] sm:$0xff] }
   0x4   :  { %189 = vmatprep.subr.mxu0 %v36_v1  ;;  %232 = vmatprep.subr.mxu1 %v36_v1  ;;  %v28_v9 = vld [vmem:[%s382_s1 + $0x30] sm:$0xff]  ;;  %v27_v10 = vld [vmem:[%s382_s1 + $0x28] sm:$0xff]  ;;  %v26_v11 = vld [vmem:[%s382_s1 + $0x20] sm:$0xff] }
   0x5   :  { %190 = vmatpush3.msra.mxu0 %v36_v1  ;;  %248 = vmatpush3.msra.mxu1 %v36_v1  ;;  %v25_v12 = vld [vmem:[%s382_s1 + $0x18] sm:$0xff]  ;;  %v24_v13 = vld [vmem:[%s382_s1 + $0x10] sm:$0xff]  ;;  %v23_v14 = vld [vmem:[%s382_s1 + $0x8] sm:$0xff] }
   0x6   :  { %191 = vmatprep.subr.mxu0 %v35_v2  ;;  %233 = vmatprep.subr.mxu1 %v35_v2  ;;  %v22_v15 = vld [vmem:[%s382_s1] sm:$0xff]  ;;  %v15_v18 = vld [vmem:[%s383_s0 + $0x8] sm:$0xff]  ;;  %v16_v20 = vld [vmem:[%s383_s0 + $0x10] sm:$0xff] }
   0x7   :  { %192 = vmatpush3.msra.mxu0 %v35_v2  ;;  %249 = vmatpush3.msra.mxu1 %v35_v2  ;;  %v14_v16 = vld [vmem:[%s383_s0] sm:$0xff]  ;;  %v19_v19 = vld [vmem:[%s383_s0 + $0x28] sm:$0xff]  ;;  %v20_v21 = vld [vmem:[%s383_s0 + $0x30] sm:$0xff] }
   0x8   :  { %193 = vmatprep.subr.mxu0 %v34_v3  ;;  %234 = vmatprep.subr.mxu1 %v34_v3  ;;  %v18_v17 = vld [vmem:[%s383_s0 + $0x20] sm:$0xff]  ;;  %v17_v22 = vld [vmem:[%s383_s0 + $0x18] sm:$0xff] }
   0x9   :  { %194 = vmatpush3.msra.mxu0 %v34_v3  ;;  %250 = vmatpush3.msra.mxu1 %v34_v3  ;;  %v21_v23 = vld [vmem:[%s383_s0 + $0x38] sm:$0xff]  ;;  %v162_v24 = vld [vmem:[%s384_s2] ss:$0 sm:$0xff] }
   0xa   :  { %195 = vmatprep.subr.mxu0 %v33_v4  ;;  %235 = vmatprep.subr.mxu1 %v33_v4 }
   0xb   :  { %196 = vmatpush3.msra.mxu0 %v33_v4  ;;  %251 = vmatpush3.msra.mxu1 %v33_v4 }
   0xc   :  { %197 = vmatprep.subr.mxu0 %v32_v5  ;;  %236 = vmatprep.subr.mxu1 %v32_v5 }
   0xd   :  { %198 = vmatpush3.msra.mxu0 %v32_v5  ;;  %252 = vmatpush3.msra.mxu1 %v32_v5 }
   0xe   :  { %199 = vmatprep.subr.mxu0 %v31_v6  ;;  %237 = vmatprep.subr.mxu1 %v31_v6 }
   0xf   :  { %200 = vmatpush3.msra.mxu0 %v31_v6  ;;  %253 = vmatpush3.msra.mxu1 %v31_v6 }
  0x10   :  { %201 = vmatprep.subr.mxu0 %v30_v7  ;;  %238 = vmatprep.subr.mxu1 %v30_v7 }
  0x11   :  { %202 = vmatpush3.msra.mxu0 %v30_v7  ;;  %254 = vmatpush3.msra.mxu1 %v30_v7 }
  0x12   :  { %203 = vmatprep.subr.mxu0 %v29_v8  ;;  %239 = vmatprep.subr.mxu1 %v29_v8 }
  0x13   :  { %204 = vmatpush3.msra.mxu0 %v29_v8  ;;  %255 = vmatpush3.msra.mxu1 %v29_v8 }
  0x14   :  { %205 = vmatprep.subr.mxu0 %v28_v9  ;;  %240 = vmatprep.subr.mxu1 %v28_v9 }
  0x15   :  { %206 = vmatpush3.msra.mxu0 %v28_v9  ;;  %256 = vmatpush3.msra.mxu1 %v28_v9 }
  0x16   :  { %207 = vmatprep.subr.mxu0 %v27_v10  ;;  %241 = vmatprep.subr.mxu1 %v27_v10 }
  0x17   :  { %208 = vmatpush3.msra.mxu0 %v27_v10  ;;  %257 = vmatpush3.msra.mxu1 %v27_v10 }
  0x18   :  { %209 = vmatprep.subr.mxu0 %v26_v11  ;;  %242 = vmatprep.subr.mxu1 %v26_v11 }
  0x19   :  { %210 = vmatpush3.msra.mxu0 %v26_v11  ;;  %258 = vmatpush3.msra.mxu1 %v26_v11 }
  0x1a   :  { %211 = vmatprep.subr.mxu0 %v25_v12  ;;  %243 = vmatprep.subr.mxu1 %v25_v12 }
  0x1b   :  { %212 = vmatpush3.msra.mxu0 %v25_v12  ;;  %259 = vmatpush3.msra.mxu1 %v25_v12 }
  0x1c   :  { %213 = vmatprep.subr.mxu0 %v24_v13  ;;  %244 = vmatprep.subr.mxu1 %v24_v13 }
  0x1d   :  { %214 = vmatpush3.msra.mxu0 %v24_v13  ;;  %260 = vmatpush3.msra.mxu1 %v24_v13 }
  0x1e   :  { %215 = vmatprep.subr.mxu0 %v23_v14  ;;  %245 = vmatprep.subr.mxu1 %v23_v14 }
  0x1f   :  { %216 = vmatpush3.msra.mxu0 %v23_v14  ;;  %261 = vmatpush3.msra.mxu1 %v23_v14 }
  0x20   :  { %217 = vmatprep.subr.mxu0 %v22_v15  ;;  %246 = vmatprep.subr.mxu1 %v22_v15 }
  0x21   :  { %218 = vmatpush3.msra.mxu0 %v22_v15  ;;  %262 = vmatpush3.msra.mxu1 %v22_v15 }
  0x22   :  { %219 = vmatprep.mubr.f32.mxu0 %v14_v16  ;;  %225 = vmatprep.mubr.f32.mxu1 %v18_v17 }
  0x23   :  { %220 = vmatmul.mubr.f32.vlgmr.msra.gmra.mxu0 %v15_v18  ;;  %226 = vmatmul.mubr.f32.vlgmr.msra.gmra.mxu1 %v19_v19 }
  0x24   :  { %222 = vmatprep.mubr.f32.mxu0 %v16_v20  ;;  %228 = vmatprep.mubr.f32.mxu1 %v20_v21 }
  0x27   :  { %223 = vmatmul.mubr.f32.gmra.mxu0 %v17_v22  ;;  %229 = vmatmul.mubr.f32.gmra.mxu1 %v21_v23 }
  0xe3   :  { %v221_v25 = vpop.f32.mrf.mxu0  ;;  %v227_v26 = vpop.f32.mrf.mxu1 }
  0xe4   :  { %v117_v27 = vadd.f32 %v221_v25, %v162_v24  ;;  %v137_v28 = vadd.f32 %v227_v26, %v162_v24 }
  0xe5   :  { %v111_v29 = vpop.f32.mrf.mxu0  ;;  %v131_v30 = vpop.f32.mrf.mxu1 }
  0xe6   :  { %151 = vst [vmem:[%s385_s3 + $0x8] sm:$0xff] %v117_v27  ;;  %155 = vst [vmem:[%s385_s3 + $0x28] sm:$0xff] %v137_v28  ;;  %v112_v31 = vadd.f32 %v162_v24, %v111_v29  ;;  %v132_v32 = vadd.f32 %v162_v24, %v131_v30 }
  0xe7   :  { %v224_v33 = vpop.f32.mrf.mxu0  ;;  %v230_v34 = vpop.f32.mrf.mxu1 }
  0xe8   :  { %150 = vst [vmem:[%s385_s3] sm:$0xff] %v112_v31  ;;  %154 = vst [vmem:[%s385_s3 + $0x20] sm:$0xff] %v132_v32  ;;  %v127_v35 = vadd.f32 %v224_v33, %v162_v24  ;;  %v147_v36 = vadd.f32 %v230_v34, %v162_v24 }
  0xe9   :  { %v121_v37 = vpop.f32.mrf.mxu0  ;;  %v141_v38 = vpop.f32.mrf.mxu1 }
  0xea   :  { %153 = vst [vmem:[%s385_s3 + $0x18] sm:$0xff] %v127_v35  ;;  %157 = vst [vmem:[%s385_s3 + $0x38] sm:$0xff] %v147_v36  ;;  %v122_v39 = vadd.f32 %v162_v24, %v121_v37  ;;  %v142_v40 = vadd.f32 %v162_v24, %v141_v38 }
  0xec   :  { %152 = vst [vmem:[%s385_s3 + $0x10] sm:$0xff] %v122_v39  ;;  %156 = vst [vmem:[%s385_s3 + $0x30] sm:$0xff] %v142_v40 }

// kernel: lstm_forward.4
= control target key start
LH: loop header
LB: loop body
LE: loop exit
PB: predicated region body
PF: predicated region fallthrough
CT: control target
= control target key end

     0   :  { %11 = vsyncpa [#allocation6], 0  ;;  %s2605_s21 = smov [#allocation5]   ;;  %s3772_s0 = inlined_call_operand.vmem [shape: f32[64,128], index: 0, kind: input, shape index: {}]   ;;  %s3773_s1 = inlined_call_operand.vmem [shape: f32[128,512], index: 1, kind: input, shape index: {}]   ;;  %s3774_s2 = inlined_call_operand.hbm [shape: f32[128,512], index: 2, kind: input, shape index: {}]   ;;  %s3775_s3 = inlined_call_operand.vmem [shape: f32[1,512], index: 3, kind: input, shape index: {}]   ;;  %s3776_s4 = inlined_call_operand.vmem [shape: f32[8,128], index: 4, kind: input, shape index: {}]   ;;  %s3777_s5 = inlined_call_operand.vmem [shape: f32[8,128], index: 5, kind: input, shape index: {}]   ;;  %s3778_s6 = inlined_call_operand.vmem [shape: f32[64,128], index: 6, kind: output, shape index: {}]  }
   0x1   :  { %s29_s22 = sshll.u32 %s2605_s21, 4  ;;  %s30_s22 = int_to_ptr.vmem [resolvable:$true] %s29_s22 }
   0x2   :  { %s2591_s23 = scalar_lea.vmem %s30_s22, 8192  ;;  %p2596_p1 = scmp.lt.s32.totalorder %s30_s22, %s30_s22 }
   0x3   :  { %p2592_p0 = scmp.ne.s32.totalorder %s30_s22, %s2591_s23  ;;  %p2597_p2 = scmp.lt.s32.totalorder %s2591_s23, %s2591_s23 }
   0x5   :  { %p2598_p3 = por %p2597_p2, %p2596_p1 }
   0x7   :  { %p2599_p4 = pnand %p2598_p3, %p2592_p0 }
   0x9   :  { %2602 = shalt.err (!%p2599_p4)
}
   0xa   :  { %s2606_s24 = smov 512   ;;  %s2607_s25 = smov 32  }
   0xb   :  { %35 = dma.hbm_to_vmem [thread:$0]  %s3774_s2, 8192, %s30_s22, [#allocation6], %s2606_s24, %s2606_s24, %s2607_s25  }
   0xc   :  { %2603 = dma.done.wait [#allocation6], 8192  }
   0xd   :  { %2604 = vsyncadd [#allocation6], 4294959104  ;;  %v3779_v0 = vmov 0.0   ;;  %v150_v1 = vld [vmem:[%s3773_s1 + $0x1e8] sm:$0xff]  ;;  %v152_v2 = vld [vmem:[%s3773_s1 + $0x1f8] sm:$0xff] }
   0xe   :  { %239 = vmatprep.mubr.f32.mxu0 %v3779_v0  ;;  %352 = vmatprep.mubr.f32.mxu1 %v3779_v0  ;;  %v149_v3 = vld [vmem:[%s3773_s1 + $0x1e0] sm:$0xff]  ;;  %v151_v4 = vld [vmem:[%s3773_s1 + $0x1f0] sm:$0xff]  ;;  %v146_v5 = vld [vmem:[%s3773_s1 + $0x1c8] sm:$0xff] }
   0xf   :  { %175 = vmatprep.subr.mxu0 %v150_v1  ;;  %288 = vmatprep.subr.mxu1 %v152_v2  ;;  %v148_v6 = vld [vmem:[%s3773_s1 + $0x1d8] sm:$0xff]  ;;  %v145_v7 = vld [vmem:[%s3773_s1 + $0x1c0] sm:$0xff]  ;;  %v147_v8 = vld [vmem:[%s3773_s1 + $0x1d0] sm:$0xff] }
  0x10   :  { %176 = vmatpush1.msra.mxu0 %v149_v3  ;;  %289 = vmatpush1.msra.mxu1 %v151_v4  ;;  %v142_v9 = vld [vmem:[%s3773_s1 + $0x1a8] sm:$0xff]  ;;  %v144_v10 = vld [vmem:[%s3773_s1 + $0x1b8] sm:$0xff]  ;;  %v141_v11 = vld [vmem:[%s3773_s1 + $0x1a0] sm:$0xff] }
  0x11   :  { %177 = vmatprep.subr.mxu0 %v146_v5  ;;  %290 = vmatprep.subr.mxu1 %v148_v6  ;;  %v143_v12 = vld [vmem:[%s3773_s1 + $0x1b0] sm:$0xff]  ;;  %v138_v13 = vld [vmem:[%s3773_s1 + $0x188] sm:$0xff]  ;;  %v140_v14 = vld [vmem:[%s3773_s1 + $0x198] sm:$0xff] }
  0x12   :  { %178 = vmatpush1.msra.mxu0 %v145_v7  ;;  %291 = vmatpush1.msra.mxu1 %v147_v8  ;;  %v137_v15 = vld [vmem:[%s3773_s1 + $0x180] sm:$0xff]  ;;  %v139_v16 = vld [vmem:[%s3773_s1 + $0x190] sm:$0xff]  ;;  %v134_v17 = vld [vmem:[%s3773_s1 + $0x168] sm:$0xff] }
  0x13   :  { %179 = vmatprep.subr.mxu0 %v142_v9  ;;  %292 = vmatprep.subr.mxu1 %v144_v10  ;;  %v136_v18 = vld [vmem:[%s3773_s1 + $0x178] sm:$0xff]  ;;  %v133_v19 = vld [vmem:[%s3773_s1 + $0x160] sm:$0xff]  ;;  %v135_v20 = vld [vmem:[%s3773_s1 + $0x170] sm:$0xff] }
  0x14   :  { %180 = vmatpush1.msra.mxu0 %v141_v11  ;;  %293 = vmatpush1.msra.mxu1 %v143_v12  ;;  %v130_v21 = vld [vmem:[%s3773_s1 + $0x148] sm:$0xff]  ;;  %v132_v22 = vld [vmem:[%s3773_s1 + $0x158] sm:$0xff]  ;;  %v129_v23 = vld [vmem:[%s3773_s1 + $0x140] sm:$0xff] }
  0x15   :  { %181 = vmatprep.subr.mxu0 %v138_v13  ;;  %294 = vmatprep.subr.mxu1 %v140_v14  ;;  %v131_v24 = vld [vmem:[%s3773_s1 + $0x150] sm:$0xff]  ;;  %v126_v25 = vld [vmem:[%s3773_s1 + $0x128] sm:$0xff]  ;;  %v128_v26 = vld [vmem:[%s3773_s1 + $0x138] sm:$0xff] }
  0x16   :  { %182 = vmatpush1.msra.mxu0 %v137_v15  ;;  %295 = vmatpush1.msra.mxu1 %v139_v16  ;;  %v125_v27 = vld [vmem:[%s3773_s1 + $0x120] sm:$0xff]  ;;  %v127_v28 = vld [vmem:[%s3773_s1 + $0x130] sm:$0xff]  ;;  %v122_v29 = vld [vmem:[%s3773_s1 + $0x108] sm:$0xff] }
  0x17   :  { %183 = vmatprep.subr.mxu0 %v134_v17  ;;  %296 = vmatprep.subr.mxu1 %v136_v18  ;;  %v124_v30 = vld [vmem:[%s3773_s1 + $0x118] sm:$0xff]  ;;  %v121_v31 = vld [vmem:[%s3773_s1 + $0x100] sm:$0xff]  ;;  %v123_v32 = vld [vmem:[%s3773_s1 + $0x110] sm:$0xff] }
  0x18   :  { %184 = vmatpush1.msra.mxu0 %v133_v19  ;;  %297 = vmatpush1.msra.mxu1 %v135_v20  ;;  %v118_v33 = vld [vmem:[%s3773_s1 + $0xe8] sm:$0xff]  ;;  %v120_v34 = vld [vmem:[%s3773_s1 + $0xf8] sm:$0xff]  ;;  %v117_v35 = vld [vmem:[%s3773_s1 + $0xe0] sm:$0xff] }
  0x19   :  { %185 = vmatprep.subr.mxu0 %v130_v21  ;;  %298 = vmatprep.subr.mxu1 %v132_v22  ;;  %v119_v36 = vld [vmem:[%s3773_s1 + $0xf0] sm:$0xff]  ;;  %v114_v37 = vld [vmem:[%s3773_s1 + $0xc8] sm:$0xff]  ;;  %v116_v38 = vld [vmem:[%s3773_s1 + $0xd8] sm:$0xff] }
  0x1a   :  { %186 = vmatpush1.msra.mxu0 %v129_v23  ;;  %299 = vmatpush1.msra.mxu1 %v131_v24  ;;  %v113_v39 = vld [vmem:[%s3773_s1 + $0xc0] sm:$0xff]  ;;  %v115_v40 = vld [vmem:[%s3773_s1 + $0xd0] sm:$0xff]  ;;  %v110_v41 = vld [vmem:[%s3773_s1 + $0xa8] sm:$0xff] }
  0x1b   :  { %187 = vmatprep.subr.mxu0 %v126_v25  ;;  %300 = vmatprep.subr.mxu1 %v128_v26  ;;  %v112_v42 = vld [vmem:[%s3773_s1 + $0xb8] sm:$0xff]  ;;  %v109_v43 = vld [vmem:[%s3773_s1 + $0xa0] sm:$0xff]  ;;  %v111_v44 = vld [vmem:[%s3773_s1 + $0xb0] sm:$0xff] }
  0x1c   :  { %188 = vmatpush1.msra.mxu0 %v125_v27  ;;  %301 = vmatpush1.msra.mxu1 %v127_v28  ;;  %v106_v45 = vld [vmem:[%s3773_s1 + $0x88] sm:$0xff]  ;;  %v108_v46 = vld [vmem:[%s3773_s1 + $0x98] sm:$0xff]  ;;  %v105_v47 = vld [vmem:[%s3773_s1 + $0x80] sm:$0xff] }
  0x1d   :  { %189 = vmatprep.subr.mxu0 %v122_v29  ;;  %302 = vmatprep.subr.mxu1 %v124_v30  ;;  %v107_v48 = vld [vmem:[%s3773_s1 + $0x90] sm:$0xff]  ;;  %v102_v49 = vld [vmem:[%s3773_s1 + $0x68] sm:$0xff]  ;;  %v104_v50 = vld [vmem:[%s3773_s1 + $0x78] sm:$0xff] }
  0x1e   :  { %190 = vmatpush1.msra.mxu0 %v121_v31  ;;  %303 = vmatpush1.msra.mxu1 %v123_v32  ;;  %v101_v51 = vld [vmem:[%s3773_s1 + $0x60] sm:$0xff]  ;;  %v103_v52 = vld [vmem:[%s3773_s1 + $0x70] sm:$0xff]  ;;  %v98_v53 = vld [vmem:[%s3773_s1 + $0x48] sm:$0xff] }
  0x1f   :  { %191 = vmatprep.subr.mxu0 %v118_v33  ;;  %304 = vmatprep.subr.mxu1 %v120_v34  ;;  %v100_v54 = vld [vmem:[%s3773_s1 + $0x58] sm:$0xff]  ;;  %v97_v55 = vld [vmem:[%s3773_s1 + $0x40] sm:$0xff]  ;;  %v99_v56 = vld [vmem:[%s3773_s1 + $0x50] sm:$0xff] }
  0x20   :  { %192 = vmatpush1.msra.mxu0 %v117_v35  ;;  %305 = vmatpush1.msra.mxu1 %v119_v36  ;;  %v94_v57 = vld [vmem:[%s3773_s1 + $0x28] sm:$0xff]  ;;  %v96_v58 = vld [vmem:[%s3773_s1 + $0x38] sm:$0xff]  ;;  %v93_v59 = vld [vmem:[%s3773_s1 + $0x20] sm:$0xff] }
  0x21   :  { %193 = vmatprep.subr.mxu0 %v114_v37  ;;  %306 = vmatprep.subr.mxu1 %v116_v38  ;;  %v95_v60 = vld [vmem:[%s3773_s1 + $0x30] sm:$0xff]  ;;  %v90_v61 = vld [vmem:[%s3773_s1 + $0x8] sm:$0xff]  ;;  %v92_v62 = vld [vmem:[%s3773_s1 + $0x18] sm:$0xff] }
  0x22   :  { %194 = vmatpush1.msra.mxu0 %v113_v39  ;;  %307 = vmatpush1.msra.mxu1 %v115_v40  ;;  %v89_v63 = vld [vmem:[%s3773_s1] sm:$0xff]  ;;  %v91_v1 = vld [vmem:[%s3773_s1 + $0x10] sm:$0xff]  ;;  %v2844_v3 = vld [vmem:[#allocation5 + $0x1e8] sm:$0xff] }
  0x23   :  { %195 = vmatprep.subr.mxu0 %v110_v41  ;;  %308 = vmatprep.subr.mxu1 %v112_v42  ;;  %v81_v2 = vld [vmem:[%s3772_s0] sm:$0xff]  ;;  %v2846_v4 = vld [vmem:[#allocation5 + $0x1f8] sm:$0xff]  ;;  %v2850_v6 = vld [vmem:[#allocation5 + $0x1f0] sm:$0xff] }
  0x24   :  { %196 = vmatpush1.msra.mxu0 %v109_v43  ;;  %309 = vmatpush1.msra.mxu1 %v111_v44  ;;  %v2848_v5 = vld [vmem:[#allocation5 + $0x1e0] sm:$0xff]  ;;  %v2852_v7 = vld [vmem:[#allocation5 + $0x1c8] sm:$0xff]  ;;  %v2854_v8 = vld [vmem:[#allocation5 + $0x1d8] sm:$0xff] }
  0x25   :  { %197 = vmatprep.subr.mxu0 %v106_v45  ;;  %310 = vmatprep.subr.mxu1 %v108_v46  ;;  %v2860_v9 = vld [vmem:[#allocation5 + $0x1c0] sm:$0xff]  ;;  %v2862_v10 = vld [vmem:[#allocation5 + $0x1d0] sm:$0xff]  ;;  %v82_v11 = vld [vmem:[%s3772_s0 + $0x8] sm:$0xff] }
  0x26   :  { %198 = vmatpush1.msra.mxu0 %v105_v47  ;;  %311 = vmatpush1.msra.mxu1 %v107_v48  ;;  %v2871_v12 = vld [vmem:[#allocation5 + $0x1a8] sm:$0xff]  ;;  %v2873_v13 = vld [vmem:[#allocation5 + $0x1b8] sm:$0xff]  ;;  %v2877_v14 = vld [vmem:[#allocation5 + $0x1a0] sm:$0xff] }
  0x27   :  { %199 = vmatprep.subr.mxu0 %v102_v49  ;;  %312 = vmatprep.subr.mxu1 %v104_v50  ;;  %v2879_v15 = vld [vmem:[#allocation5 + $0x1b0] sm:$0xff]  ;;  %v2881_v16 = vld [vmem:[#allocation5 + $0x188] sm:$0xff]  ;;  %v2883_v17 = vld [vmem:[#allocation5 + $0x198] sm:$0xff] }
  0x28   :  { %200 = vmatpush1.msra.mxu0 %v101_v51  ;;  %313 = vmatpush1.msra.mxu1 %v103_v52  ;;  %v2889_v18 = vld [vmem:[#allocation5 + $0x180] sm:$0xff]  ;;  %v2891_v19 = vld [vmem:[#allocation5 + $0x190] sm:$0xff]  ;;  %v2900_v21 = vld [vmem:[#allocation5 + $0x168] sm:$0xff] }
  0x29   :  { %201 = vmatprep.subr.mxu0 %v98_v53  ;;  %314 = vmatprep.subr.mxu1 %v100_v54  ;;  %v83_v20 = vld [vmem:[%s3772_s0 + $0x10] sm:$0xff]  ;;  %v2902_v22 = vld [vmem:[#allocation5 + $0x178] sm:$0xff]  ;;  %v2906_v23 = vld [vmem:[#allocation5 + $0x160] sm:$0xff] }
  0x2a   :  { %202 = vmatpush1.msra.mxu0 %v97_v55  ;;  %315 = vmatpush1.msra.mxu1 %v99_v56  ;;  %v2908_v24 = vld [vmem:[#allocation5 + $0x170] sm:$0xff]  ;;  %v2910_v25 = vld [vmem:[#allocation5 + $0x148] sm:$0xff]  ;;  %v2912_v26 = vld [vmem:[#allocation5 + $0x158] sm:$0xff] }
  0x2b   :  { %203 = vmatprep.subr.mxu0 %v94_v57  ;;  %316 = vmatprep.subr.mxu1 %v96_v58  ;;  %v2918_v27 = vld [vmem:[#allocation5 + $0x140] sm:$0xff]  ;;  %v2920_v28 = vld [vmem:[#allocation5 + $0x150] sm:$0xff]  ;;  %v84_v29 = vld [vmem:[%s3772_s0 + $0x18] sm:$0xff] }
  0x2c   :  { %204 = vmatpush1.msra.mxu0 %v93_v59  ;;  %317 = vmatpush1.msra.mxu1 %v95_v60  ;;  %v2929_v30 = vld [vmem:[#allocation5 + $0x128] sm:$0xff]  ;;  %v2931_v31 = vld [vmem:[#allocation5 + $0x138] sm:$0xff]  ;;  %v2935_v32 = vld [vmem:[#allocation5 + $0x120] sm:$0xff] }
  0x2d   :  { %205 = vmatprep.subr.mxu0 %v90_v61  ;;  %318 = vmatprep.subr.mxu1 %v92_v62  ;;  %v2937_v33 = vld [vmem:[#allocation5 + $0x130] sm:$0xff]  ;;  %v2939_v34 = vld [vmem:[#allocation5 + $0x108] sm:$0xff]  ;;  %v2941_v35 = vld [vmem:[#allocation5 + $0x118] sm:$0xff] }
  0x2e   :  { %206 = vmatpush1.msra.mxu0 %v89_v63  ;;  %319 = vmatpush1.msra.mxu1 %v91_v1  ;;  %v2947_v36 = vld [vmem:[#allocation5 + $0x100] sm:$0xff]  ;;  %v2949_v37 = vld [vmem:[#allocation5 + $0x110] sm:$0xff]  ;;  %v2958_v39 = vld [vmem:[#allocation5 + $0xe8] sm:$0xff] }
  0x2f   :  { %240 = vmatmul.mubr.f32.vlgmr.msra.gmra.mxu0 %v81_v2  ;;  %353 = vmatmul.mubr.f32.vlgmr.msra.gmra.mxu1 %v81_v2  ;;  %v85_v38 = vld [vmem:[%s3772_s0 + $0x20] sm:$0xff]  ;;  %v2960_v40 = vld [vmem:[#allocation5 + $0xf8] sm:$0xff]  ;;  %v2966_v42 = vld [vmem:[#allocation5 + $0xf0] sm:$0xff] }
  0x30   :  { %506 = vmatprep.subr.mxu0 %v2844_v3  ;;  %577 = vmatprep.subr.mxu1 %v2846_v4  ;;  %v2964_v41 = vld [vmem:[#allocation5 + $0xe0] sm:$0xff]  ;;  %v2968_v43 = vld [vmem:[#allocation5 + $0xc8] sm:$0xff]  ;;  %v2970_v44 = vld [vmem:[#allocation5 + $0xd8] sm:$0xff] }
  0x31   :  { %507 = vmatpush1.msra.mxu0 %v2848_v5  ;;  %578 = vmatpush1.msra.mxu1 %v2850_v6  ;;  %v2976_v45 = vld [vmem:[#allocation5 + $0xc0] sm:$0xff]  ;;  %v2978_v46 = vld [vmem:[#allocation5 + $0xd0] sm:$0xff]  ;;  %v86_v47 = vld [vmem:[%s3772_s0 + $0x28] sm:$0xff] }
  0x32   :  { %508 = vmatprep.subr.mxu0 %v2852_v7  ;;  %579 = vmatprep.subr.mxu1 %v2854_v8  ;;  %v2987_v48 = vld [vmem:[#allocation5 + $0xa8] sm:$0xff]  ;;  %v2989_v49 = vld [vmem:[#allocation5 + $0xb8] sm:$0xff]  ;;  %v2993_v50 = vld [vmem:[#allocation5 + $0xa0] sm:$0xff] }
  0x33   :  { %245 = vmatprep.mubr.f32.mxu0 %v3779_v0  ;;  %358 = vmatprep.mubr.f32.mxu1 %v3779_v0  ;;  %v2995_v51 = vld [vmem:[#allocation5 + $0xb0] sm:$0xff]  ;;  %v2997_v52 = vld [vmem:[#allocation5 + $0x88] sm:$0xff]  ;;  %v2999_v53 = vld [vmem:[#allocation5 + $0x98] sm:$0xff] }
  0x34   :  { %509 = vmatpush1.msra.mxu0 %v2860_v9  ;;  %580 = vmatpush1.msra.mxu1 %v2862_v10  ;;  %3845 = vst [vmem:[#allocation8_spill] sm:$0xff] %v2997_v52  ;;  %3846 = vst [vmem:[#allocation9_spill] sm:$0xff] %v2999_v53  ;;  %v3005_v54 = vld [vmem:[#allocation5 + $0x80] sm:$0xff]  ;;  %v3007_v55 = vld [vmem:[#allocation5 + $0x90] sm:$0xff] }
  0x35   :  { %246 = vmatmul.mubr.f32.gmra.mxu0 %v82_v11  ;;  %359 = vmatmul.mubr.f32.gmra.mxu1 %v82_v11  ;;  %3847 = vst [vmem:[#allocation10_spill] sm:$0xff] %v3005_v54  ;;  %3848 = vst [vmem:[#allocation11_spill] sm:$0xff] %v3007_v55  ;;  %v87_v56 = vld [vmem:[%s3772_s0 + $0x30] sm:$0xff]  ;;  %v3016_v57 = vld [vmem:[#allocation5 + $0x68] sm:$0xff] }
  0x36   :  { %510 = vmatprep.subr.mxu0 %v2871_v12  ;;  %581 = vmatprep.subr.mxu1 %v2873_v13  ;;  %3849 = vst [vmem:[#allocation12_spill] sm:$0xff] %v3016_v57  ;;  %v3018_v58 = vld [vmem:[#allocation5 + $0x78] sm:$0xff]  ;;  %v3022_v59 = vld [vmem:[#allocation5 + $0x60] sm:$0xff]  ;;  %v3024_v60 = vld [vmem:[#allocation5 + $0x70] sm:$0xff] }
  0x37   :  { %511 = vmatpush1.msra.mxu0 %v2877_v14  ;;  %582 = vmatpush1.msra.mxu1 %v2879_v15  ;;  %3850 = vst [vmem:[#allocation13_spill] sm:$0xff] %v3018_v58  ;;  %3851 = vst [vmem:[#allocation14_spill] sm:$0xff] %v3022_v59  ;;  %v3026_v61 = vld [vmem:[#allocation5 + $0x48] sm:$0xff]  ;;  %v3028_v62 = vld [vmem:[#allocation5 + $0x58] sm:$0xff] }
  0x38   :  { %512 = vmatprep.subr.mxu0 %v2881_v16  ;;  %583 = vmatprep.subr.mxu1 %v2883_v17  ;;  %3852 = vst [vmem:[#allocation15_spill] sm:$0xff] %v3024_v60  ;;  %3853 = vst [vmem:[#allocation16_spill] sm:$0xff] %v3026_v61  ;;  %v3034_v63 = vld [vmem:[#allocation5 + $0x40] sm:$0xff]  ;;  %v3036_v1 = vld [vmem:[#allocation5 + $0x50] sm:$0xff] }
  0x39   :  { %251 = vmatprep.mubr.f32.mxu0 %v3779_v0  ;;  %364 = vmatprep.mubr.f32.mxu1 %v3779_v0  ;;  %3854 = vst [vmem:[#allocation17_spill] sm:$0xff] %v3028_v62  ;;  %3855 = vst [vmem:[#allocation18_spill] sm:$0xff] %v3034_v63  ;;  %v88_v2 = vld [vmem:[%s3772_s0 + $0x38] sm:$0xff]  ;;  %v3045_v11 = vld [vmem:[#allocation5 + $0x28] sm:$0xff] }
  0x3a   :  { %513 = vmatpush1.msra.mxu0 %v2889_v18  ;;  %584 = vmatpush1.msra.mxu1 %v2891_v19  ;;  %3856 = vst [vmem:[#allocation19_spill] sm:$0xff] %v3036_v1  ;;  %3857 = vst [vmem:[#allocation20_spill] sm:$0xff] %v3045_v11 }
  0x3b   :  { %252 = vmatmul.mubr.f32.gmra.mxu0 %v83_v20  ;;  %365 = vmatmul.mubr.f32.gmra.mxu1 %v83_v20  ;;  %v3047_v20 = vld [vmem:[#allocation5 + $0x38] sm:$0xff] }
  0x3c   :  { %514 = vmatprep.subr.mxu0 %v2900_v21  ;;  %585 = vmatprep.subr.mxu1 %v2902_v22  ;;  %3858 = vst [vmem:[#allocation21_spill] sm:$0xff] %v3047_v20 }
  0x3d   :  { %515 = vmatpush1.msra.mxu0 %v2906_v23  ;;  %586 = vmatpush1.msra.mxu1 %v2908_v24 }
  0x3e   :  { %516 = vmatprep.subr.mxu0 %v2910_v25  ;;  %587 = vmatprep.subr.mxu1 %v2912_v26 }
  0x3f   :  { %257 = vmatprep.mubr.f32.mxu0 %v3779_v0  ;;  %370 = vmatprep.mubr.f32.mxu1 %v3779_v0 }
  0x40   :  { %517 = vmatpush1.msra.mxu0 %v2918_v27  ;;  %588 = vmatpush1.msra.mxu1 %v2920_v28 }
  0x41   :  { %258 = vmatmul.mubr.f32.gmra.mxu0 %v84_v29  ;;  %371 = vmatmul.mubr.f32.gmra.mxu1 %v84_v29  ;;  %v3051_v29 = vld [vmem:[#allocation5 + $0x20] sm:$0xff] }
  0x42   :  { %518 = vmatprep.subr.mxu0 %v2929_v30  ;;  %589 = vmatprep.subr.mxu1 %v2931_v31  ;;  %3859 = vst [vmem:[#allocation22_spill] sm:$0xff] %v3051_v29 }
  0x43   :  { %519 = vmatpush1.msra.mxu0 %v2935_v32  ;;  %590 = vmatpush1.msra.mxu1 %v2937_v33 }
  0x44   :  { %520 = vmatprep.subr.mxu0 %v2939_v34  ;;  %591 = vmatprep.subr.mxu1 %v2941_v35 }
  0x45   :  { %263 = vmatprep.mubr.f32.mxu0 %v3779_v0  ;;  %376 = vmatprep.mubr.f32.mxu1 %v3779_v0 }
  0x46   :  { %521 = vmatpush1.msra.mxu0 %v2947_v36  ;;  %592 = vmatpush1.msra.mxu1 %v2949_v37 }
  0x47   :  { %264 = vmatmul.mubr.f32.gmra.mxu0 %v85_v38  ;;  %377 = vmatmul.mubr.f32.gmra.mxu1 %v85_v38  ;;  %v3053_v38 = vld [vmem:[#allocation5 + $0x30] sm:$0xff] }
  0x48   :  { %522 = vmatprep.subr.mxu0 %v2958_v39  ;;  %593 = vmatprep.subr.mxu1 %v2960_v40  ;;  %3860 = vst [vmem:[#allocation23_spill] sm:$0xff] %v3053_v38 }
  0x49   :  { %523 = vmatpush1.msra.mxu0 %v2964_v41  ;;  %594 = vmatpush1.msra.mxu1 %v2966_v42 }
  0x4a   :  { %524 = vmatprep.subr.mxu0 %v2968_v43  ;;  %595 = vmatprep.subr.mxu1 %v2970_v44 }
  0x4b   :  { %269 = vmatprep.mubr.f32.mxu0 %v3779_v0  ;;  %382 = vmatprep.mubr.f32.mxu1 %v3779_v0 }
  0x4c   :  { %525 = vmatpush1.msra.mxu0 %v2976_v45  ;;  %596 = vmatpush1.msra.mxu1 %v2978_v46 }
  0x4d   :  { %270 = vmatmul.mubr.f32.gmra.mxu0 %v86_v47  ;;  %383 = vmatmul.mubr.f32.gmra.mxu1 %v86_v47  ;;  %v3055_v47 = vld [vmem:[#allocation5 + $0x8] sm:$0xff] }
  0x4e   :  { %526 = vmatprep.subr.mxu0 %v2987_v48  ;;  %597 = vmatprep.subr.mxu1 %v2989_v49  ;;  %3861 = vst [vmem:[#allocation24_spill] sm:$0xff] %v3055_v47 }
  0x4f   :  { %527 = vmatpush1.msra.mxu0 %v2993_v50  ;;  %598 = vmatpush1.msra.mxu1 %v2995_v51 }
  0x50   :  { %528 = vmatprep.subr.mxu0 %v2997_v52  ;;  %599 = vmatprep.subr.mxu1 %v2999_v53 }
  0x51   :  { %275 = vmatprep.mubr.f32.mxu0 %v3779_v0  ;;  %388 = vmatprep.mubr.f32.mxu1 %v3779_v0 }
  0x52   :  { %529 = vmatpush1.msra.mxu0 %v3005_v54  ;;  %600 = vmatpush1.msra.mxu1 %v3007_v55 }
  0x53   :  { %276 = vmatmul.mubr.f32.gmra.mxu0 %v87_v56  ;;  %389 = vmatmul.mubr.f32.gmra.mxu1 %v87_v56  ;;  %v3057_v56 = vld [vmem:[#allocation5 + $0x18] sm:$0xff] }
  0x54   :  { %530 = vmatprep.subr.mxu0 %v3016_v57  ;;  %601 = vmatprep.subr.mxu1 %v3018_v58  ;;  %3862 = vst [vmem:[#allocation25_spill] sm:$0xff] %v3057_v56 }
  0x55   :  { %531 = vmatpush1.msra.mxu0 %v3022_v59  ;;  %602 = vmatpush1.msra.mxu1 %v3024_v60 }
  0x56   :  { %532 = vmatprep.subr.mxu0 %v3026_v61  ;;  %603 = vmatprep.subr.mxu1 %v3028_v62 }
  0x57   :  { %281 = vmatprep.mubr.f32.mxu0 %v3779_v0  ;;  %394 = vmatprep.mubr.f32.mxu1 %v3779_v0  ;;  %v3061_v0 = vld [vmem:[#allocation5] sm:$0xff] }
  0x58   :  { %533 = vmatpush1.msra.mxu0 %v3034_v63  ;;  %604 = vmatpush1.msra.mxu1 %v3036_v1  ;;  %3863 = vst [vmem:[#allocation26_spill] sm:$0xff] %v3061_v0  ;;  %v3065_v1 = vld [vmem:[#allocation5 + $0x10] sm:$0xff] }
  0x59   :  { %282 = vmatmul.mubr.f32.gmra.mxu0 %v88_v2  ;;  %395 = vmatmul.mubr.f32.gmra.mxu1 %v88_v2  ;;  %3864 = vst [vmem:[#allocation27_spill] sm:$0xff] %v3065_v1  ;;  %v77_v2 = vld [vmem:[%s3776_s4] sm:$0xff] }
  0x5a   :  { %534 = vmatprep.subr.mxu0 %v3045_v11  ;;  %605 = vmatprep.subr.mxu1 %v3047_v20  ;;  %v3865_v11 = vmov 0.0  }
  0x5b   :  { %535 = vmatpush1.msra.mxu0 %v3051_v29  ;;  %606 = vmatpush1.msra.mxu1 %v3053_v38 }
  0x5c   :  { %536 = vmatprep.subr.mxu0 %v3055_v47  ;;  %607 = vmatprep.subr.mxu1 %v3057_v56 }
  0x5d   :  { %537 = vmatpush1.msra.mxu0 %v3061_v0  ;;  %570 = vmatprep.mubr.f32.mxu0 %v3865_v11 }
  0x5e   :  { %608 = vmatpush1.msra.mxu1 %v3065_v1  ;;  %641 = vmatprep.mubr.f32.mxu1 %v3865_v11 }
  0x5f   :  { %571 = vmatmul.mubr.f32.vlgmr.msra.gmra.mxu0 %v77_v2  ;;  %642 = vmatmul.mubr.f32.vlgmr.msra.gmra.mxu1 %v77_v2  ;;  %v3866_v2 = vld [vmem:[#allocation19_spill] sm:$0xff] }
  0x60   :  { %748 = vmatprep.subr.mxu0 %v2844_v3  ;;  %819 = vmatprep.subr.mxu1 %v2846_v4 }
  0x61   :  { %749 = vmatpush1.msra.mxu0 %v2848_v5  ;;  %820 = vmatpush1.msra.mxu1 %v2850_v6 }
  0x62   :  { %750 = vmatprep.subr.mxu0 %v2852_v7  ;;  %821 = vmatprep.subr.mxu1 %v2854_v8 }
  0x63   :  { %751 = vmatpush1.msra.mxu0 %v2860_v9  ;;  %822 = vmatpush1.msra.mxu1 %v2862_v10 }
  0x64   :  { %752 = vmatprep.subr.mxu0 %v2871_v12  ;;  %823 = vmatprep.subr.mxu1 %v2873_v13 }
  0x65   :  { %753 = vmatpush1.msra.mxu0 %v2877_v14  ;;  %824 = vmatpush1.msra.mxu1 %v2879_v15 }
  0x66   :  { %754 = vmatprep.subr.mxu0 %v2881_v16  ;;  %825 = vmatprep.subr.mxu1 %v2883_v17 }
  0x67   :  { %755 = vmatpush1.msra.mxu0 %v2889_v18  ;;  %826 = vmatpush1.msra.mxu1 %v2891_v19 }
  0x68   :  { %756 = vmatprep.subr.mxu0 %v2900_v21  ;;  %827 = vmatprep.subr.mxu1 %v2902_v22 }
  0x69   :  { %757 = vmatpush1.msra.mxu0 %v2906_v23  ;;  %828 = vmatpush1.msra.mxu1 %v2908_v24 }
  0x6a   :  { %758 = vmatprep.subr.mxu0 %v2910_v25  ;;  %829 = vmatprep.subr.mxu1 %v2912_v26 }
  0x6b   :  { %759 = vmatpush1.msra.mxu0 %v2918_v27  ;;  %830 = vmatpush1.msra.mxu1 %v2920_v28 }
  0x6c   :  { %760 = vmatprep.subr.mxu0 %v2929_v30  ;;  %831 = vmatprep.subr.mxu1 %v2931_v31 }
  0x6d   :  { %761 = vmatpush1.msra.mxu0 %v2935_v32  ;;  %832 = vmatpush1.msra.mxu1 %v2937_v33 }
  0x6e   :  { %762 = vmatprep.subr.mxu0 %v2939_v34  ;;  %833 = vmatprep.subr.mxu1 %v2941_v35 }
  0x6f   :  { %763 = vmatpush1.msra.mxu0 %v2947_v36  ;;  %834 = vmatpush1.msra.mxu1 %v2949_v37 }
  0x70   :  { %764 = vmatprep.subr.mxu0 %v2958_v39  ;;  %835 = vmatprep.subr.mxu1 %v2960_v40 }
  0x71   :  { %765 = vmatpush1.msra.mxu0 %v2964_v41  ;;  %836 = vmatpush1.msra.mxu1 %v2966_v42 }
  0x72   :  { %766 = vmatprep.subr.mxu0 %v2968_v43  ;;  %837 = vmatprep.subr.mxu1 %v2970_v44 }
  0x73   :  { %767 = vmatpush1.msra.mxu0 %v2976_v45  ;;  %838 = vmatpush1.msra.mxu1 %v2978_v46 }
  0x74   :  { %768 = vmatprep.subr.mxu0 %v2987_v48  ;;  %839 = vmatprep.subr.mxu1 %v2989_v49 }
  0x75   :  { %769 = vmatpush1.msra.mxu0 %v2993_v50  ;;  %840 = vmatpush1.msra.mxu1 %v2995_v51 }
  0x76   :  { %770 = vmatprep.subr.mxu0 %v2997_v52  ;;  %841 = vmatprep.subr.mxu1 %v2999_v53  ;;  %v3867_v53 = vld [vmem:[#allocation20_spill] sm:$0xff] }
  0x77   :  { %771 = vmatpush1.msra.mxu0 %v3005_v54  ;;  %842 = vmatpush1.msra.mxu1 %v3007_v55 }
  0x78   :  { %772 = vmatprep.subr.mxu0 %v3016_v57  ;;  %843 = vmatprep.subr.mxu1 %v3018_v58 }
  0x79   :  { %773 = vmatpush1.msra.mxu0 %v3022_v59  ;;  %844 = vmatpush1.msra.mxu1 %v3024_v60 }
  0x7a   :  { %774 = vmatprep.subr.mxu0 %v3026_v61  ;;  %845 = vmatprep.subr.mxu1 %v3028_v62 }
  0x7b   :  { %775 = vmatpush1.msra.mxu0 %v3034_v63  ;;  %846 = vmatpush1.msra.mxu1 %v3866_v2 }
  0x7c   :  { %776 = vmatprep.subr.mxu0 %v3867_v53  ;;  %847 = vmatprep.subr.mxu1 %v3047_v20  ;;  %v155_v20 = vlaneseq }
  0x7d   :  { %777 = vmatpush1.msra.mxu0 %v3051_v29  ;;  %848 = vmatpush1.msra.mxu1 %v3053_v38 }
  0x7e   :  { %778 = vmatprep.subr.mxu0 %v3055_v47  ;;  %849 = vmatprep.subr.mxu1 %v3057_v56  ;;  %v156_v29 = vshrl.u32 %v155_v20, 7 }
  0x7f   :  { %779 = vmatpush1.msra.mxu0 %v3061_v0  ;;  %812 = vmatprep.mubr.f32.mxu0 %v3865_v11  ;;  %v153_v0 = vld [vmem:[%s3775_s3] sm:$0xf] }
  0x80   :  { %850 = vmatpush1.msra.mxu1 %v3065_v1  ;;  %883 = vmatprep.mubr.f32.mxu1 %v3865_v11  ;;  %v157_v47 = vsub.s32 0, %v156_v29  ;;  %v165_v56 = vsub.s32 2, %v156_v29  ;;  %v161_v11 = vsub.s32 1, %v156_v29 }
  0x81   :  { %991 = vmatprep.subr.mxu0 %v2844_v3  ;;  %1062 = vmatprep.subr.mxu1 %v2846_v4  ;;  %v169_v3 = vsub.s32 3, %v156_v29 }
  0x82   :  { %v158_v63 = vrot.slane %v153_v0, %v157_v47  ;;  %v3155_v4 = vrot.slane %v153_v0, %v165_v56  ;;  %v162_v61 = vrot.slane %v153_v0, %v161_v11 }
  0x83   :  { %v3157_v60 = vrot.slane %v153_v0, %v169_v3 }
  0xef   :  { %v3144_v53 = vpop.f32.mrf.mxu0  ;;  %v3146_v38 = vpop.f32.mrf.mxu1 }
  0xf1   :  { %v3151_v2 = vpop.f32.mrf.mxu0  ;;  %v3153_v1 = vpop.f32.mrf.mxu1 }
  0xf5   :  { %v247_v20 = vpop.f32.mrf.mxu0  ;;  %v360_v62 = vpop.f32.mrf.mxu1 }
  0xf6   :  { %v3159_v59 = vadd.f32 %v247_v20, %v158_v63  ;;  %v3162_v58 = vadd.f32 %v360_v62, %v3155_v4 }
  0xf7   :  { %v249_v57 = vpop.f32.mrf.mxu0  ;;  %v362_v55 = vpop.f32.mrf.mxu1 }
  0xf8   :  { %3868 = vst [vmem:[#allocation28_spill] sm:$0xff] %v3159_v59  ;;  %3869 = vst [vmem:[#allocation29_spill] sm:$0xff] %v3162_v58  ;;  %v3164_v54 = vadd.f32 %v249_v57, %v162_v61  ;;  %v3167_v52 = vadd.f32 %v362_v55, %v3157_v60 }
  0xfa   :  { %3870 = vst [vmem:[#allocation30_spill] sm:$0xff] %v3164_v54  ;;  %3871 = vst [vmem:[#allocation31_spill] sm:$0xff] %v3167_v52 }
  0xfb   :  { %v253_v29 = vpop.f32.mrf.mxu0  ;;  %v366_v47 = vpop.f32.mrf.mxu1 }
  0xfc   :  { %v3169_v56 = vadd.f32 %v253_v29, %v158_v63  ;;  %v3172_v11 = vadd.f32 %v366_v47, %v3155_v4 }
  0xfd   :  { %v255_v0 = vpop.f32.mrf.mxu0  ;;  %v368_v3 = vpop.f32.mrf.mxu1 }
  0xfe   :  { %3872 = vst [vmem:[#allocation32_spill] sm:$0xff] %v3169_v56  ;;  %3873 = vst [vmem:[#allocation33_spill] sm:$0xff] %v3172_v11  ;;  %v3174_v20 = vadd.f32 %v255_v0, %v162_v61  ;;  %v3177_v62 = vadd.f32 %v368_v3, %v3157_v60 }
 0x100   :  { %3874 = vst [vmem:[#allocation34_spill] sm:$0xff] %v3174_v20  ;;  %3875 = vst [vmem:[#allocation35_spill] sm:$0xff] %v3177_v62 }
 0x101   :  { %v259_v58 = vpop.f32.mrf.mxu0  ;;  %v372_v57 = vpop.f32.mrf.mxu1 }
 0x102   :  { %v3179_v54 = vadd.f32 %v259_v58, %v158_v63  ;;  %v3182_v55 = vadd.f32 %v372_v57, %v3155_v4 }
 0x103   :  { %v261_v52 = vpop.f32.mrf.mxu0  ;;  %v374_v29 = vpop.f32.mrf.mxu1 }
 0x104   :  { %3876 = vst [vmem:[#allocation36_spill] sm:$0xff] %v3179_v54  ;;  %3877 = vst [vmem:[#allocation37_spill] sm:$0xff] %v3182_v55  ;;  %v3184_v56 = vadd.f32 %v261_v52, %v162_v61  ;;  %v3187_v47 = vadd.f32 %v374_v29, %v3157_v60 }
 0x106   :  { %3878 = vst [vmem:[#allocation38_spill] sm:$0xff] %v3184_v56  ;;  %3879 = vst [vmem:[#allocation39_spill] sm:$0xff] %v3187_v47 }
 0x107   :  { %v265_v11 = vpop.f32.mrf.mxu0  ;;  %v378_v0 = vpop.f32.mrf.mxu1 }
 0x108   :  { %v3189_v20 = vadd.f32 %v265_v11, %v158_v63  ;;  %v3192_v3 = vadd.f32 %v378_v0, %v3155_v4 }
 0x109   :  { %v267_v62 = vpop.f32.mrf.mxu0  ;;  %v380_v58 = vpop.f32.mrf.mxu1 }
 0x10a   :  { %3880 = vst [vmem:[#allocation40_spill] sm:$0xff] %v3189_v20  ;;  %3881 = vst [vmem:[#allocation41_spill] sm:$0xff] %v3192_v3  ;;  %v3194_v54 = vadd.f32 %v267_v62, %v162_v61  ;;  %v3197_v57 = vadd.f32 %v380_v58, %v3157_v60 }
 0x10c   :  { %3882 = vst [vmem:[#allocation42_spill] sm:$0xff] %v3194_v54  ;;  %3883 = vst [vmem:[#allocation43_spill] sm:$0xff] %v3197_v57 }
 0x10d   :  { %v271_v55 = vpop.f32.mrf.mxu0  ;;  %v384_v52 = vpop.f32.mrf.mxu1 }
 0x10e   :  { %v3199_v56 = vadd.f32 %v271_v55, %v158_v63  ;;  %v3202_v29 = vadd.f32 %v384_v52, %v3155_v4 }
 0x10f   :  { %v273_v47 = vpop.f32.mrf.mxu0  ;;  %v386_v11 = vpop.f32.mrf.mxu1 }
 0x110   :  { %3884 = vst [vmem:[#allocation44_spill] sm:$0xff] %v3199_v56  ;;  %3885 = vst [vmem:[#allocation45_spill] sm:$0xff] %v3202_v29  ;;  %v3204_v20 = vadd.f32 %v273_v47, %v162_v61  ;;  %v3207_v0 = vadd.f32 %v386_v11, %v3157_v60 }
 0x112   :  { %3886 = vst [vmem:[#allocation46_spill] sm:$0xff] %v3204_v20  ;;  %3887 = vst [vmem:[#allocation47_spill] sm:$0xff] %v3207_v0 }
 0x113   :  { %v277_v3 = vpop.f32.mrf.mxu0  ;;  %v390_v62 = vpop.f32.mrf.mxu1 }
 0x114   :  { %v3209_v54 = vadd.f32 %v277_v3, %v158_v63  ;;  %v3212_v58 = vadd.f32 %v390_v62, %v3155_v4 }
 0x115   :  { %v279_v57 = vpop.f32.mrf.mxu0  ;;  %v392_v55 = vpop.f32.mrf.mxu1 }
 0x116   :  { %3888 = vst [vmem:[#allocation48_spill] sm:$0xff] %v3209_v54  ;;  %3889 = vst [vmem:[#allocation49_spill] sm:$0xff] %v3212_v58  ;;  %v3214_v56 = vadd.f32 %v279_v57, %v162_v61  ;;  %v3217_v52 = vadd.f32 %v392_v55, %v3157_v60  ;;  %v242_v57 = vadd.f32 %v3144_v53, %v158_v63 }
 0x117   :  { %v244_v55 = vadd.f32 %v3151_v2, %v162_v61 }
 0x118   :  { %3890 = vst [vmem:[#allocation50_spill] sm:$0xff] %v3214_v56  ;;  %3891 = vst [vmem:[#allocation51_spill] sm:$0xff] %v3217_v52 }
 0x119   :  { %v283_v29 = vpop.f32.mrf.mxu0  ;;  %v396_v47 = vpop.f32.mrf.mxu1 }
 0x11a   :  { %v3219_v20 = vadd.f32 %v283_v29, %v158_v63  ;;  %v3222_v11 = vadd.f32 %v396_v47, %v3155_v4 }
 0x11b   :  { %v285_v0 = vpop.f32.mrf.mxu0  ;;  %v398_v3 = vpop.f32.mrf.mxu1 }
 0x11c   :  { %3892 = vst [vmem:[#allocation52_spill] sm:$0xff] %v3219_v20  ;;  %3893 = vst [vmem:[#allocation53_spill] sm:$0xff] %v3222_v11  ;;  %v3224_v54 = vadd.f32 %v285_v0, %v162_v61  ;;  %v3227_v62 = vadd.f32 %v398_v3, %v3157_v60  ;;  %v357_v0 = vadd.f32 %v3153_v1, %v3157_v60  ;;  %v79_v60 = vld [vmem:[%s3777_s5] sm:$0xff] }
 0x11d   :  { %v355_v3 = vadd.f32 %v3146_v38, %v3155_v4 }
 0x11e   :  { %3894 = vst [vmem:[#allocation54_spill] sm:$0xff] %v3224_v54  ;;  %3895 = vst [vmem:[#allocation55_spill] sm:$0xff] %v3227_v62 }
 0x11f   :  { %v572_v58 = vpop.f32.mrf.mxu0  ;;  %v643_v20 = vpop.f32.mrf.mxu1 }
 0x120   :  { %v648_v52 = vadd.f32 %v572_v58, %v242_v57  ;;  %v650_v62 = vadd.f32 %v643_v20, %v355_v3 }
 0x121   :  { %v574_v56 = vpop.f32.mrf.mxu0  ;;  %v645_v11 = vpop.f32.mrf.mxu1 }
 0x122   :  { %v2420_v59 = vmul.f32 -1.442695, %v648_v52  ;;  %v649_v29 = vadd.f32 %v574_v56, %v244_v55  ;;  %v651_v54 = vadd.f32 %v645_v11, %v357_v0 }
 0x124   :  { %2455 = vpow2.f32 %v2420_v59  ;;  %v2421_v47 = vmul.f32 -1.442695, %v649_v29  ;;  %v2422_v53 = vmul.f32 -1.442695, %v651_v54 }
 0x126   :  { %2457 = vpow2.f32 %v2421_v47 }
 0x127   :  { %2459 = vpow2.f32 %v2422_v53 }
 0x131   :  { %v2456_v63 = vpop.eup %2455 }
 0x132   :  { %v655_v61 = vadd.f32 1.0, %v2456_v63 }
 0x133   :  { %v2458_v2 = vpop.eup %2457 }
 0x134   :  { %2461 = vrcp.f32 %v655_v61  ;;  %v661_v56 = vadd.f32 1.0, %v2458_v2  ;;  %v2460_v59 = vpop.eup %2459 }
 0x135   :  { %2463 = vtanh.f32 %v650_v62  ;;  %v668_v11 = vadd.f32 1.0, %v2460_v59  ;;  %v3323_v59 = vld [vmem:[#allocation5 + $0x1f8] sm:$0xff] }
 0x136   :  { %2465 = vrcp.f32 %v661_v56  ;;  %v3321_v56 = vld [vmem:[#allocation5 + $0x1e8] sm:$0xff] }
 0x137   :  { %2467 = vrcp.f32 %v668_v11  ;;  %v3339_v11 = vld [vmem:[#allocation5 + $0x1c0] sm:$0xff] }
 0x141   :  { %v2462_v58 = vpop.eup %2461 }
 0x142   :  { %v2464_v1 = vpop.eup %2463 }
 0x143   :  { %v2466_v52 = vpop.eup %2465  ;;  %v672_v38 = vmul.f32 %v2464_v1, %v2462_v58  ;;  %v3327_v58 = vld [vmem:[#allocation5 + $0x1e0] sm:$0xff]  ;;  %v3333_v1 = vld [vmem:[#allocation5 + $0x1c8] sm:$0xff] }
 0x144   :  { %v671_v54 = vmul.f32 %v2466_v52, %v79_v60  ;;  %v2468_v20 = vpop.eup %2467  ;;  %v3329_v60 = vld [vmem:[#allocation5 + $0x1f0] sm:$0xff]  ;;  %v3335_v52 = vld [vmem:[#allocation5 + $0x1d8] sm:$0xff] }
 0x146   :  { %v3238_v4 = vadd.f32 %v672_v38, %v671_v54  ;;  %v3341_v38 = vld [vmem:[#allocation5 + $0x1d0] sm:$0xff]  ;;  %v3345_v54 = vld [vmem:[#allocation5 + $0x1a8] sm:$0xff] }
 0x148   :  { %2469 = vtanh.f32 %v3238_v4 }
 0x155   :  { %v2470_v57 = vpop.eup %2469 }
 0x156   :  { %v675_v62 = vmul.f32 %v2470_v57, %v2468_v20  ;;  %v3351_v20 = vld [vmem:[#allocation5 + $0x1a0] sm:$0xff]  ;;  %v3353_v57 = vld [vmem:[#allocation5 + $0x1b0] sm:$0xff] }
 0x158   :  { %676 = vst [vmem:[%s3778_s6] sm:$0xff] %v675_v62  ;;  %813 = vmatmul.mubr.f32.vlgmr.msra.gmra.mxu0 %v675_v62  ;;  %884 = vmatmul.mubr.f32.vlgmr.msra.gmra.mxu1 %v675_v62  ;;  %v3357_v62 = vld [vmem:[#allocation5 + $0x188] sm:$0xff] }
 0x159   :  { %992 = vmatpush1.msra.mxu0 %v2848_v5  ;;  %1063 = vmatpush1.msra.mxu1 %v2850_v6  ;;  %v3896_v5 = vld [vmem:[#allocation8_spill] sm:$0xff]  ;;  %v3897_v6 = vld [vmem:[#allocation9_spill] sm:$0xff] }
 0x15a   :  { %993 = vmatprep.subr.mxu0 %v2852_v7  ;;  %1064 = vmatprep.subr.mxu1 %v2854_v8  ;;  %v3898_v7 = vld [vmem:[#allocation10_spill] sm:$0xff]  ;;  %v3899_v8 = vld [vmem:[#allocation11_spill] sm:$0xff]  ;;  %3921 = vst [vmem:[#allocation8_spill] sm:$0xff] %v3321_v56  ;;  %3922 = vst [vmem:[#allocation9_spill] sm:$0xff] %v3323_v59 }
 0x15b   :  { %994 = vmatpush1.msra.mxu0 %v2860_v9  ;;  %1065 = vmatpush1.msra.mxu1 %v2862_v10  ;;  %v3900_v9 = vld [vmem:[#allocation12_spill] sm:$0xff]  ;;  %v3901_v10 = vld [vmem:[#allocation13_spill] sm:$0xff] }
 0x15c   :  { %995 = vmatprep.subr.mxu0 %v2871_v12  ;;  %1066 = vmatprep.subr.mxu1 %v2873_v13  ;;  %v3902_v12 = vld [vmem:[#allocation14_spill] sm:$0xff]  ;;  %v3903_v13 = vld [vmem:[#allocation15_spill] sm:$0xff] }
 0x15d   :  { %996 = vmatpush1.msra.mxu0 %v2877_v14  ;;  %1067 = vmatpush1.msra.mxu1 %v2879_v15  ;;  %v3904_v14 = vld [vmem:[#allocation16_spill] sm:$0xff]  ;;  %v3905_v15 = vld [vmem:[#allocation17_spill] sm:$0xff] }
 0x15e   :  { %997 = vmatprep.subr.mxu0 %v2881_v16  ;;  %1068 = vmatprep.subr.mxu1 %v2883_v17  ;;  %v3906_v16 = vld [vmem:[#allocation18_spill] sm:$0xff]  ;;  %v3907_v17 = vld [vmem:[#allocation19_spill] sm:$0xff] }
 0x15f   :  { %998 = vmatpush1.msra.mxu0 %v2889_v18  ;;  %1069 = vmatpush1.msra.mxu1 %v2891_v19  ;;  %v3908_v18 = vld [vmem:[#allocation20_spill] sm:$0xff]  ;;  %v3909_v19 = vld [vmem:[#allocation21_spill] sm:$0xff] }
 0x160   :  { %999 = vmatprep.subr.mxu0 %v2900_v21  ;;  %1070 = vmatprep.subr.mxu1 %v2902_v22  ;;  %v3910_v21 = vld [vmem:[#allocation22_spill] sm:$0xff]  ;;  %v3911_v22 = vld [vmem:[#allocation23_spill] sm:$0xff] }
 0x161   :  { %1000 = vmatpush1.msra.mxu0 %v2906_v23  ;;  %1071 = vmatpush1.msra.mxu1 %v2908_v24  ;;  %v3912_v23 = vld [vmem:[#allocation24_spill] sm:$0xff]  ;;  %v3913_v24 = vld [vmem:[#allocation25_spill] sm:$0xff] }
 0x162   :  { %1001 = vmatprep.subr.mxu0 %v2910_v25  ;;  %1072 = vmatprep.subr.mxu1 %v2912_v26  ;;  %v3914_v25 = vld [vmem:[#allocation26_spill] sm:$0xff]  ;;  %v3915_v26 = vmov 0.0  }
 0x163   :  { %1002 = vmatpush1.msra.mxu0 %v2918_v27  ;;  %1073 = vmatpush1.msra.mxu1 %v2920_v28  ;;  %v3916_v27 = vld [vmem:[#allocation27_spill] sm:$0xff] }
 0x164   :  { %1003 = vmatprep.subr.mxu0 %v2929_v30  ;;  %1074 = vmatprep.subr.mxu1 %v2931_v31  ;;  %v3917_v30 = vld [vmem:[#allocation28_spill] sm:$0xff] }
 0x165   :  { %1004 = vmatpush1.msra.mxu0 %v2935_v32  ;;  %1075 = vmatpush1.msra.mxu1 %v2937_v33 }
 0x166   :  { %1005 = vmatprep.subr.mxu0 %v2939_v34  ;;  %1076 = vmatprep.subr.mxu1 %v2941_v35  ;;  %v3918_v34 = vld [vmem:[#allocation30_spill] sm:$0xff] }
 0x167   :  { %1006 = vmatpush1.msra.mxu0 %v2947_v36  ;;  %1077 = vmatpush1.msra.mxu1 %v2949_v37 }
 0x168   :  { %1007 = vmatprep.subr.mxu0 %v2958_v39  ;;  %1078 = vmatprep.subr.mxu1 %v2960_v40  ;;  %v3919_v40 = vld [vmem:[#allocation31_spill] sm:$0xff] }
 0x169   :  { %1008 = vmatpush1.msra.mxu0 %v2964_v41  ;;  %1079 = vmatpush1.msra.mxu1 %v2966_v42  ;;  %v3920_v42 = vld [vmem:[#allocation29_spill] sm:$0xff] }
 0x16a   :  { %1009 = vmatprep.subr.mxu0 %v2968_v43  ;;  %1080 = vmatprep.subr.mxu1 %v2970_v44 }
 0x16b   :  { %1010 = vmatpush1.msra.mxu0 %v2976_v45  ;;  %1081 = vmatpush1.msra.mxu1 %v2978_v46 }
 0x16c   :  { %1011 = vmatprep.subr.mxu0 %v2987_v48  ;;  %1082 = vmatprep.subr.mxu1 %v2989_v49 }
 0x16d   :  { %1012 = vmatpush1.msra.mxu0 %v2993_v50  ;;  %1083 = vmatpush1.msra.mxu1 %v2995_v51 }
 0x16e   :  { %1013 = vmatprep.subr.mxu0 %v3896_v5  ;;  %1084 = vmatprep.subr.mxu1 %v3897_v6  ;;  %v3359_v5 = vld [vmem:[#allocation5 + $0x198] sm:$0xff]  ;;  %v3363_v6 = vld [vmem:[#allocation5 + $0x180] sm:$0xff] }
 0x16f   :  { %1014 = vmatpush1.msra.mxu0 %v3898_v7  ;;  %1085 = vmatpush1.msra.mxu1 %v3899_v8  ;;  %v3365_v7 = vld [vmem:[#allocation5 + $0x190] sm:$0xff]  ;;  %v3369_v8 = vld [vmem:[#allocation5 + $0x168] sm:$0xff] }
 0x170   :  { %1015 = vmatprep.subr.mxu0 %v3900_v9  ;;  %1086 = vmatprep.subr.mxu1 %v3901_v10  ;;  %v3371_v9 = vld [vmem:[#allocation5 + $0x178] sm:$0xff]  ;;  %v3375_v10 = vld [vmem:[#allocation5 + $0x160] sm:$0xff] }
 0x171   :  { %1016 = vmatpush1.msra.mxu0 %v3902_v12  ;;  %1087 = vmatpush1.msra.mxu1 %v3903_v13  ;;  %v3377_v12 = vld [vmem:[#allocation5 + $0x170] sm:$0xff]  ;;  %v3381_v13 = vld [vmem:[#allocation5 + $0x148] sm:$0xff] }
 0x172   :  { %1017 = vmatprep.subr.mxu0 %v3904_v14  ;;  %1088 = vmatprep.subr.mxu1 %v3905_v15  ;;  %v3383_v14 = vld [vmem:[#allocation5 + $0x158] sm:$0xff]  ;;  %v3387_v15 = vld [vmem:[#allocation5 + $0x140] sm:$0xff] }
 0x173   :  { %1018 = vmatpush1.msra.mxu0 %v3906_v16  ;;  %1089 = vmatpush1.msra.mxu1 %v3907_v17  ;;  %v3389_v16 = vld [vmem:[#allocation5 + $0x150] sm:$0xff]  ;;  %v3393_v17 = vld [vmem:[#allocation5 + $0x128] sm:$0xff] }
 0x174   :  { %1019 = vmatprep.subr.mxu0 %v3908_v18  ;;  %1090 = vmatprep.subr.mxu1 %v3909_v19  ;;  %v3395_v18 = vld [vmem:[#allocation5 + $0x138] sm:$0xff]  ;;  %v3399_v19 = vld [vmem:[#allocation5 + $0x120] sm:$0xff] }
 0x175   :  { %1020 = vmatpush1.msra.mxu0 %v3910_v21  ;;  %1091 = vmatpush1.msra.mxu1 %v3911_v22  ;;  %v3401_v21 = vld [vmem:[#allocation5 + $0x130] sm:$0xff]  ;;  %v3405_v22 = vld [vmem:[#allocation5 + $0x108] sm:$0xff] }
 0x176   :  { %1021 = vmatprep.subr.mxu0 %v3912_v23  ;;  %1092 = vmatprep.subr.mxu1 %v3913_v24  ;;  %v3407_v23 = vld [vmem:[#allocation5 + $0x118] sm:$0xff]  ;;  %v3409_v24 = vld [vmem:[#allocation5 + $0x100] sm:$0xff] }
 0x177   :  { %1022 = vmatpush1.msra.mxu0 %v3914_v25  ;;  %1055 = vmatprep.mubr.f32.mxu0 %v3915_v26  ;;  %v3413_v25 = vld [vmem:[#allocation5 + $0x110] sm:$0xff] }
 0x178   :  { %1093 = vmatpush1.msra.mxu1 %v3916_v27  ;;  %1126 = vmatprep.mubr.f32.mxu1 %v3915_v26  ;;  %v3415_v27 = vld [vmem:[#allocation5 + $0xe8] sm:$0xff] }
 0x179   :  { %1234 = vmatprep.subr.mxu0 %v3321_v56  ;;  %1305 = vmatprep.subr.mxu1 %v3323_v59 }
 0x218   :  { %v814_v28 = vpop.f32.mrf.mxu0  ;;  %v885_v36 = vpop.f32.mrf.mxu1 }
 0x219   :  { %v890_v31 = vadd.f32 %v814_v28, %v3917_v30  ;;  %v892_v43 = vadd.f32 %v885_v36, %v3920_v42  ;;  %v3417_v28 = vld [vmem:[#allocation5 + $0xf8] sm:$0xff]  ;;  %v3421_v30 = vld [vmem:[#allocation5 + $0xe0] sm:$0xff]  ;;  %v3437_v36 = vld [vmem:[#allocation5 + $0xa8] sm:$0xff] }
 0x21a   :  { %v816_v32 = vpop.f32.mrf.mxu0  ;;  %v887_v39 = vpop.f32.mrf.mxu1  ;;  %v3451_v42 = vld [vmem:[#allocation5 + $0x98] sm:$0xff] }
 0x21b   :  { %v2423_v33 = vmul.f32 -1.442695, %v890_v31  ;;  %v891_v35 = vadd.f32 %v816_v32, %v3918_v34  ;;  %v893_v41 = vadd.f32 %v887_v39, %v3919_v40  ;;  %v3423_v31 = vld [vmem:[#allocation5 + $0xf0] sm:$0xff]  ;;  %v3425_v32 = vld [vmem:[#allocation5 + $0xc8] sm:$0xff]  ;;  %v3431_v34 = vld [vmem:[#allocation5 + $0xc0] sm:$0xff] }
 0x21c   :  { %v3443_v39 = vld [vmem:[#allocation5 + $0xa0] sm:$0xff]  ;;  %v3445_v40 = vld [vmem:[#allocation5 + $0xb0] sm:$0xff] }
 0x21d   :  { %2471 = vpow2.f32 %v2423_v33  ;;  %v2424_v37 = vmul.f32 -1.442695, %v891_v35  ;;  %v2425_v44 = vmul.f32 -1.442695, %v893_v41  ;;  %v3429_v33 = vld [vmem:[#allocation5 + $0xd8] sm:$0xff]  ;;  %v3433_v35 = vld [vmem:[#allocation5 + $0xd0] sm:$0xff] }
 0x21e   :  { %v3449_v41 = vld [vmem:[#allocation5 + $0x88] sm:$0xff] }
 0x21f   :  { %2473 = vpow2.f32 %v2424_v37  ;;  %v3439_v37 = vld [vmem:[#allocation5 + $0xb8] sm:$0xff] }
 0x220   :  { %2475 = vtanh.f32 %v892_v43  ;;  %v3455_v43 = vld [vmem:[#allocation5 + $0x80] sm:$0xff] }
 0x221   :  { %2477 = vpow2.f32 %v2425_v44  ;;  %v3457_v44 = vld [vmem:[#allocation5 + $0x90] sm:$0xff] }
 0x222   :  { %3923 = vst [vmem:[#allocation10_spill] sm:$0xff] %v3457_v44 }
 0x22a   :  { %v2472_v45 = vpop.eup %2471 }
 0x22b   :  { %v897_v46 = vadd.f32 1.0, %v2472_v45  ;;  %v3461_v45 = vld [vmem:[#allocation5 + $0x68] sm:$0xff] }
 0x22c   :  { %v2474_v48 = vpop.eup %2473  ;;  %3924 = vst [vmem:[#allocation11_spill] sm:$0xff] %v3461_v45 }
 0x22d   :  { %2479 = vrcp.f32 %v897_v46  ;;  %v903_v49 = vadd.f32 1.0, %v2474_v48  ;;  %v2476_v50 = vpop.eup %2475  ;;  %v3463_v46 = vld [vmem:[#allocation5 + $0x78] sm:$0xff]  ;;  %v3467_v48 = vld [vmem:[#allocation5 + $0x60] sm:$0xff] }
 0x22e   :  { %v2478_v51 = vpop.eup %2477  ;;  %3925 = vst [vmem:[#allocation12_spill] sm:$0xff] %v3463_v46  ;;  %3926 = vst [vmem:[#allocation13_spill] sm:$0xff] %v3467_v48 }
 0x22f   :  { %2481 = vrcp.f32 %v903_v49  ;;  %v910_v0 = vadd.f32 1.0, %v2478_v51  ;;  %v3469_v49 = vld [vmem:[#allocation5 + $0x70] sm:$0xff]  ;;  %v3475_v51 = vld [vmem:[#allocation5 + $0x58] sm:$0xff] }
 0x230   :  { %3927 = vst [vmem:[#allocation14_spill] sm:$0xff] %v3469_v49  ;;  %3929 = vst [vmem:[#allocation16_spill] sm:$0xff] %v3475_v51 }
 0x231   :  { %2483 = vrcp.f32 %v910_v0  ;;  %v3487_v0 = vld [vmem:[#allocation5 + $0x38] sm:$0xff] }
 0x232   :  { %3933 = vst [vmem:[#allocation20_spill] sm:$0xff] %v3487_v0 }
 0x23a   :  { %v2480_v55 = vpop.eup %2479 }
 0x23b   :  { %v914_v29 = vmul.f32 %v2480_v55, %v2476_v50  ;;  %v3473_v50 = vld [vmem:[#allocation5 + $0x48] sm:$0xff]  ;;  %v3479_v55 = vld [vmem:[#allocation5 + $0x40] sm:$0xff] }
 0x23c   :  { %v2482_v47 = vpop.eup %2481  ;;  %3928 = vst [vmem:[#allocation15_spill] sm:$0xff] %v3473_v50  ;;  %3930 = vst [vmem:[#allocation17_spill] sm:$0xff] %v3479_v55 }
 0x23d   :  { %v913_v3 = vmul.f32 %v2482_v47, %v3238_v4  ;;  %v3347_v4 = vld [vmem:[#allocation5 + $0x1b8] sm:$0xff]  ;;  %v3485_v47 = vld [vmem:[#allocation5 + $0x28] sm:$0xff] }
 0x23e   :  { %v2484_v63 = vpop.eup %2483  ;;  %3932 = vst [vmem:[#allocation19_spill] sm:$0xff] %v3485_v47 }
 0x23f   :  { %v3313_v53 = vadd.f32 %v914_v29, %v913_v3  ;;  %v3481_v29 = vld [vmem:[#allocation5 + $0x50] sm:$0xff]  ;;  %v3491_v3 = vld [vmem:[#allocation5 + $0x20] sm:$0xff] }
 0x240   :  { %3931 = vst [vmem:[#allocation18_spill] sm:$0xff] %v3481_v29  ;;  %3934 = vst [vmem:[#allocation21_spill] sm:$0xff] %v3491_v3 }
 0x241   :  { %2485 = vtanh.f32 %v3313_v53 }
 0x24e   :  { %v2486_v61 = vpop.eup %2485 }
 0x24f   :  { %v917_v2 = vmul.f32 %v2486_v61, %v2484_v63  ;;  %v3493_v63 = vld [vmem:[#allocation5 + $0x30] sm:$0xff]  ;;  %v3497_v61 = vld [vmem:[#allocation5 + $0x8] sm:$0xff] }
 0x250   :  { %3935 = vst [vmem:[#allocation22_spill] sm:$0xff] %v3493_v63  ;;  %3936 = vst [vmem:[#allocation23_spill] sm:$0xff] %v3497_v61 }
 0x251   :  { %2426 = vst [vmem:[%s3778_s6 + $0x8] sm:$0xff] %v917_v2  ;;  %1056 = vmatmul.mubr.f32.vlgmr.msra.gmra.mxu0 %v917_v2  ;;  %1127 = vmatmul.mubr.f32.vlgmr.msra.gmra.mxu1 %v917_v2  ;;  %v3499_v2 = vld [vmem:[#allocation5 + $0x18] sm:$0xff] }
 0x252   :  { %1298 = vmatprep.mubr.f32.mxu0 %v3915_v26  ;;  %1369 = vmatprep.mubr.f32.mxu1 %v3915_v26  ;;  %3937 = vst [vmem:[#allocation24_spill] sm:$0xff] %v3499_v2  ;;  %v3503_v26 = vld [vmem:[#allocation5] sm:$0xff] }
 0x253   :  { %1235 = vmatpush1.msra.mxu0 %v3327_v58  ;;  %1306 = vmatpush1.msra.mxu1 %v3329_v60  ;;  %3938 = vst [vmem:[#allocation25_spill] sm:$0xff] %v3503_v26 }
 0x254   :  { %1236 = vmatprep.subr.mxu0 %v3333_v1  ;;  %1307 = vmatprep.subr.mxu1 %v3335_v52 }
 0x255   :  { %1237 = vmatpush1.msra.mxu0 %v3339_v11  ;;  %1308 = vmatpush1.msra.mxu1 %v3341_v38 }
 0x256   :  { %1238 = vmatprep.subr.mxu0 %v3345_v54  ;;  %1309 = vmatprep.subr.mxu1 %v3347_v4 }
 0x257   :  { %1239 = vmatpush1.msra.mxu0 %v3351_v20  ;;  %1310 = vmatpush1.msra.mxu1 %v3353_v57 }
 0x258   :  { %1240 = vmatprep.subr.mxu0 %v3357_v62  ;;  %1311 = vmatprep.subr.mxu1 %v3359_v5 }
 0x259   :  { %1241 = vmatpush1.msra.mxu0 %v3363_v6  ;;  %1312 = vmatpush1.msra.mxu1 %v3365_v7 }
 0x25a   :  { %1242 = vmatprep.subr.mxu0 %v3369_v8  ;;  %1313 = vmatprep.subr.mxu1 %v3371_v9 }
 0x25b   :  { %1243 = vmatpush1.msra.mxu0 %v3375_v10  ;;  %1314 = vmatpush1.msra.mxu1 %v3377_v12 }
 0x25c   :  { %1244 = vmatprep.subr.mxu0 %v3381_v13  ;;  %1315 = vmatprep.subr.mxu1 %v3383_v14 }
 0x25d   :  { %1245 = vmatpush1.msra.mxu0 %v3387_v15  ;;  %1316 = vmatpush1.msra.mxu1 %v3389_v16 }
 0x25e   :  { %1246 = vmatprep.subr.mxu0 %v3393_v17  ;;  %1317 = vmatprep.subr.mxu1 %v3395_v18 }
 0x25f   :  { %1247 = vmatpush1.msra.mxu0 %v3399_v19  ;;  %1318 = vmatpush1.msra.mxu1 %v3401_v21 }
 0x260   :  { %1248 = vmatprep.subr.mxu0 %v3405_v22  ;;  %1319 = vmatprep.subr.mxu1 %v3407_v23 }
 0x261   :  { %1249 = vmatpush1.msra.mxu0 %v3409_v24  ;;  %1320 = vmatpush1.msra.mxu1 %v3413_v25 }
 0x262   :  { %1250 = vmatprep.subr.mxu0 %v3415_v27  ;;  %1321 = vmatprep.subr.mxu1 %v3417_v28 }
 0x263   :  { %1251 = vmatpush1.msra.mxu0 %v3421_v30  ;;  %1322 = vmatpush1.msra.mxu1 %v3423_v31 }
 0x264   :  { %1252 = vmatprep.subr.mxu0 %v3425_v32  ;;  %1323 = vmatprep.subr.mxu1 %v3429_v33 }
 0x265   :  { %1253 = vmatpush1.msra.mxu0 %v3431_v34  ;;  %1324 = vmatpush1.msra.mxu1 %v3433_v35 }
 0x266   :  { %1254 = vmatprep.subr.mxu0 %v3437_v36  ;;  %1325 = vmatprep.subr.mxu1 %v3439_v37 }
 0x267   :  { %1255 = vmatpush1.msra.mxu0 %v3443_v39  ;;  %1326 = vmatpush1.msra.mxu1 %v3445_v40 }
 0x268   :  { %1256 = vmatprep.subr.mxu0 %v3449_v41  ;;  %1327 = vmatprep.subr.mxu1 %v3451_v42 }
 0x269   :  { %1257 = vmatpush1.msra.mxu0 %v3455_v43  ;;  %1328 = vmatpush1.msra.mxu1 %v3457_v44 }
 0x26a   :  { %1258 = vmatprep.subr.mxu0 %v3461_v45  ;;  %1329 = vmatprep.subr.mxu1 %v3463_v46  ;;  %v3943_v46 = vld [vmem:[#allocation33_spill] sm:$0xff] }
 0x26b   :  { %1259 = vmatpush1.msra.mxu0 %v3467_v48  ;;  %1330 = vmatpush1.msra.mxu1 %v3469_v49  ;;  %v3942_v48 = vld [vmem:[#allocation35_spill] sm:$0xff] }
 0x26c   :  { %1260 = vmatprep.subr.mxu0 %v3473_v50  ;;  %1331 = vmatprep.subr.mxu1 %v3475_v51  ;;  %v3505_v50 = vld [vmem:[#allocation5 + $0x10] sm:$0xff] }
 0x26d   :  { %1261 = vmatpush1.msra.mxu0 %v3479_v55  ;;  %1332 = vmatpush1.msra.mxu1 %v3481_v29  ;;  %3939 = vst [vmem:[#allocation26_spill] sm:$0xff] %v3505_v50 }
 0x26e   :  { %1262 = vmatprep.subr.mxu0 %v3485_v47  ;;  %1333 = vmatprep.subr.mxu1 %v3487_v0  ;;  %v3940_v47 = vld [vmem:[#allocation32_spill] sm:$0xff] }
 0x26f   :  { %1263 = vmatpush1.msra.mxu0 %v3491_v3  ;;  %1334 = vmatpush1.msra.mxu1 %v3493_v63  ;;  %v3941_v3 = vld [vmem:[#allocation34_spill] sm:$0xff] }
 0x270   :  { %1264 = vmatprep.subr.mxu0 %v3497_v61  ;;  %1335 = vmatprep.subr.mxu1 %v3499_v2 }
 0x271   :  { %1265 = vmatpush1.msra.mxu0 %v3503_v26  ;;  %1336 = vmatpush1.msra.mxu1 %v3505_v50 }
 0x272   :  { %1477 = vmatprep.subr.mxu0 %v3321_v56  ;;  %1548 = vmatprep.subr.mxu1 %v3323_v59 }
 0x311   :  { %v1057_v0 = vpop.f32.mrf.mxu0  ;;  %v1128_v63 = vpop.f32.mrf.mxu1 }
 0x312   :  { %v1133_v29 = vadd.f32 %v1057_v0, %v3940_v47  ;;  %v1135_v50 = vadd.f32 %v1128_v63, %v3943_v46  ;;  %v3949_v63 = vld [vmem:[#allocation15_spill] sm:$0xff] }
 0x313   :  { %v1059_v55 = vpop.f32.mrf.mxu0  ;;  %v1130_v2 = vpop.f32.mrf.mxu1 }
 0x314   :  { %v2427_v51 = vmul.f32 -1.442695, %v1133_v29  ;;  %v1134_v49 = vadd.f32 %v1059_v55, %v3941_v3  ;;  %v1136_v26 = vadd.f32 %v1130_v2, %v3942_v48  ;;  %v3950_v2 = vld [vmem:[#allocation16_spill] sm:$0xff] }
 0x316   :  { %2487 = vpow2.f32 %v2427_v51  ;;  %v2428_v61 = vmul.f32 -1.442695, %v1134_v49  ;;  %v2429_v45 = vmul.f32 -1.442695, %v1136_v26 }
 0x318   :  { %2489 = vpow2.f32 %v2428_v61 }
 0x319   :  { %2491 = vtanh.f32 %v1135_v50  ;;  %v3948_v50 = vld [vmem:[#allocation14_spill] sm:$0xff] }
 0x31a   :  { %2493 = vpow2.f32 %v2429_v45  ;;  %v3947_v45 = vld [vmem:[#allocation13_spill] sm:$0xff] }
 0x323   :  { %v2488_v56 = vpop.eup %2487 }
 0x324   :  { %v1140_v44 = vadd.f32 1.0, %v2488_v56 }
 0x325   :  { %v2490_v59 = vpop.eup %2489 }
 0x326   :  { %2495 = vrcp.f32 %v1140_v44  ;;  %v1146_v47 = vadd.f32 1.0, %v2490_v59  ;;  %v2492_v29 = vpop.eup %2491  ;;  %v3945_v59 = vld [vmem:[#allocation11_spill] sm:$0xff]  ;;  %v3946_v44 = vld [vmem:[#allocation12_spill] sm:$0xff] }
 0x327   :  { %v2494_v55 = vpop.eup %2493 }
 0x328   :  { %2497 = vrcp.f32 %v1146_v47  ;;  %v1153_v3 = vadd.f32 1.0, %v2494_v55  ;;  %v3951_v47 = vld [vmem:[#allocation17_spill] sm:$0xff]  ;;  %v3953_v55 = vld [vmem:[#allocation19_spill] sm:$0xff] }
 0x32a   :  { %2499 = vrcp.f32 %v1153_v3  ;;  %v3957_v3 = vld [vmem:[#allocation23_spill] sm:$0xff] }
 0x333   :  { %v2496_v51 = vpop.eup %2495 }
 0x334   :  { %v1157_v0 = vmul.f32 %v2496_v51, %v2492_v29  ;;  %v3952_v29 = vld [vmem:[#allocation18_spill] sm:$0xff]  ;;  %v3954_v51 = vld [vmem:[#allocation20_spill] sm:$0xff] }
 0x335   :  { %v2498_v49 = vpop.eup %2497 }
 0x336   :  { %v1156_v61 = vmul.f32 %v2498_v49, %v3313_v53  ;;  %v3944_v53 = vld [vmem:[#allocation10_spill] sm:$0xff] }
 0x337   :  { %v2500_v26 = vpop.eup %2499  ;;  %v3956_v49 = vld [vmem:[#allocation22_spill] sm:$0xff] }
 0x338   :  { %v3520_v48 = vadd.f32 %v1157_v0, %v1156_v61  ;;  %v3955_v0 = vld [vmem:[#allocation21_spill] sm:$0xff]  ;;  %v3958_v61 = vld [vmem:[#allocation24_spill] sm:$0xff] }
 0x33a   :  { %2501 = vtanh.f32 %v3520_v48 }
 0x347   :  { %v2502_v56 = vpop.eup %2501 }
 0x348   :  { %v1160_v46 = vmul.f32 %v2502_v56, %v2500_v26  ;;  %v3959_v26 = vld [vmem:[#allocation25_spill] sm:$0xff]  ;;  %v3960_v56 = vmov 0.0  }
 0x34a   :  { %2430 = vst [vmem:[%s3778_s6 + $0x10] sm:$0xff] %v1160_v46  ;;  %1299 = vmatmul.mubr.f32.vlgmr.msra.gmra.mxu0 %v1160_v46  ;;  %1370 = vmatmul.mubr.f32.vlgmr.msra.gmra.mxu1 %v1160_v46  ;;  %v3961_v46 = vld [vmem:[#allocation26_spill] sm:$0xff] }
 0x34b   :  { %1478 = vmatpush1.msra.mxu0 %v3327_v58  ;;  %1549 = vmatpush1.msra.mxu1 %v3329_v60 }
 0x34c   :  { %1479 = vmatprep.subr.mxu0 %v3333_v1  ;;  %1550 = vmatprep.subr.mxu1 %v3335_v52 }
 0x34d   :  { %1480 = vmatpush1.msra.mxu0 %v3339_v11  ;;  %1551 = vmatpush1.msra.mxu1 %v3341_v38 }
 0x34e   :  { %1481 = vmatprep.subr.mxu0 %v3345_v54  ;;  %1552 = vmatprep.subr.mxu1 %v3347_v4 }
 0x34f   :  { %1482 = vmatpush1.msra.mxu0 %v3351_v20  ;;  %1553 = vmatpush1.msra.mxu1 %v3353_v57 }
 0x350   :  { %1483 = vmatprep.subr.mxu0 %v3357_v62  ;;  %1554 = vmatprep.subr.mxu1 %v3359_v5 }
 0x351   :  { %1484 = vmatpush1.msra.mxu0 %v3363_v6  ;;  %1555 = vmatpush1.msra.mxu1 %v3365_v7 }
 0x352   :  { %1485 = vmatprep.subr.mxu0 %v3369_v8  ;;  %1556 = vmatprep.subr.mxu1 %v3371_v9 }
 0x353   :  { %1486 = vmatpush1.msra.mxu0 %v3375_v10  ;;  %1557 = vmatpush1.msra.mxu1 %v3377_v12 }
 0x354   :  { %1487 = vmatprep.subr.mxu0 %v3381_v13  ;;  %1558 = vmatprep.subr.mxu1 %v3383_v14 }
 0x355   :  { %1488 = vmatpush1.msra.mxu0 %v3387_v15  ;;  %1559 = vmatpush1.msra.mxu1 %v3389_v16 }
 0x356   :  { %1489 = vmatprep.subr.mxu0 %v3393_v17  ;;  %1560 = vmatprep.subr.mxu1 %v3395_v18 }
 0x357   :  { %1490 = vmatpush1.msra.mxu0 %v3399_v19  ;;  %1561 = vmatpush1.msra.mxu1 %v3401_v21 }
 0x358   :  { %1491 = vmatprep.subr.mxu0 %v3405_v22  ;;  %1562 = vmatprep.subr.mxu1 %v3407_v23 }
 0x359   :  { %1492 = vmatpush1.msra.mxu0 %v3409_v24  ;;  %1563 = vmatpush1.msra.mxu1 %v3413_v25 }
 0x35a   :  { %1493 = vmatprep.subr.mxu0 %v3415_v27  ;;  %1564 = vmatprep.subr.mxu1 %v3417_v28 }
 0x35b   :  { %1494 = vmatpush1.msra.mxu0 %v3421_v30  ;;  %1565 = vmatpush1.msra.mxu1 %v3423_v31 }
 0x35c   :  { %1495 = vmatprep.subr.mxu0 %v3425_v32  ;;  %1566 = vmatprep.subr.mxu1 %v3429_v33 }
 0x35d   :  { %1496 = vmatpush1.msra.mxu0 %v3431_v34  ;;  %1567 = vmatpush1.msra.mxu1 %v3433_v35 }
 0x35e   :  { %1497 = vmatprep.subr.mxu0 %v3437_v36  ;;  %1568 = vmatprep.subr.mxu1 %v3439_v37 }
 0x35f   :  { %1498 = vmatpush1.msra.mxu0 %v3443_v39  ;;  %1569 = vmatpush1.msra.mxu1 %v3445_v40 }
 0x360   :  { %1499 = vmatprep.subr.mxu0 %v3449_v41  ;;  %1570 = vmatprep.subr.mxu1 %v3451_v42 }
 0x361   :  { %1500 = vmatpush1.msra.mxu0 %v3455_v43  ;;  %1571 = vmatpush1.msra.mxu1 %v3944_v53 }
 0x362   :  { %1501 = vmatprep.subr.mxu0 %v3945_v59  ;;  %1572 = vmatprep.subr.mxu1 %v3946_v44  ;;  %v3967_v44 = vld [vmem:[#allocation37_spill] sm:$0xff] }
 0x363   :  { %1502 = vmatpush1.msra.mxu0 %v3947_v45  ;;  %1573 = vmatpush1.msra.mxu1 %v3948_v50  ;;  %v3966_v45 = vld [vmem:[#allocation39_spill] sm:$0xff] }
 0x364   :  { %1503 = vmatprep.subr.mxu0 %v3949_v63  ;;  %1574 = vmatprep.subr.mxu1 %v3950_v2 }
 0x365   :  { %1504 = vmatpush1.msra.mxu0 %v3951_v47  ;;  %1575 = vmatpush1.msra.mxu1 %v3952_v29  ;;  %v3962_v29 = vld [vmem:[#allocation8_spill] sm:$0xff] }
 0x366   :  { %1505 = vmatprep.subr.mxu0 %v3953_v55  ;;  %1576 = vmatprep.subr.mxu1 %v3954_v51  ;;  %v3963_v55 = vld [vmem:[#allocation9_spill] sm:$0xff] }
 0x367   :  { %1506 = vmatpush1.msra.mxu0 %v3955_v0  ;;  %1577 = vmatpush1.msra.mxu1 %v3956_v49  ;;  %v3964_v0 = vld [vmem:[#allocation36_spill] sm:$0xff] }
 0x368   :  { %1507 = vmatprep.subr.mxu0 %v3957_v3  ;;  %1578 = vmatprep.subr.mxu1 %v3958_v61  ;;  %v3965_v3 = vld [vmem:[#allocation38_spill] sm:$0xff] }
 0x369   :  { %1508 = vmatpush1.msra.mxu0 %v3959_v26  ;;  %1541 = vmatprep.mubr.f32.mxu0 %v3960_v56 }
 0x36a   :  { %1579 = vmatpush1.msra.mxu1 %v3961_v46  ;;  %1612 = vmatprep.mubr.f32.mxu1 %v3960_v56 }
 0x36b   :  { %1720 = vmatprep.subr.mxu0 %v3962_v29  ;;  %1791 = vmatprep.subr.mxu1 %v3963_v55 }
 0x40a   :  { %v1300_v51 = vpop.f32.mrf.mxu0  ;;  %v1371_v61 = vpop.f32.mrf.mxu1 }
 0x40b   :  { %v1376_v47 = vadd.f32 %v1300_v51, %v3964_v0  ;;  %v1378_v56 = vadd.f32 %v1371_v61, %v3967_v44  ;;  %v3972_v61 = vld [vmem:[#allocation14_spill] sm:$0xff] }
 0x40c   :  { %v1302_v49 = vpop.f32.mrf.mxu0  ;;  %v1373_v50 = vpop.f32.mrf.mxu1 }
 0x40d   :  { %v2431_v2 = vmul.f32 -1.442695, %v1376_v47  ;;  %v1377_v63 = vadd.f32 %v1302_v49, %v3965_v3  ;;  %v1379_v46 = vadd.f32 %v1373_v50, %v3966_v45 }
 0x40f   :  { %2503 = vpow2.f32 %v2431_v2  ;;  %v2432_v26 = vmul.f32 -1.442695, %v1377_v63  ;;  %v2433_v59 = vmul.f32 -1.442695, %v1379_v46  ;;  %v3974_v46 = vld [vmem:[#allocation16_spill] sm:$0xff] }
 0x411   :  { %2505 = vpow2.f32 %v2432_v26 }
 0x412   :  { %2507 = vtanh.f32 %v1378_v56  ;;  %v3973_v56 = vld [vmem:[#allocation15_spill] sm:$0xff] }
 0x413   :  { %2509 = vpow2.f32 %v2433_v59  ;;  %v3970_v59 = vld [vmem:[#allocation12_spill] sm:$0xff] }
 0x41c   :  { %v2504_v29 = vpop.eup %2503 }
 0x41d   :  { %v1383_v53 = vadd.f32 1.0, %v2504_v29 }
 0x41e   :  { %v2506_v55 = vpop.eup %2505 }
 0x41f   :  { %2511 = vrcp.f32 %v1383_v53  ;;  %v1389_v51 = vadd.f32 1.0, %v2506_v55  ;;  %v2508_v47 = vpop.eup %2507  ;;  %v3969_v53 = vld [vmem:[#allocation11_spill] sm:$0xff]  ;;  %v3971_v55 = vld [vmem:[#allocation13_spill] sm:$0xff] }
 0x420   :  { %v2510_v0 = vpop.eup %2509 }
 0x421   :  { %2513 = vrcp.f32 %v1389_v51  ;;  %v1396_v3 = vadd.f32 1.0, %v2510_v0  ;;  %v3975_v51 = vld [vmem:[#allocation17_spill] sm:$0xff]  ;;  %v3977_v0 = vld [vmem:[#allocation19_spill] sm:$0xff] }
 0x423   :  { %2515 = vrcp.f32 %v1396_v3  ;;  %v3981_v3 = vld [vmem:[#allocation23_spill] sm:$0xff] }
 0x42c   :  { %v2512_v2 = vpop.eup %2511 }
 0x42d   :  { %v1400_v49 = vmul.f32 %v2512_v2, %v2508_v47  ;;  %v3976_v47 = vld [vmem:[#allocation18_spill] sm:$0xff]  ;;  %v3978_v2 = vld [vmem:[#allocation20_spill] sm:$0xff] }
 0x42e   :  { %v2514_v63 = vpop.eup %2513 }
 0x42f   :  { %v1399_v26 = vmul.f32 %v2514_v63, %v3520_v48  ;;  %v3968_v48 = vld [vmem:[#allocation10_spill] sm:$0xff] }
 0x430   :  { %v2516_v44 = vpop.eup %2515  ;;  %v3980_v63 = vld [vmem:[#allocation22_spill] sm:$0xff] }
 0x431   :  { %v3597_v45 = vadd.f32 %v1400_v49, %v1399_v26  ;;  %v3979_v49 = vld [vmem:[#allocation21_spill] sm:$0xff]  ;;  %v3982_v26 = vld [vmem:[#allocation24_spill] sm:$0xff] }
 0x433   :  { %2517 = vtanh.f32 %v3597_v45 }
 0x440   :  { %v2518_v50 = vpop.eup %2517 }
 0x441   :  { %v1403_v29 = vmul.f32 %v2518_v50, %v2516_v44  ;;  %v3983_v44 = vld [vmem:[#allocation25_spill] sm:$0xff]  ;;  %v3984_v50 = vmov 0.0  }
 0x443   :  { %2434 = vst [vmem:[%s3778_s6 + $0x18] sm:$0xff] %v1403_v29  ;;  %1542 = vmatmul.mubr.f32.vlgmr.msra.gmra.mxu0 %v1403_v29  ;;  %1613 = vmatmul.mubr.f32.vlgmr.msra.gmra.mxu1 %v1403_v29  ;;  %v3985_v29 = vld [vmem:[#allocation26_spill] sm:$0xff] }
 0x444   :  { %1721 = vmatpush1.msra.mxu0 %v3327_v58  ;;  %1792 = vmatpush1.msra.mxu1 %v3329_v60 }
 0x445   :  { %1722 = vmatprep.subr.mxu0 %v3333_v1  ;;  %1793 = vmatprep.subr.mxu1 %v3335_v52 }
 0x446   :  { %1723 = vmatpush1.msra.mxu0 %v3339_v11  ;;  %1794 = vmatpush1.msra.mxu1 %v3341_v38 }
 0x447   :  { %1724 = vmatprep.subr.mxu0 %v3345_v54  ;;  %1795 = vmatprep.subr.mxu1 %v3347_v4 }
 0x448   :  { %1725 = vmatpush1.msra.mxu0 %v3351_v20  ;;  %1796 = vmatpush1.msra.mxu1 %v3353_v57 }
 0x449   :  { %1726 = vmatprep.subr.mxu0 %v3357_v62  ;;  %1797 = vmatprep.subr.mxu1 %v3359_v5 }
 0x44a   :  { %1727 = vmatpush1.msra.mxu0 %v3363_v6  ;;  %1798 = vmatpush1.msra.mxu1 %v3365_v7 }
 0x44b   :  { %1728 = vmatprep.subr.mxu0 %v3369_v8  ;;  %1799 = vmatprep.subr.mxu1 %v3371_v9 }
 0x44c   :  { %1729 = vmatpush1.msra.mxu0 %v3375_v10  ;;  %1800 = vmatpush1.msra.mxu1 %v3377_v12 }
 0x44d   :  { %1730 = vmatprep.subr.mxu0 %v3381_v13  ;;  %1801 = vmatprep.subr.mxu1 %v3383_v14 }
 0x44e   :  { %1731 = vmatpush1.msra.mxu0 %v3387_v15  ;;  %1802 = vmatpush1.msra.mxu1 %v3389_v16 }
 0x44f   :  { %1732 = vmatprep.subr.mxu0 %v3393_v17  ;;  %1803 = vmatprep.subr.mxu1 %v3395_v18 }
 0x450   :  { %1733 = vmatpush1.msra.mxu0 %v3399_v19  ;;  %1804 = vmatpush1.msra.mxu1 %v3401_v21 }
 0x451   :  { %1734 = vmatprep.subr.mxu0 %v3405_v22  ;;  %1805 = vmatprep.subr.mxu1 %v3407_v23 }
 0x452   :  { %1735 = vmatpush1.msra.mxu0 %v3409_v24  ;;  %1806 = vmatpush1.msra.mxu1 %v3413_v25 }
 0x453   :  { %1736 = vmatprep.subr.mxu0 %v3415_v27  ;;  %1807 = vmatprep.subr.mxu1 %v3417_v28 }
 0x454   :  { %1737 = vmatpush1.msra.mxu0 %v3421_v30  ;;  %1808 = vmatpush1.msra.mxu1 %v3423_v31 }
 0x455   :  { %1738 = vmatprep.subr.mxu0 %v3425_v32  ;;  %1809 = vmatprep.subr.mxu1 %v3429_v33 }
 0x456   :  { %1739 = vmatpush1.msra.mxu0 %v3431_v34  ;;  %1810 = vmatpush1.msra.mxu1 %v3433_v35 }
 0x457   :  { %1740 = vmatprep.subr.mxu0 %v3437_v36  ;;  %1811 = vmatprep.subr.mxu1 %v3439_v37 }
 0x458   :  { %1741 = vmatpush1.msra.mxu0 %v3443_v39  ;;  %1812 = vmatpush1.msra.mxu1 %v3445_v40 }
 0x459   :  { %1742 = vmatprep.subr.mxu0 %v3449_v41  ;;  %1813 = vmatprep.subr.mxu1 %v3451_v42 }
 0x45a   :  { %1743 = vmatpush1.msra.mxu0 %v3455_v43  ;;  %1814 = vmatpush1.msra.mxu1 %v3968_v48 }
 0x45b   :  { %1744 = vmatprep.subr.mxu0 %v3969_v53  ;;  %1815 = vmatprep.subr.mxu1 %v3970_v59  ;;  %v3991_v59 = vld [vmem:[#allocation41_spill] sm:$0xff] }
 0x45c   :  { %1745 = vmatpush1.msra.mxu0 %v3971_v55  ;;  %1816 = vmatpush1.msra.mxu1 %v3972_v61  ;;  %v3990_v55 = vld [vmem:[#allocation43_spill] sm:$0xff] }
 0x45d   :  { %1746 = vmatprep.subr.mxu0 %v3973_v56  ;;  %1817 = vmatprep.subr.mxu1 %v3974_v46 }
 0x45e   :  { %1747 = vmatpush1.msra.mxu0 %v3975_v51  ;;  %1818 = vmatpush1.msra.mxu1 %v3976_v47  ;;  %v3986_v47 = vld [vmem:[#allocation8_spill] sm:$0xff] }
 0x45f   :  { %1748 = vmatprep.subr.mxu0 %v3977_v0  ;;  %1819 = vmatprep.subr.mxu1 %v3978_v2  ;;  %v3987_v0 = vld [vmem:[#allocation9_spill] sm:$0xff] }
 0x460   :  { %1749 = vmatpush1.msra.mxu0 %v3979_v49  ;;  %1820 = vmatpush1.msra.mxu1 %v3980_v63  ;;  %v3988_v49 = vld [vmem:[#allocation40_spill] sm:$0xff] }
 0x461   :  { %1750 = vmatprep.subr.mxu0 %v3981_v3  ;;  %1821 = vmatprep.subr.mxu1 %v3982_v26  ;;  %v3989_v3 = vld [vmem:[#allocation42_spill] sm:$0xff] }
 0x462   :  { %1751 = vmatpush1.msra.mxu0 %v3983_v44  ;;  %1784 = vmatprep.mubr.f32.mxu0 %v3984_v50 }
 0x463   :  { %1822 = vmatpush1.msra.mxu1 %v3985_v29  ;;  %1855 = vmatprep.mubr.f32.mxu1 %v3984_v50 }
 0x464   :  { %1963 = vmatprep.subr.mxu0 %v3986_v47  ;;  %2034 = vmatprep.subr.mxu1 %v3987_v0 }
 0x503   :  { %v1543_v2 = vpop.f32.mrf.mxu0  ;;  %v1614_v26 = vpop.f32.mrf.mxu1 }
 0x504   :  { %v1619_v51 = vadd.f32 %v1543_v2, %v3988_v49  ;;  %v1621_v50 = vadd.f32 %v1614_v26, %v3991_v59 }
 0x505   :  { %v1545_v63 = vpop.f32.mrf.mxu0  ;;  %v1616_v61 = vpop.f32.mrf.mxu1 }
 0x506   :  { %v2435_v46 = vmul.f32 -1.442695, %v1619_v51  ;;  %v1620_v56 = vadd.f32 %v1545_v63, %v3989_v3  ;;  %v1622_v29 = vadd.f32 %v1616_v61, %v3990_v55 }
 0x508   :  { %2519 = vpow2.f32 %v2435_v46  ;;  %v2436_v44 = vmul.f32 -1.442695, %v1620_v56  ;;  %v2437_v53 = vmul.f32 -1.442695, %v1622_v29  ;;  %v2205_v29 = vld [vmem:[#allocation5 + $0x1f8] sm:$0xff] }
 0x50a   :  { %2521 = vpow2.f32 %v2436_v44 }
 0x50b   :  { %2523 = vtanh.f32 %v1621_v50  ;;  %v2203_v50 = vld [vmem:[#allocation5 + $0x1e8] sm:$0xff] }
 0x50c   :  { %2525 = vpow2.f32 %v2437_v53 }
 0x515   :  { %v2520_v47 = vpop.eup %2519 }
 0x516   :  { %v1626_v48 = vadd.f32 1.0, %v2520_v47  ;;  %v2202_v47 = vld [vmem:[#allocation5 + $0x1e0] sm:$0xff] }
 0x517   :  { %v2522_v0 = vpop.eup %2521 }
 0x518   :  { %2527 = vrcp.f32 %v1626_v48  ;;  %v1632_v2 = vadd.f32 1.0, %v2522_v0  ;;  %v2524_v51 = vpop.eup %2523  ;;  %v2204_v0 = vld [vmem:[#allocation5 + $0x1f0] sm:$0xff] }
 0x519   :  { %v2526_v49 = vpop.eup %2525 }
 0x51a   :  { %2529 = vrcp.f32 %v1632_v2  ;;  %v1639_v3 = vadd.f32 1.0, %v2526_v49  ;;  %v2199_v2 = vld [vmem:[#allocation5 + $0x1c8] sm:$0xff]  ;;  %v2198_v49 = vld [vmem:[#allocation5 + $0x1c0] sm:$0xff] }
 0x51c   :  { %2531 = vrcp.f32 %v1639_v3  ;;  %v2194_v3 = vld [vmem:[#allocation5 + $0x1a0] sm:$0xff] }
 0x525   :  { %v2528_v46 = vpop.eup %2527 }
 0x526   :  { %v1643_v63 = vmul.f32 %v2528_v46, %v2524_v51  ;;  %v2201_v51 = vld [vmem:[#allocation5 + $0x1d8] sm:$0xff]  ;;  %v2200_v46 = vld [vmem:[#allocation5 + $0x1d0] sm:$0xff] }
 0x527   :  { %v2530_v56 = vpop.eup %2529 }
 0x528   :  { %v1642_v44 = vmul.f32 %v2530_v56, %v3597_v45  ;;  %v2197_v56 = vld [vmem:[#allocation5 + $0x1b8] sm:$0xff] }
 0x529   :  { %v2532_v59 = vpop.eup %2531 }
 0x52a   :  { %v3674_v55 = vadd.f32 %v1643_v63, %v1642_v44  ;;  %v2195_v63 = vld [vmem:[#allocation5 + $0x1a8] sm:$0xff]  ;;  %v2196_v44 = vld [vmem:[#allocation5 + $0x1b0] sm:$0xff] }
 0x52c   :  { %2533 = vtanh.f32 %v3674_v55 }
 0x539   :  { %v2534_v61 = vpop.eup %2533 }
 0x53a   :  { %v1646_v26 = vmul.f32 %v2534_v61, %v2532_v59  ;;  %v2193_v59 = vld [vmem:[#allocation5 + $0x198] sm:$0xff]  ;;  %v2190_v61 = vld [vmem:[#allocation5 + $0x180] sm:$0xff] }
 0x53c   :  { %2438 = vst [vmem:[%s3778_s6 + $0x20] sm:$0xff] %v1646_v26  ;;  %1785 = vmatmul.mubr.f32.vlgmr.msra.gmra.mxu0 %v1646_v26  ;;  %1856 = vmatmul.mubr.f32.vlgmr.msra.gmra.mxu1 %v1646_v26  ;;  %v2192_v26 = vld [vmem:[#allocation5 + $0x190] sm:$0xff] }
 0x53d   :  { %1964 = vmatpush1.msra.mxu0 %v3327_v58  ;;  %2035 = vmatpush1.msra.mxu1 %v3329_v60  ;;  %v3992_v58 = vld [vmem:[#allocation10_spill] sm:$0xff]  ;;  %v3993_v60 = vld [vmem:[#allocation11_spill] sm:$0xff] }
 0x53e   :  { %1965 = vmatprep.subr.mxu0 %v3333_v1  ;;  %2036 = vmatprep.subr.mxu1 %v3335_v52  ;;  %v3994_v1 = vld [vmem:[#allocation12_spill] sm:$0xff]  ;;  %v3995_v52 = vld [vmem:[#allocation13_spill] sm:$0xff] }
 0x53f   :  { %1966 = vmatpush1.msra.mxu0 %v3339_v11  ;;  %2037 = vmatpush1.msra.mxu1 %v3341_v38  ;;  %v3996_v11 = vld [vmem:[#allocation14_spill] sm:$0xff]  ;;  %v3997_v38 = vld [vmem:[#allocation15_spill] sm:$0xff] }
 0x540   :  { %1967 = vmatprep.subr.mxu0 %v3345_v54  ;;  %2038 = vmatprep.subr.mxu1 %v3347_v4  ;;  %v3998_v54 = vld [vmem:[#allocation16_spill] sm:$0xff]  ;;  %v3999_v4 = vld [vmem:[#allocation17_spill] sm:$0xff] }
 0x541   :  { %1968 = vmatpush1.msra.mxu0 %v3351_v20  ;;  %2039 = vmatpush1.msra.mxu1 %v3353_v57  ;;  %v4000_v20 = vld [vmem:[#allocation18_spill] sm:$0xff]  ;;  %v4001_v57 = vld [vmem:[#allocation19_spill] sm:$0xff] }
 0x542   :  { %1969 = vmatprep.subr.mxu0 %v3357_v62  ;;  %2040 = vmatprep.subr.mxu1 %v3359_v5  ;;  %v4002_v62 = vld [vmem:[#allocation20_spill] sm:$0xff]  ;;  %v4003_v5 = vld [vmem:[#allocation21_spill] sm:$0xff] }
 0x543   :  { %1970 = vmatpush1.msra.mxu0 %v3363_v6  ;;  %2041 = vmatpush1.msra.mxu1 %v3365_v7  ;;  %v4004_v6 = vld [vmem:[#allocation22_spill] sm:$0xff]  ;;  %v4005_v7 = vld [vmem:[#allocation23_spill] sm:$0xff] }
 0x544   :  { %1971 = vmatprep.subr.mxu0 %v3369_v8  ;;  %2042 = vmatprep.subr.mxu1 %v3371_v9  ;;  %v4006_v8 = vld [vmem:[#allocation24_spill] sm:$0xff]  ;;  %v4007_v9 = vld [vmem:[#allocation25_spill] sm:$0xff] }
 0x545   :  { %1972 = vmatpush1.msra.mxu0 %v3375_v10  ;;  %2043 = vmatpush1.msra.mxu1 %v3377_v12  ;;  %v4008_v10 = vmov 0.0   ;;  %v4009_v12 = vld [vmem:[#allocation26_spill] sm:$0xff] }
 0x546   :  { %1973 = vmatprep.subr.mxu0 %v3381_v13  ;;  %2044 = vmatprep.subr.mxu1 %v3383_v14  ;;  %v4010_v14 = vld [vmem:[#allocation44_spill] sm:$0xff] }
 0x547   :  { %1974 = vmatpush1.msra.mxu0 %v3387_v15  ;;  %2045 = vmatpush1.msra.mxu1 %v3389_v16 }
 0x548   :  { %1975 = vmatprep.subr.mxu0 %v3393_v17  ;;  %2046 = vmatprep.subr.mxu1 %v3395_v18  ;;  %v4011_v18 = vld [vmem:[#allocation46_spill] sm:$0xff] }
 0x549   :  { %1976 = vmatpush1.msra.mxu0 %v3399_v19  ;;  %2047 = vmatpush1.msra.mxu1 %v3401_v21 }
 0x54a   :  { %1977 = vmatprep.subr.mxu0 %v3405_v22  ;;  %2048 = vmatprep.subr.mxu1 %v3407_v23 }
 0x54b   :  { %1978 = vmatpush1.msra.mxu0 %v3409_v24  ;;  %2049 = vmatpush1.msra.mxu1 %v3413_v25  ;;  %v4012_v24 = vld [vmem:[#allocation47_spill] sm:$0xff] }
 0x54c   :  { %1979 = vmatprep.subr.mxu0 %v3415_v27  ;;  %2050 = vmatprep.subr.mxu1 %v3417_v28  ;;  %v4013_v27 = vld [vmem:[#allocation45_spill] sm:$0xff] }
 0x54d   :  { %1980 = vmatpush1.msra.mxu0 %v3421_v30  ;;  %2051 = vmatpush1.msra.mxu1 %v3423_v31 }
 0x54e   :  { %1981 = vmatprep.subr.mxu0 %v3425_v32  ;;  %2052 = vmatprep.subr.mxu1 %v3429_v33 }
 0x54f   :  { %1982 = vmatpush1.msra.mxu0 %v3431_v34  ;;  %2053 = vmatpush1.msra.mxu1 %v3433_v35 }
 0x550   :  { %1983 = vmatprep.subr.mxu0 %v3437_v36  ;;  %2054 = vmatprep.subr.mxu1 %v3439_v37 }
 0x551   :  { %1984 = vmatpush1.msra.mxu0 %v3443_v39  ;;  %2055 = vmatpush1.msra.mxu1 %v3445_v40 }
 0x552   :  { %1985 = vmatprep.subr.mxu0 %v3449_v41  ;;  %2056 = vmatprep.subr.mxu1 %v3451_v42 }
 0x553   :  { %1986 = vmatpush1.msra.mxu0 %v3455_v43  ;;  %2057 = vmatpush1.msra.mxu1 %v3992_v58  ;;  %v2187_v58 = vld [vmem:[#allocation5 + $0x168] sm:$0xff] }
 0x554   :  { %1987 = vmatprep.subr.mxu0 %v3993_v60  ;;  %2058 = vmatprep.subr.mxu1 %v3994_v1  ;;  %v2189_v60 = vld [vmem:[#allocation5 + $0x178] sm:$0xff]  ;;  %v2186_v1 = vld [vmem:[#allocation5 + $0x160] sm:$0xff] }
 0x555   :  { %1988 = vmatpush1.msra.mxu0 %v3995_v52  ;;  %2059 = vmatpush1.msra.mxu1 %v3996_v11  ;;  %v2188_v52 = vld [vmem:[#allocation5 + $0x170] sm:$0xff]  ;;  %v2183_v11 = vld [vmem:[#allocation5 + $0x148] sm:$0xff] }
 0x556   :  { %1989 = vmatprep.subr.mxu0 %v3997_v38  ;;  %2060 = vmatprep.subr.mxu1 %v3998_v54  ;;  %v2185_v38 = vld [vmem:[#allocation5 + $0x158] sm:$0xff]  ;;  %v2182_v54 = vld [vmem:[#allocation5 + $0x140] sm:$0xff] }
 0x557   :  { %1990 = vmatpush1.msra.mxu0 %v3999_v4  ;;  %2061 = vmatpush1.msra.mxu1 %v4000_v20  ;;  %v2184_v4 = vld [vmem:[#allocation5 + $0x150] sm:$0xff]  ;;  %v2179_v20 = vld [vmem:[#allocation5 + $0x128] sm:$0xff] }
 0x558   :  { %1991 = vmatprep.subr.mxu0 %v4001_v57  ;;  %2062 = vmatprep.subr.mxu1 %v4002_v62  ;;  %v2181_v57 = vld [vmem:[#allocation5 + $0x138] sm:$0xff]  ;;  %v2178_v62 = vld [vmem:[#allocation5 + $0x120] sm:$0xff] }
 0x559   :  { %1992 = vmatpush1.msra.mxu0 %v4003_v5  ;;  %2063 = vmatpush1.msra.mxu1 %v4004_v6  ;;  %v2180_v5 = vld [vmem:[#allocation5 + $0x130] sm:$0xff]  ;;  %v2175_v6 = vld [vmem:[#allocation5 + $0x108] sm:$0xff] }
 0x55a   :  { %1993 = vmatprep.subr.mxu0 %v4005_v7  ;;  %2064 = vmatprep.subr.mxu1 %v4006_v8  ;;  %v2177_v7 = vld [vmem:[#allocation5 + $0x118] sm:$0xff]  ;;  %v2174_v8 = vld [vmem:[#allocation5 + $0x100] sm:$0xff] }
 0x55b   :  { %1994 = vmatpush1.msra.mxu0 %v4007_v9  ;;  %2027 = vmatprep.mubr.f32.mxu0 %v4008_v10  ;;  %v2176_v9 = vld [vmem:[#allocation5 + $0x110] sm:$0xff] }
 0x55c   :  { %2065 = vmatpush1.msra.mxu1 %v4009_v12  ;;  %2098 = vmatprep.mubr.f32.mxu1 %v4008_v10  ;;  %v2173_v12 = vld [vmem:[#allocation5 + $0xf8] sm:$0xff] }
 0x55d   :  { %2206 = vmatprep.subr.mxu0 %v2203_v50  ;;  %2277 = vmatprep.subr.mxu1 %v2205_v29  ;;  %v2144_v50 = vld [vmem:[#allocation5 + $0x10] sm:$0xff] }
 0x5fc   :  { %v1786_v13 = vpop.f32.mrf.mxu0  ;;  %v1857_v21 = vpop.f32.mrf.mxu1 }
 0x5fd   :  { %v1862_v15 = vadd.f32 %v1786_v13, %v4010_v14  ;;  %v1864_v28 = vadd.f32 %v1857_v21, %v4013_v27  ;;  %v2170_v13 = vld [vmem:[#allocation5 + $0xe0] sm:$0xff]  ;;  %v2172_v14 = vld [vmem:[#allocation5 + $0xf0] sm:$0xff]  ;;  %v2165_v21 = vld [vmem:[#allocation5 + $0xb8] sm:$0xff] }
 0x5fe   :  { %v1788_v16 = vpop.f32.mrf.mxu0  ;;  %v1859_v23 = vpop.f32.mrf.mxu1  ;;  %v2158_v27 = vld [vmem:[#allocation5 + $0x80] sm:$0xff] }
 0x5ff   :  { %v2439_v17 = vmul.f32 -1.442695, %v1862_v15  ;;  %v1863_v19 = vadd.f32 %v1788_v16, %v4011_v18  ;;  %v1865_v25 = vadd.f32 %v1859_v23, %v4012_v24  ;;  %v2167_v15 = vld [vmem:[#allocation5 + $0xc8] sm:$0xff]  ;;  %v2169_v16 = vld [vmem:[#allocation5 + $0xd8] sm:$0xff]  ;;  %v2168_v18 = vld [vmem:[#allocation5 + $0xd0] sm:$0xff] }
 0x600   :  { %v2164_v23 = vld [vmem:[#allocation5 + $0xb0] sm:$0xff]  ;;  %v2159_v24 = vld [vmem:[#allocation5 + $0x88] sm:$0xff] }
 0x601   :  { %2535 = vpow2.f32 %v2439_v17  ;;  %v2440_v22 = vmul.f32 -1.442695, %v1863_v19  ;;  %v2441_v30 = vmul.f32 -1.442695, %v1865_v25  ;;  %v2166_v17 = vld [vmem:[#allocation5 + $0xc0] sm:$0xff]  ;;  %v2163_v19 = vld [vmem:[#allocation5 + $0xa8] sm:$0xff] }
 0x602   :  { %v2161_v25 = vld [vmem:[#allocation5 + $0x98] sm:$0xff] }
 0x603   :  { %2537 = vpow2.f32 %v2440_v22  ;;  %v2162_v22 = vld [vmem:[#allocation5 + $0xa0] sm:$0xff] }
 0x604   :  { %2539 = vtanh.f32 %v1864_v28  ;;  %v2160_v28 = vld [vmem:[#allocation5 + $0x90] sm:$0xff] }
 0x605   :  { %2541 = vpow2.f32 %v2441_v30  ;;  %v2155_v30 = vld [vmem:[#allocation5 + $0x68] sm:$0xff] }
 0x60e   :  { %v2536_v31 = vpop.eup %2535 }
 0x60f   :  { %v1869_v32 = vadd.f32 1.0, %v2536_v31  ;;  %v2157_v31 = vld [vmem:[#allocation5 + $0x78] sm:$0xff] }
 0x610   :  { %v2538_v33 = vpop.eup %2537 }
 0x611   :  { %2543 = vrcp.f32 %v1869_v32  ;;  %v1875_v34 = vadd.f32 1.0, %v2538_v33  ;;  %v2540_v35 = vpop.eup %2539  ;;  %v2154_v32 = vld [vmem:[#allocation5 + $0x60] sm:$0xff]  ;;  %v2156_v33 = vld [vmem:[#allocation5 + $0x70] sm:$0xff] }
 0x612   :  { %v2542_v36 = vpop.eup %2541 }
 0x613   :  { %2545 = vrcp.f32 %v1875_v34  ;;  %v1882_v41 = vadd.f32 1.0, %v2542_v36  ;;  %v2151_v34 = vld [vmem:[#allocation5 + $0x48] sm:$0xff]  ;;  %v2150_v36 = vld [vmem:[#allocation5 + $0x40] sm:$0xff] }
 0x615   :  { %2547 = vrcp.f32 %v1882_v41  ;;  %v2146_v41 = vld [vmem:[#allocation5 + $0x20] sm:$0xff] }
 0x61e   :  { %v2544_v37 = vpop.eup %2543 }
 0x61f   :  { %v1886_v39 = vmul.f32 %v2544_v37, %v2540_v35  ;;  %v2153_v35 = vld [vmem:[#allocation5 + $0x58] sm:$0xff]  ;;  %v2152_v37 = vld [vmem:[#allocation5 + $0x50] sm:$0xff] }
 0x620   :  { %v2546_v40 = vpop.eup %2545 }
 0x621   :  { %v1885_v42 = vmul.f32 %v2546_v40, %v3674_v55  ;;  %v2191_v55 = vld [vmem:[#allocation5 + $0x188] sm:$0xff]  ;;  %v2149_v40 = vld [vmem:[#allocation5 + $0x38] sm:$0xff] }
 0x622   :  { %v2548_v45 = vpop.eup %2547 }
 0x623   :  { %v3749_v43 = vadd.f32 %v1886_v39, %v1885_v42  ;;  %v2147_v39 = vld [vmem:[#allocation5 + $0x28] sm:$0xff]  ;;  %v2148_v42 = vld [vmem:[#allocation5 + $0x30] sm:$0xff] }
 0x625   :  { %2549 = vtanh.f32 %v3749_v43 }
 0x632   :  { %v2550_v48 = vpop.eup %2549 }
 0x633   :  { %v1889_v53 = vmul.f32 %v2550_v48, %v2548_v45  ;;  %v2143_v45 = vld [vmem:[#allocation5 + $0x8] sm:$0xff]  ;;  %v2145_v48 = vld [vmem:[#allocation5 + $0x18] sm:$0xff] }
 0x635   :  { %2442 = vst [vmem:[%s3778_s6 + $0x28] sm:$0xff] %v1889_v53  ;;  %2028 = vmatmul.mubr.f32.vlgmr.msra.gmra.mxu0 %v1889_v53  ;;  %2099 = vmatmul.mubr.f32.vlgmr.msra.gmra.mxu1 %v1889_v53  ;;  %v2142_v53 = vld [vmem:[#allocation5] sm:$0xff] }
 0x636   :  { %2270 = vmatprep.mubr.f32.mxu0 %v4008_v10  ;;  %2341 = vmatprep.mubr.f32.mxu1 %v4008_v10  ;;  %v2171_v10 = vld [vmem:[#allocation5 + $0xe8] sm:$0xff] }
 0x637   :  { %2207 = vmatpush1.msra.mxu0 %v2202_v47  ;;  %2278 = vmatpush1.msra.mxu1 %v2204_v0  ;;  %v4014_v47 = vld [vmem:[#allocation48_spill] sm:$0xff] }
 0x638   :  { %2208 = vmatprep.subr.mxu0 %v2199_v2  ;;  %2279 = vmatprep.subr.mxu1 %v2201_v51 }
 0x639   :  { %2209 = vmatpush1.msra.mxu0 %v2198_v49  ;;  %2280 = vmatpush1.msra.mxu1 %v2200_v46  ;;  %v4015_v49 = vld [vmem:[#allocation50_spill] sm:$0xff] }
 0x63a   :  { %2210 = vmatprep.subr.mxu0 %v2195_v63  ;;  %2281 = vmatprep.subr.mxu1 %v2197_v56 }
 0x63b   :  { %2211 = vmatpush1.msra.mxu0 %v2194_v3  ;;  %2282 = vmatpush1.msra.mxu1 %v2196_v44  ;;  %v4016_v44 = vld [vmem:[#allocation51_spill] sm:$0xff] }
 0x63c   :  { %2212 = vmatprep.subr.mxu0 %v2191_v55  ;;  %2283 = vmatprep.subr.mxu1 %v2193_v59  ;;  %v4017_v59 = vld [vmem:[#allocation49_spill] sm:$0xff] }
 0x63d   :  { %2213 = vmatpush1.msra.mxu0 %v2190_v61  ;;  %2284 = vmatpush1.msra.mxu1 %v2192_v26 }
 0x63e   :  { %2214 = vmatprep.subr.mxu0 %v2187_v58  ;;  %2285 = vmatprep.subr.mxu1 %v2189_v60 }
 0x63f   :  { %2215 = vmatpush1.msra.mxu0 %v2186_v1  ;;  %2286 = vmatpush1.msra.mxu1 %v2188_v52 }
 0x640   :  { %2216 = vmatprep.subr.mxu0 %v2183_v11  ;;  %2287 = vmatprep.subr.mxu1 %v2185_v38 }
 0x641   :  { %2217 = vmatpush1.msra.mxu0 %v2182_v54  ;;  %2288 = vmatpush1.msra.mxu1 %v2184_v4 }
 0x642   :  { %2218 = vmatprep.subr.mxu0 %v2179_v20  ;;  %2289 = vmatprep.subr.mxu1 %v2181_v57 }
 0x643   :  { %2219 = vmatpush1.msra.mxu0 %v2178_v62  ;;  %2290 = vmatpush1.msra.mxu1 %v2180_v5 }
 0x644   :  { %2220 = vmatprep.subr.mxu0 %v2175_v6  ;;  %2291 = vmatprep.subr.mxu1 %v2177_v7 }
 0x645   :  { %2221 = vmatpush1.msra.mxu0 %v2174_v8  ;;  %2292 = vmatpush1.msra.mxu1 %v2176_v9 }
 0x646   :  { %2222 = vmatprep.subr.mxu0 %v2171_v10  ;;  %2293 = vmatprep.subr.mxu1 %v2173_v12  ;;  %v4018_v10 = vld [vmem:[#allocation52_spill] sm:$0xff] }
 0x647   :  { %2223 = vmatpush1.msra.mxu0 %v2170_v13  ;;  %2294 = vmatpush1.msra.mxu1 %v2172_v14 }
 0x648   :  { %2224 = vmatprep.subr.mxu0 %v2167_v15  ;;  %2295 = vmatprep.subr.mxu1 %v2169_v16  ;;  %v4019_v15 = vld [vmem:[#allocation54_spill] sm:$0xff] }
 0x649   :  { %2225 = vmatpush1.msra.mxu0 %v2166_v17  ;;  %2296 = vmatpush1.msra.mxu1 %v2168_v18 }
 0x64a   :  { %2226 = vmatprep.subr.mxu0 %v2163_v19  ;;  %2297 = vmatprep.subr.mxu1 %v2165_v21  ;;  %v4020_v19 = vld [vmem:[#allocation55_spill] sm:$0xff] }
 0x64b   :  { %2227 = vmatpush1.msra.mxu0 %v2162_v22  ;;  %2298 = vmatpush1.msra.mxu1 %v2164_v23  ;;  %v4021_v22 = vld [vmem:[#allocation53_spill] sm:$0xff] }
 0x64c   :  { %2228 = vmatprep.subr.mxu0 %v2159_v24  ;;  %2299 = vmatprep.subr.mxu1 %v2161_v25 }
 0x64d   :  { %2229 = vmatpush1.msra.mxu0 %v2158_v27  ;;  %2300 = vmatpush1.msra.mxu1 %v2160_v28 }
 0x64e   :  { %2230 = vmatprep.subr.mxu0 %v2155_v30  ;;  %2301 = vmatprep.subr.mxu1 %v2157_v31 }
 0x64f   :  { %2231 = vmatpush1.msra.mxu0 %v2154_v32  ;;  %2302 = vmatpush1.msra.mxu1 %v2156_v33 }
 0x650   :  { %2232 = vmatprep.subr.mxu0 %v2151_v34  ;;  %2303 = vmatprep.subr.mxu1 %v2153_v35 }
 0x651   :  { %2233 = vmatpush1.msra.mxu0 %v2150_v36  ;;  %2304 = vmatpush1.msra.mxu1 %v2152_v37 }
 0x652   :  { %2234 = vmatprep.subr.mxu0 %v2147_v39  ;;  %2305 = vmatprep.subr.mxu1 %v2149_v40 }
 0x653   :  { %2235 = vmatpush1.msra.mxu0 %v2146_v41  ;;  %2306 = vmatpush1.msra.mxu1 %v2148_v42 }
 0x654   :  { %2236 = vmatprep.subr.mxu0 %v2143_v45  ;;  %2307 = vmatprep.subr.mxu1 %v2145_v48 }
 0x655   :  { %2237 = vmatpush1.msra.mxu0 %v2142_v53  ;;  %2308 = vmatpush1.msra.mxu1 %v2144_v50 }
 0x6f5   :  { %v2029_v29 = vpop.f32.mrf.mxu0  ;;  %v2100_v63 = vpop.f32.mrf.mxu1 }
 0x6f6   :  { %v2105_v0 = vadd.f32 %v2029_v29, %v4014_v47  ;;  %v2107_v61 = vadd.f32 %v2100_v63, %v4017_v59 }
 0x6f7   :  { %v2031_v2 = vpop.f32.mrf.mxu0  ;;  %v2102_v3 = vpop.f32.mrf.mxu1 }
 0x6f8   :  { %v2443_v51 = vmul.f32 -1.442695, %v2105_v0  ;;  %v2106_v46 = vadd.f32 %v2031_v2, %v4015_v49  ;;  %v2108_v55 = vadd.f32 %v2102_v3, %v4016_v44 }
 0x6fa   :  { %2551 = vpow2.f32 %v2443_v51  ;;  %v2444_v56 = vmul.f32 -1.442695, %v2106_v46  ;;  %v2445_v26 = vmul.f32 -1.442695, %v2108_v55 }
 0x6fc   :  { %2553 = vpow2.f32 %v2444_v56 }
 0x6fd   :  { %2555 = vtanh.f32 %v2107_v61 }
 0x6fe   :  { %2557 = vpow2.f32 %v2445_v26 }
 0x707   :  { %v2552_v58 = vpop.eup %2551 }
 0x708   :  { %v2112_v60 = vadd.f32 1.0, %v2552_v58 }
 0x709   :  { %v2554_v1 = vpop.eup %2553 }
 0x70a   :  { %2559 = vrcp.f32 %v2112_v60  ;;  %v2118_v52 = vadd.f32 1.0, %v2554_v1  ;;  %v2556_v11 = vpop.eup %2555 }
 0x70b   :  { %v2558_v38 = vpop.eup %2557 }
 0x70c   :  { %2561 = vrcp.f32 %v2118_v52  ;;  %v2125_v57 = vadd.f32 1.0, %v2558_v38 }
 0x70e   :  { %2563 = vrcp.f32 %v2125_v57 }
 0x717   :  { %v2560_v54 = vpop.eup %2559 }
 0x718   :  { %v2129_v4 = vmul.f32 %v2560_v54, %v2556_v11 }
 0x719   :  { %v2562_v20 = vpop.eup %2561 }
 0x71a   :  { %v2128_v62 = vmul.f32 %v2562_v20, %v3749_v43 }
 0x71b   :  { %v2564_v6 = vpop.eup %2563 }
 0x71c   :  { %v2130_v5 = vadd.f32 %v2129_v4, %v2128_v62 }
 0x71e   :  { %2565 = vtanh.f32 %v2130_v5 }
 0x72b   :  { %v2566_v7 = vpop.eup %2565 }
 0x72c   :  { %v2132_v8 = vmul.f32 %v2566_v7, %v2564_v6 }
 0x72e   :  { %2446 = vst [vmem:[%s3778_s6 + $0x30] sm:$0xff] %v2132_v8  ;;  %2271 = vmatmul.mubr.f32.vlgmr.msra.gmra.mxu0 %v2132_v8  ;;  %2342 = vmatmul.mubr.f32.vlgmr.msra.gmra.mxu1 %v2132_v8 }
 0x7ee   :  { %v2272_v9 = vpop.f32.mrf.mxu0  ;;  %v2343_v43 = vpop.f32.mrf.mxu1 }
 0x7ef   :  { %v2348_v12 = vadd.f32 %v2272_v9, %v4018_v10  ;;  %v2350_v23 = vadd.f32 %v2343_v43, %v4021_v22 }
 0x7f0   :  { %v2274_v13 = vpop.f32.mrf.mxu0  ;;  %v2345_v18 = vpop.f32.mrf.mxu1 }
 0x7f1   :  { %v2447_v14 = vmul.f32 -1.442695, %v2348_v12  ;;  %v2349_v16 = vadd.f32 %v2274_v13, %v4019_v15  ;;  %v2351_v21 = vadd.f32 %v2345_v18, %v4020_v19 }
 0x7f3   :  { %2567 = vpow2.f32 %v2447_v14  ;;  %v2448_v17 = vmul.f32 -1.442695, %v2349_v16  ;;  %v2449_v24 = vmul.f32 -1.442695, %v2351_v21 }
 0x7f5   :  { %2569 = vpow2.f32 %v2448_v17 }
 0x7f6   :  { %2571 = vtanh.f32 %v2350_v23 }
 0x7f7   :  { %2573 = vpow2.f32 %v2449_v24 }
 0x800   :  { %v2568_v25 = vpop.eup %2567 }
 0x801   :  { %v2355_v27 = vadd.f32 1.0, %v2568_v25 }
 0x802   :  { %v2570_v28 = vpop.eup %2569 }
 0x803   :  { %2575 = vrcp.f32 %v2355_v27  ;;  %v2361_v30 = vadd.f32 1.0, %v2570_v28  ;;  %v2572_v31 = vpop.eup %2571 }
 0x804   :  { %v2574_v32 = vpop.eup %2573 }
 0x805   :  { %2577 = vrcp.f32 %v2361_v30  ;;  %v2368_v36 = vadd.f32 1.0, %v2574_v32 }
 0x807   :  { %2579 = vrcp.f32 %v2368_v36 }
 0x810   :  { %v2576_v33 = vpop.eup %2575 }
 0x811   :  { %v2372_v34 = vmul.f32 %v2576_v33, %v2572_v31 }
 0x812   :  { %v2578_v35 = vpop.eup %2577 }
 0x813   :  { %v2371_v37 = vmul.f32 %v2578_v35, %v2130_v5 }
 0x814   :  { %v2580_v40 = vpop.eup %2579 }
 0x815   :  { %v2373_v39 = vadd.f32 %v2372_v34, %v2371_v37 }
 0x817   :  { %2581 = vtanh.f32 %v2373_v39 }
 0x824   :  { %v2582_v41 = vpop.eup %2581 }
 0x825   :  { %v2375_v42 = vmul.f32 %v2582_v41, %v2580_v40 }
 0x827   :  { %2450 = vst [vmem:[%s3778_s6 + $0x38] sm:$0xff] %v2375_v42 }
 0x828   :  { %2398 = vsyncpa [#allocation6], 1 }

// kernel: lstm_forward.3
= control target key start
LH: loop header
LB: loop body
LE: loop exit
PB: predicated region body
PF: predicated region fallthrough
CT: control target
= control target key end

     0   :  { %11 = vsyncpa [#allocation6], 0  ;;  %s2590_s21 = smov [#allocation5]   ;;  %s3605_s0 = inlined_call_operand.vmem [shape: f32[64,16], index: 0, kind: input, shape index: {}]   ;;  %s3606_s1 = inlined_call_operand.vmem [shape: f32[16,512], index: 1, kind: input, shape index: {}]   ;;  %s3607_s2 = inlined_call_operand.hbm [shape: f32[128,512], index: 2, kind: input, shape index: {}]   ;;  %s3608_s3 = inlined_call_operand.vmem [shape: f32[1,512], index: 3, kind: input, shape index: {}]   ;;  %s3609_s4 = inlined_call_operand.vmem [shape: f32[8,128], index: 4, kind: input, shape index: {}]   ;;  %s3610_s5 = inlined_call_operand.vmem [shape: f32[8,128], index: 5, kind: input, shape index: {}]   ;;  %s3611_s6 = inlined_call_operand.vmem [shape: f32[64,128], index: 6, kind: output, shape index: {}]  }
   0x1   :  { %s29_s22 = sshll.u32 %s2590_s21, 4  ;;  %s30_s22 = int_to_ptr.vmem [resolvable:$true] %s29_s22 }
   0x2   :  { %s2576_s23 = scalar_lea.vmem %s30_s22, 8192  ;;  %p2581_p1 = scmp.lt.s32.totalorder %s30_s22, %s30_s22 }
   0x3   :  { %p2577_p0 = scmp.ne.s32.totalorder %s30_s22, %s2576_s23  ;;  %p2582_p2 = scmp.lt.s32.totalorder %s2576_s23, %s2576_s23 }
   0x5   :  { %p2583_p3 = por %p2582_p2, %p2581_p1 }
   0x7   :  { %p2584_p4 = pnand %p2583_p3, %p2577_p0 }
   0x9   :  { %2587 = shalt.err (!%p2584_p4)
}
   0xa   :  { %s2591_s24 = smov 512   ;;  %s2592_s25 = smov 32  }
   0xb   :  { %35 = dma.hbm_to_vmem [thread:$0]  %s3607_s2, 8192, %s30_s22, [#allocation6], %s2591_s24, %s2591_s24, %s2592_s25  }
   0xc   :  { %2588 = dma.done.wait [#allocation6], 8192  }
   0xd   :  { %2589 = vsyncadd [#allocation6], 4294959104  ;;  %v3612_v0 = vmov 0.0   ;;  %v94_v1 = vld [vmem:[%s3606_s1 + $0x28] sm:$0xff]  ;;  %v96_v2 = vld [vmem:[%s3606_s1 + $0x38] sm:$0xff]  ;;  %vm119_vm0 = vcmask 130048  }
   0xe   :  { %208 = vmatprep.mubr.f32.mxu0 %v3612_v0  ;;  %321 = vmatprep.mubr.f32.mxu1 %v3612_v0  ;;  %v93_v3 = vld [vmem:[%s3606_s1 + $0x20] sm:$0xff]  ;;  %v95_v4 = vld [vmem:[%s3606_s1 + $0x30] sm:$0xff]  ;;  %v90_v5 = vld [vmem:[%s3606_s1 + $0x8] sm:$0xff] }
   0xf   :  { %172 = vmatprep.subr.mxu0 %v94_v1  ;;  %285 = vmatprep.subr.mxu1 %v96_v2  ;;  %v92_v6 = vld [vmem:[%s3606_s1 + $0x18] sm:$0xff]  ;;  %v89_v7 = vld [vmem:[%s3606_s1] sm:$0xff]  ;;  %v91_v8 = vld [vmem:[%s3606_s1 + $0x10] sm:$0xff] }
  0x10   :  { %173 = vmatpush1.msra.mxu0 %v93_v3  ;;  %286 = vmatpush1.msra.mxu1 %v95_v4  ;;  %v81_v9 = vld [vmem:[%s3605_s0] sm:$0xff]  ;;  %v2661_v10 = vld [vmem:[#allocation5 + $0x1e8] sm:$0xff]  ;;  %v2663_v11 = vld [vmem:[#allocation5 + $0x1f8] sm:$0xff] }
  0x11   :  { %174 = vmatprep.subr.mxu0 %v90_v5  ;;  %287 = vmatprep.subr.mxu1 %v92_v6  ;;  %v2665_v12 = vld [vmem:[#allocation5 + $0x1e0] sm:$0xff]  ;;  %v2667_v13 = vld [vmem:[#allocation5 + $0x1f0] sm:$0xff]  ;;  %v2671_v14 = vld [vmem:[#allocation5 + $0x1c8] sm:$0xff] }
  0x12   :  { %175 = vmatpush1.msra.mxu0 %v89_v7  ;;  %288 = vmatpush1.msra.mxu1 %v91_v8  ;;  %v2673_v15 = vld [vmem:[#allocation5 + $0x1d8] sm:$0xff]  ;;  %v2679_v16 = vld [vmem:[#allocation5 + $0x1c0] sm:$0xff]  ;;  %v2681_v17 = vld [vmem:[#allocation5 + $0x1d0] sm:$0xff] }
  0x13   :  { %2389 = vmatmul.mubr.msk.f32.vlgmr.msra.gmra.mxu0 %vm119_vm0, %v81_v9  ;;  %2397 = vmatmul.mubr.msk.f32.vlgmr.msra.gmra.mxu1 %vm119_vm0, %v81_v9  ;;  %v82_v18 = vld [vmem:[%s3605_s0 + $0x8] sm:$0xff]  ;;  %v2692_v20 = vld [vmem:[#allocation5 + $0x1b8] sm:$0xff]  ;;  %v2696_v21 = vld [vmem:[#allocation5 + $0x1a0] sm:$0xff] }
  0x14   :  { %475 = vmatprep.subr.mxu0 %v2661_v10  ;;  %546 = vmatprep.subr.mxu1 %v2663_v11  ;;  %v2690_v19 = vld [vmem:[#allocation5 + $0x1a8] sm:$0xff]  ;;  %v2698_v22 = vld [vmem:[#allocation5 + $0x1b0] sm:$0xff]  ;;  %v2704_v24 = vld [vmem:[#allocation5 + $0x198] sm:$0xff] }
  0x15   :  { %476 = vmatpush1.msra.mxu0 %v2665_v12  ;;  %547 = vmatpush1.msra.mxu1 %v2667_v13  ;;  %v2702_v23 = vld [vmem:[#allocation5 + $0x188] sm:$0xff]  ;;  %v2710_v25 = vld [vmem:[#allocation5 + $0x180] sm:$0xff]  ;;  %v2712_v26 = vld [vmem:[#allocation5 + $0x190] sm:$0xff] }
  0x16   :  { %477 = vmatprep.subr.mxu0 %v2671_v14  ;;  %548 = vmatprep.subr.mxu1 %v2673_v15  ;;  %v83_v27 = vld [vmem:[%s3605_s0 + $0x10] sm:$0xff]  ;;  %v2721_v28 = vld [vmem:[#allocation5 + $0x168] sm:$0xff]  ;;  %v2723_v29 = vld [vmem:[#allocation5 + $0x178] sm:$0xff] }
  0x17   :  { %214 = vmatprep.mubr.f32.mxu0 %v3612_v0  ;;  %327 = vmatprep.mubr.f32.mxu1 %v3612_v0  ;;  %v2727_v30 = vld [vmem:[#allocation5 + $0x160] sm:$0xff]  ;;  %v2729_v31 = vld [vmem:[#allocation5 + $0x170] sm:$0xff]  ;;  %v2733_v32 = vld [vmem:[#allocation5 + $0x148] sm:$0xff] }
  0x18   :  { %478 = vmatpush1.msra.mxu0 %v2679_v16  ;;  %549 = vmatpush1.msra.mxu1 %v2681_v17  ;;  %v2735_v33 = vld [vmem:[#allocation5 + $0x158] sm:$0xff]  ;;  %v2741_v34 = vld [vmem:[#allocation5 + $0x140] sm:$0xff]  ;;  %v2743_v35 = vld [vmem:[#allocation5 + $0x150] sm:$0xff] }
  0x19   :  { %2390 = vmatmul.mubr.msk.f32.gmra.mxu0 %vm119_vm0, %v82_v18  ;;  %2398 = vmatmul.mubr.msk.f32.gmra.mxu1 %vm119_vm0, %v82_v18  ;;  %v84_v36 = vld [vmem:[%s3605_s0 + $0x18] sm:$0xff]  ;;  %v2752_v37 = vld [vmem:[#allocation5 + $0x128] sm:$0xff]  ;;  %v2758_v39 = vld [vmem:[#allocation5 + $0x120] sm:$0xff] }
  0x1a   :  { %479 = vmatprep.subr.mxu0 %v2690_v19  ;;  %550 = vmatprep.subr.mxu1 %v2692_v20  ;;  %v2754_v38 = vld [vmem:[#allocation5 + $0x138] sm:$0xff]  ;;  %v2760_v40 = vld [vmem:[#allocation5 + $0x130] sm:$0xff]  ;;  %v2764_v41 = vld [vmem:[#allocation5 + $0x108] sm:$0xff] }
  0x1b   :  { %480 = vmatpush1.msra.mxu0 %v2696_v21  ;;  %551 = vmatpush1.msra.mxu1 %v2698_v22  ;;  %v2766_v42 = vld [vmem:[#allocation5 + $0x118] sm:$0xff]  ;;  %v2772_v43 = vld [vmem:[#allocation5 + $0x100] sm:$0xff]  ;;  %v2774_v44 = vld [vmem:[#allocation5 + $0x110] sm:$0xff] }
  0x1c   :  { %481 = vmatprep.subr.mxu0 %v2702_v23  ;;  %552 = vmatprep.subr.mxu1 %v2704_v24  ;;  %v85_v45 = vld [vmem:[%s3605_s0 + $0x20] sm:$0xff]  ;;  %v2783_v46 = vld [vmem:[#allocation5 + $0xe8] sm:$0xff]  ;;  %v2785_v47 = vld [vmem:[#allocation5 + $0xf8] sm:$0xff] }
  0x1d   :  { %220 = vmatprep.mubr.f32.mxu0 %v3612_v0  ;;  %333 = vmatprep.mubr.f32.mxu1 %v3612_v0  ;;  %v2789_v48 = vld [vmem:[#allocation5 + $0xe0] sm:$0xff]  ;;  %v2791_v49 = vld [vmem:[#allocation5 + $0xf0] sm:$0xff]  ;;  %v2795_v50 = vld [vmem:[#allocation5 + $0xc8] sm:$0xff] }
  0x1e   :  { %482 = vmatpush1.msra.mxu0 %v2710_v25  ;;  %553 = vmatpush1.msra.mxu1 %v2712_v26  ;;  %v2797_v51 = vld [vmem:[#allocation5 + $0xd8] sm:$0xff]  ;;  %v2803_v52 = vld [vmem:[#allocation5 + $0xc0] sm:$0xff]  ;;  %v2805_v53 = vld [vmem:[#allocation5 + $0xd0] sm:$0xff] }
  0x1f   :  { %2391 = vmatmul.mubr.msk.f32.gmra.mxu0 %vm119_vm0, %v83_v27  ;;  %2399 = vmatmul.mubr.msk.f32.gmra.mxu1 %vm119_vm0, %v83_v27  ;;  %v86_v54 = vld [vmem:[%s3605_s0 + $0x28] sm:$0xff]  ;;  %v2816_v56 = vld [vmem:[#allocation5 + $0xb8] sm:$0xff]  ;;  %v2820_v57 = vld [vmem:[#allocation5 + $0xa0] sm:$0xff] }
  0x20   :  { %483 = vmatprep.subr.mxu0 %v2721_v28  ;;  %554 = vmatprep.subr.mxu1 %v2723_v29  ;;  %v2814_v55 = vld [vmem:[#allocation5 + $0xa8] sm:$0xff]  ;;  %v2822_v58 = vld [vmem:[#allocation5 + $0xb0] sm:$0xff]  ;;  %v2828_v60 = vld [vmem:[#allocation5 + $0x98] sm:$0xff] }
  0x21   :  { %484 = vmatpush1.msra.mxu0 %v2727_v30  ;;  %555 = vmatpush1.msra.mxu1 %v2729_v31  ;;  %v2826_v59 = vld [vmem:[#allocation5 + $0x88] sm:$0xff]  ;;  %3679 = vst [vmem:[#allocation9_spill] sm:$0xff] %v2828_v60  ;;  %v2834_v61 = vld [vmem:[#allocation5 + $0x80] sm:$0xff]  ;;  %v2836_v62 = vld [vmem:[#allocation5 + $0x90] sm:$0xff] }
  0x22   :  { %485 = vmatprep.subr.mxu0 %v2733_v32  ;;  %556 = vmatprep.subr.mxu1 %v2735_v33  ;;  %3678 = vst [vmem:[#allocation8_spill] sm:$0xff] %v2826_v59  ;;  %3680 = vst [vmem:[#allocation10_spill] sm:$0xff] %v2834_v61  ;;  %v87_v63 = vld [vmem:[%s3605_s0 + $0x30] sm:$0xff]  ;;  %v2845_v1 = vld [vmem:[#allocation5 + $0x68] sm:$0xff] }
  0x23   :  { %226 = vmatprep.mubr.f32.mxu0 %v3612_v0  ;;  %339 = vmatprep.mubr.f32.mxu1 %v3612_v0  ;;  %3681 = vst [vmem:[#allocation11_spill] sm:$0xff] %v2836_v62  ;;  %3682 = vst [vmem:[#allocation12_spill] sm:$0xff] %v2845_v1  ;;  %v2847_v2 = vld [vmem:[#allocation5 + $0x78] sm:$0xff]  ;;  %v2851_v3 = vld [vmem:[#allocation5 + $0x60] sm:$0xff] }
  0x24   :  { %486 = vmatpush1.msra.mxu0 %v2741_v34  ;;  %557 = vmatpush1.msra.mxu1 %v2743_v35  ;;  %3683 = vst [vmem:[#allocation13_spill] sm:$0xff] %v2847_v2  ;;  %3684 = vst [vmem:[#allocation14_spill] sm:$0xff] %v2851_v3  ;;  %v2853_v4 = vld [vmem:[#allocation5 + $0x70] sm:$0xff]  ;;  %v2857_v5 = vld [vmem:[#allocation5 + $0x48] sm:$0xff] }
  0x25   :  { %2392 = vmatmul.mubr.msk.f32.gmra.mxu0 %vm119_vm0, %v84_v36  ;;  %2400 = vmatmul.mubr.msk.f32.gmra.mxu1 %vm119_vm0, %v84_v36  ;;  %3685 = vst [vmem:[#allocation15_spill] sm:$0xff] %v2853_v4  ;;  %3686 = vst [vmem:[#allocation16_spill] sm:$0xff] %v2857_v5  ;;  %v2859_v6 = vld [vmem:[#allocation5 + $0x58] sm:$0xff]  ;;  %v2865_v7 = vld [vmem:[#allocation5 + $0x40] sm:$0xff] }
  0x26   :  { %487 = vmatprep.subr.mxu0 %v2752_v37  ;;  %558 = vmatprep.subr.mxu1 %v2754_v38  ;;  %3687 = vst [vmem:[#allocation17_spill] sm:$0xff] %v2859_v6  ;;  %3688 = vst [vmem:[#allocation18_spill] sm:$0xff] %v2865_v7  ;;  %v2867_v8 = vld [vmem:[#allocation5 + $0x50] sm:$0xff]  ;;  %v88_v9 = vld [vmem:[%s3605_s0 + $0x38] sm:$0xff] }
  0x27   :  { %488 = vmatpush1.msra.mxu0 %v2758_v39  ;;  %559 = vmatpush1.msra.mxu1 %v2760_v40  ;;  %3689 = vst [vmem:[#allocation19_spill] sm:$0xff] %v2867_v8  ;;  %v2876_v18 = vld [vmem:[#allocation5 + $0x28] sm:$0xff]  ;;  %v2878_v27 = vld [vmem:[#allocation5 + $0x38] sm:$0xff]  ;;  %v2882_v36 = vld [vmem:[#allocation5 + $0x20] sm:$0xff] }
  0x28   :  { %489 = vmatprep.subr.mxu0 %v2764_v41  ;;  %560 = vmatprep.subr.mxu1 %v2766_v42  ;;  %3690 = vst [vmem:[#allocation20_spill] sm:$0xff] %v2876_v18  ;;  %3691 = vst [vmem:[#allocation21_spill] sm:$0xff] %v2878_v27 }
  0x29   :  { %232 = vmatprep.mubr.f32.mxu0 %v3612_v0  ;;  %345 = vmatprep.mubr.f32.mxu1 %v3612_v0  ;;  %3692 = vst [vmem:[#allocation22_spill] sm:$0xff] %v2882_v36 }
  0x2a   :  { %490 = vmatpush1.msra.mxu0 %v2772_v43  ;;  %561 = vmatpush1.msra.mxu1 %v2774_v44 }
  0x2b   :  { %2393 = vmatmul.mubr.msk.f32.gmra.mxu0 %vm119_vm0, %v85_v45  ;;  %2401 = vmatmul.mubr.msk.f32.gmra.mxu1 %vm119_vm0, %v85_v45  ;;  %v2884_v45 = vld [vmem:[#allocation5 + $0x30] sm:$0xff] }
  0x2c   :  { %491 = vmatprep.subr.mxu0 %v2783_v46  ;;  %562 = vmatprep.subr.mxu1 %v2785_v47  ;;  %3693 = vst [vmem:[#allocation23_spill] sm:$0xff] %v2884_v45 }
  0x2d   :  { %492 = vmatpush1.msra.mxu0 %v2789_v48  ;;  %563 = vmatpush1.msra.mxu1 %v2791_v49 }
  0x2e   :  { %493 = vmatprep.subr.mxu0 %v2795_v50  ;;  %564 = vmatprep.subr.mxu1 %v2797_v51 }
  0x2f   :  { %238 = vmatprep.mubr.f32.mxu0 %v3612_v0  ;;  %351 = vmatprep.mubr.f32.mxu1 %v3612_v0 }
  0x30   :  { %494 = vmatpush1.msra.mxu0 %v2803_v52  ;;  %565 = vmatpush1.msra.mxu1 %v2805_v53 }
  0x31   :  { %2394 = vmatmul.mubr.msk.f32.gmra.mxu0 %vm119_vm0, %v86_v54  ;;  %2402 = vmatmul.mubr.msk.f32.gmra.mxu1 %vm119_vm0, %v86_v54  ;;  %v2888_v54 = vld [vmem:[#allocation5 + $0x8] sm:$0xff] }
  0x32   :  { %495 = vmatprep.subr.mxu0 %v2814_v55  ;;  %566 = vmatprep.subr.mxu1 %v2816_v56  ;;  %3694 = vst [vmem:[#allocation24_spill] sm:$0xff] %v2888_v54 }
  0x33   :  { %496 = vmatpush1.msra.mxu0 %v2820_v57  ;;  %567 = vmatpush1.msra.mxu1 %v2822_v58 }
  0x34   :  { %497 = vmatprep.subr.mxu0 %v2826_v59  ;;  %568 = vmatprep.subr.mxu1 %v2828_v60 }
  0x35   :  { %244 = vmatprep.mubr.f32.mxu0 %v3612_v0  ;;  %357 = vmatprep.mubr.f32.mxu1 %v3612_v0 }
  0x36   :  { %498 = vmatpush1.msra.mxu0 %v2834_v61  ;;  %569 = vmatpush1.msra.mxu1 %v2836_v62 }
  0x37   :  { %2395 = vmatmul.mubr.msk.f32.gmra.mxu0 %vm119_vm0, %v87_v63  ;;  %2403 = vmatmul.mubr.msk.f32.gmra.mxu1 %vm119_vm0, %v87_v63  ;;  %v2890_v63 = vld [vmem:[#allocation5 + $0x18] sm:$0xff] }
  0x38   :  { %499 = vmatprep.subr.mxu0 %v2845_v1  ;;  %570 = vmatprep.subr.mxu1 %v2847_v2  ;;  %3695 = vst [vmem:[#allocation25_spill] sm:$0xff] %v2890_v63 }
  0x39   :  { %500 = vmatpush1.msra.mxu0 %v2851_v3  ;;  %571 = vmatpush1.msra.mxu1 %v2853_v4 }
  0x3a   :  { %501 = vmatprep.subr.mxu0 %v2857_v5  ;;  %572 = vmatprep.subr.mxu1 %v2859_v6 }
  0x3b   :  { %250 = vmatprep.mubr.f32.mxu0 %v3612_v0  ;;  %363 = vmatprep.mubr.f32.mxu1 %v3612_v0  ;;  %v2894_v0 = vld [vmem:[#allocation5] sm:$0xff] }
  0x3c   :  { %502 = vmatpush1.msra.mxu0 %v2865_v7  ;;  %573 = vmatpush1.msra.mxu1 %v2867_v8  ;;  %3696 = vst [vmem:[#allocation26_spill] sm:$0xff] %v2894_v0  ;;  %v2898_v8 = vld [vmem:[#allocation5 + $0x10] sm:$0xff] }
  0x3d   :  { %2396 = vmatmul.mubr.msk.f32.gmra.mxu0 %vm119_vm0, %v88_v9  ;;  %2404 = vmatmul.mubr.msk.f32.gmra.mxu1 %vm119_vm0, %v88_v9  ;;  %3697 = vst [vmem:[#allocation27_spill] sm:$0xff] %v2898_v8  ;;  %v77_v9 = vld [vmem:[%s3609_s4] sm:$0xff] }
  0x3e   :  { %503 = vmatprep.subr.mxu0 %v2876_v18  ;;  %574 = vmatprep.subr.mxu1 %v2878_v27  ;;  %v3698_v18 = vmov 0.0  }
  0x3f   :  { %504 = vmatpush1.msra.mxu0 %v2882_v36  ;;  %575 = vmatpush1.msra.mxu1 %v2884_v45 }
  0x40   :  { %505 = vmatprep.subr.mxu0 %v2888_v54  ;;  %576 = vmatprep.subr.mxu1 %v2890_v63 }
  0x41   :  { %506 = vmatpush1.msra.mxu0 %v2894_v0  ;;  %539 = vmatprep.mubr.f32.mxu0 %v3698_v18 }
  0x42   :  { %577 = vmatpush1.msra.mxu1 %v2898_v8  ;;  %610 = vmatprep.mubr.f32.mxu1 %v3698_v18 }
  0x43   :  { %540 = vmatmul.mubr.f32.vlgmr.msra.gmra.mxu0 %v77_v9  ;;  %611 = vmatmul.mubr.f32.vlgmr.msra.gmra.mxu1 %v77_v9  ;;  %v3699_v9 = vld [vmem:[#allocation19_spill] sm:$0xff] }
  0x44   :  { %717 = vmatprep.subr.mxu0 %v2661_v10  ;;  %788 = vmatprep.subr.mxu1 %v2663_v11 }
  0x45   :  { %718 = vmatpush1.msra.mxu0 %v2665_v12  ;;  %789 = vmatpush1.msra.mxu1 %v2667_v13 }
  0x46   :  { %719 = vmatprep.subr.mxu0 %v2671_v14  ;;  %790 = vmatprep.subr.mxu1 %v2673_v15 }
  0x47   :  { %720 = vmatpush1.msra.mxu0 %v2679_v16  ;;  %791 = vmatpush1.msra.mxu1 %v2681_v17 }
  0x48   :  { %721 = vmatprep.subr.mxu0 %v2690_v19  ;;  %792 = vmatprep.subr.mxu1 %v2692_v20 }
  0x49   :  { %722 = vmatpush1.msra.mxu0 %v2696_v21  ;;  %793 = vmatpush1.msra.mxu1 %v2698_v22 }
  0x4a   :  { %723 = vmatprep.subr.mxu0 %v2702_v23  ;;  %794 = vmatprep.subr.mxu1 %v2704_v24 }
  0x4b   :  { %724 = vmatpush1.msra.mxu0 %v2710_v25  ;;  %795 = vmatpush1.msra.mxu1 %v2712_v26 }
  0x4c   :  { %725 = vmatprep.subr.mxu0 %v2721_v28  ;;  %796 = vmatprep.subr.mxu1 %v2723_v29 }
  0x4d   :  { %726 = vmatpush1.msra.mxu0 %v2727_v30  ;;  %797 = vmatpush1.msra.mxu1 %v2729_v31 }
  0x4e   :  { %727 = vmatprep.subr.mxu0 %v2733_v32  ;;  %798 = vmatprep.subr.mxu1 %v2735_v33 }
  0x4f   :  { %728 = vmatpush1.msra.mxu0 %v2741_v34  ;;  %799 = vmatpush1.msra.mxu1 %v2743_v35 }
  0x50   :  { %729 = vmatprep.subr.mxu0 %v2752_v37  ;;  %800 = vmatprep.subr.mxu1 %v2754_v38 }
  0x51   :  { %730 = vmatpush1.msra.mxu0 %v2758_v39  ;;  %801 = vmatpush1.msra.mxu1 %v2760_v40 }
  0x52   :  { %731 = vmatprep.subr.mxu0 %v2764_v41  ;;  %802 = vmatprep.subr.mxu1 %v2766_v42 }
  0x53   :  { %732 = vmatpush1.msra.mxu0 %v2772_v43  ;;  %803 = vmatpush1.msra.mxu1 %v2774_v44 }
  0x54   :  { %733 = vmatprep.subr.mxu0 %v2783_v46  ;;  %804 = vmatprep.subr.mxu1 %v2785_v47 }
  0x55   :  { %734 = vmatpush1.msra.mxu0 %v2789_v48  ;;  %805 = vmatpush1.msra.mxu1 %v2791_v49 }
  0x56   :  { %735 = vmatprep.subr.mxu0 %v2795_v50  ;;  %806 = vmatprep.subr.mxu1 %v2797_v51 }
  0x57   :  { %736 = vmatpush1.msra.mxu0 %v2803_v52  ;;  %807 = vmatpush1.msra.mxu1 %v2805_v53 }
  0x58   :  { %737 = vmatprep.subr.mxu0 %v2814_v55  ;;  %808 = vmatprep.subr.mxu1 %v2816_v56 }
  0x59   :  { %738 = vmatpush1.msra.mxu0 %v2820_v57  ;;  %809 = vmatpush1.msra.mxu1 %v2822_v58 }
  0x5a   :  { %739 = vmatprep.subr.mxu0 %v2826_v59  ;;  %810 = vmatprep.subr.mxu1 %v2828_v60  ;;  %v3700_v60 = vld [vmem:[#allocation20_spill] sm:$0xff] }
  0x5b   :  { %740 = vmatpush1.msra.mxu0 %v2834_v61  ;;  %811 = vmatpush1.msra.mxu1 %v2836_v62 }
  0x5c   :  { %741 = vmatprep.subr.mxu0 %v2845_v1  ;;  %812 = vmatprep.subr.mxu1 %v2847_v2 }
  0x5d   :  { %742 = vmatpush1.msra.mxu0 %v2851_v3  ;;  %813 = vmatpush1.msra.mxu1 %v2853_v4 }
  0x5e   :  { %743 = vmatprep.subr.mxu0 %v2857_v5  ;;  %814 = vmatprep.subr.mxu1 %v2859_v6 }
  0x5f   :  { %744 = vmatpush1.msra.mxu0 %v2865_v7  ;;  %815 = vmatpush1.msra.mxu1 %v3699_v9 }
  0x60   :  { %745 = vmatprep.subr.mxu0 %v3700_v60  ;;  %816 = vmatprep.subr.mxu1 %v2878_v27  ;;  %v99_v27 = vlaneseq }
  0x61   :  { %746 = vmatpush1.msra.mxu0 %v2882_v36  ;;  %817 = vmatpush1.msra.mxu1 %v2884_v45 }
  0x62   :  { %747 = vmatprep.subr.mxu0 %v2888_v54  ;;  %818 = vmatprep.subr.mxu1 %v2890_v63  ;;  %v100_v36 = vshrl.u32 %v99_v27, 7 }
  0x63   :  { %748 = vmatpush1.msra.mxu0 %v2894_v0  ;;  %781 = vmatprep.mubr.f32.mxu0 %v3698_v18  ;;  %v97_v0 = vld [vmem:[%s3608_s3] sm:$0xf] }
  0x64   :  { %819 = vmatpush1.msra.mxu1 %v2898_v8  ;;  %852 = vmatprep.mubr.f32.mxu1 %v3698_v18  ;;  %v101_v54 = vsub.s32 0, %v100_v36  ;;  %v109_v63 = vsub.s32 2, %v100_v36  ;;  %v105_v18 = vsub.s32 1, %v100_v36 }
  0x65   :  { %960 = vmatprep.subr.mxu0 %v2661_v10  ;;  %1031 = vmatprep.subr.mxu1 %v2663_v11  ;;  %v113_v10 = vsub.s32 3, %v100_v36 }
  0x66   :  { %v102_v7 = vrot.slane %v97_v0, %v101_v54  ;;  %v2988_v11 = vrot.slane %v97_v0, %v109_v63  ;;  %v106_v5 = vrot.slane %v97_v0, %v105_v18 }
  0x67   :  { %v2990_v4 = vrot.slane %v97_v0, %v113_v10 }
  0xd3   :  { %v2977_v60 = vpop.f32.mrf.mxu0  ;;  %v2979_v45 = vpop.f32.mrf.mxu1 }
  0xd5   :  { %v2984_v9 = vpop.f32.mrf.mxu0  ;;  %v2986_v8 = vpop.f32.mrf.mxu1 }
  0xd9   :  { %v216_v27 = vpop.f32.mrf.mxu0  ;;  %v329_v6 = vpop.f32.mrf.mxu1 }
  0xda   :  { %v2992_v3 = vadd.f32 %v216_v27, %v102_v7  ;;  %v2995_v2 = vadd.f32 %v329_v6, %v2988_v11 }
  0xdb   :  { %v218_v1 = vpop.f32.mrf.mxu0  ;;  %v331_v62 = vpop.f32.mrf.mxu1 }
  0xdc   :  { %3701 = vst [vmem:[#allocation28_spill] sm:$0xff] %v2992_v3  ;;  %3702 = vst [vmem:[#allocation29_spill] sm:$0xff] %v2995_v2  ;;  %v2997_v61 = vadd.f32 %v218_v1, %v106_v5  ;;  %v3000_v59 = vadd.f32 %v331_v62, %v2990_v4 }
  0xde   :  { %3703 = vst [vmem:[#allocation30_spill] sm:$0xff] %v2997_v61  ;;  %3704 = vst [vmem:[#allocation31_spill] sm:$0xff] %v3000_v59 }
  0xdf   :  { %v222_v36 = vpop.f32.mrf.mxu0  ;;  %v335_v54 = vpop.f32.mrf.mxu1 }
  0xe0   :  { %v3002_v63 = vadd.f32 %v222_v36, %v102_v7  ;;  %v3005_v18 = vadd.f32 %v335_v54, %v2988_v11 }
  0xe1   :  { %v224_v0 = vpop.f32.mrf.mxu0  ;;  %v337_v10 = vpop.f32.mrf.mxu1 }
  0xe2   :  { %3705 = vst [vmem:[#allocation32_spill] sm:$0xff] %v3002_v63  ;;  %3706 = vst [vmem:[#allocation33_spill] sm:$0xff] %v3005_v18  ;;  %v3007_v27 = vadd.f32 %v224_v0, %v106_v5  ;;  %v3010_v6 = vadd.f32 %v337_v10, %v2990_v4 }
  0xe4   :  { %3707 = vst [vmem:[#allocation34_spill] sm:$0xff] %v3007_v27  ;;  %3708 = vst [vmem:[#allocation35_spill] sm:$0xff] %v3010_v6 }
  0xe5   :  { %v228_v2 = vpop.f32.mrf.mxu0  ;;  %v341_v1 = vpop.f32.mrf.mxu1 }
  0xe6   :  { %v3012_v61 = vadd.f32 %v228_v2, %v102_v7  ;;  %v3015_v62 = vadd.f32 %v341_v1, %v2988_v11 }
  0xe7   :  { %v230_v59 = vpop.f32.mrf.mxu0  ;;  %v343_v36 = vpop.f32.mrf.mxu1 }
  0xe8   :  { %3709 = vst [vmem:[#allocation36_spill] sm:$0xff] %v3012_v61  ;;  %3710 = vst [vmem:[#allocation37_spill] sm:$0xff] %v3015_v62  ;;  %v3017_v63 = vadd.f32 %v230_v59, %v106_v5  ;;  %v3020_v54 = vadd.f32 %v343_v36, %v2990_v4 }
  0xea   :  { %3711 = vst [vmem:[#allocation38_spill] sm:$0xff] %v3017_v63  ;;  %3712 = vst [vmem:[#allocation39_spill] sm:$0xff] %v3020_v54 }
  0xeb   :  { %v234_v18 = vpop.f32.mrf.mxu0  ;;  %v347_v0 = vpop.f32.mrf.mxu1 }
  0xec   :  { %v3022_v27 = vadd.f32 %v234_v18, %v102_v7  ;;  %v3025_v10 = vadd.f32 %v347_v0, %v2988_v11 }
  0xed   :  { %v236_v6 = vpop.f32.mrf.mxu0  ;;  %v349_v2 = vpop.f32.mrf.mxu1 }
  0xee   :  { %3713 = vst [vmem:[#allocation40_spill] sm:$0xff] %v3022_v27  ;;  %3714 = vst [vmem:[#allocation41_spill] sm:$0xff] %v3025_v10  ;;  %v3027_v61 = vadd.f32 %v236_v6, %v106_v5  ;;  %v3030_v1 = vadd.f32 %v349_v2, %v2990_v4 }
  0xf0   :  { %3715 = vst [vmem:[#allocation42_spill] sm:$0xff] %v3027_v61  ;;  %3716 = vst [vmem:[#allocation43_spill] sm:$0xff] %v3030_v1 }
  0xf1   :  { %v240_v62 = vpop.f32.mrf.mxu0  ;;  %v353_v59 = vpop.f32.mrf.mxu1 }
  0xf2   :  { %v3032_v63 = vadd.f32 %v240_v62, %v102_v7  ;;  %v3035_v36 = vadd.f32 %v353_v59, %v2988_v11 }
  0xf3   :  { %v242_v54 = vpop.f32.mrf.mxu0  ;;  %v355_v18 = vpop.f32.mrf.mxu1 }
  0xf4   :  { %3717 = vst [vmem:[#allocation44_spill] sm:$0xff] %v3032_v63  ;;  %3718 = vst [vmem:[#allocation45_spill] sm:$0xff] %v3035_v36  ;;  %v3037_v27 = vadd.f32 %v242_v54, %v106_v5  ;;  %v3040_v0 = vadd.f32 %v355_v18, %v2990_v4 }
  0xf6   :  { %3719 = vst [vmem:[#allocation46_spill] sm:$0xff] %v3037_v27  ;;  %3720 = vst [vmem:[#allocation47_spill] sm:$0xff] %v3040_v0 }
  0xf7   :  { %v246_v10 = vpop.f32.mrf.mxu0  ;;  %v359_v6 = vpop.f32.mrf.mxu1 }
  0xf8   :  { %v3042_v61 = vadd.f32 %v246_v10, %v102_v7  ;;  %v3045_v2 = vadd.f32 %v359_v6, %v2988_v11 }
  0xf9   :  { %v248_v1 = vpop.f32.mrf.mxu0  ;;  %v361_v62 = vpop.f32.mrf.mxu1 }
  0xfa   :  { %3721 = vst [vmem:[#allocation48_spill] sm:$0xff] %v3042_v61  ;;  %3722 = vst [vmem:[#allocation49_spill] sm:$0xff] %v3045_v2  ;;  %v3047_v63 = vadd.f32 %v248_v1, %v106_v5  ;;  %v3050_v59 = vadd.f32 %v361_v62, %v2990_v4  ;;  %v211_v1 = vadd.f32 %v2977_v60, %v102_v7 }
  0xfb   :  { %v213_v62 = vadd.f32 %v2984_v9, %v106_v5 }
  0xfc   :  { %3723 = vst [vmem:[#allocation50_spill] sm:$0xff] %v3047_v63  ;;  %3724 = vst [vmem:[#allocation51_spill] sm:$0xff] %v3050_v59 }
  0xfd   :  { %v252_v36 = vpop.f32.mrf.mxu0  ;;  %v365_v54 = vpop.f32.mrf.mxu1 }
  0xfe   :  { %v3052_v27 = vadd.f32 %v252_v36, %v102_v7  ;;  %v3055_v18 = vadd.f32 %v365_v54, %v2988_v11 }
  0xff   :  { %v254_v0 = vpop.f32.mrf.mxu0  ;;  %v367_v10 = vpop.f32.mrf.mxu1 }
 0x100   :  { %3725 = vst [vmem:[#allocation52_spill] sm:$0xff] %v3052_v27  ;;  %3726 = vst [vmem:[#allocation53_spill] sm:$0xff] %v3055_v18  ;;  %v3057_v61 = vadd.f32 %v254_v0, %v106_v5  ;;  %v3060_v6 = vadd.f32 %v367_v10, %v2990_v4  ;;  %v326_v0 = vadd.f32 %v2986_v8, %v2990_v4  ;;  %v79_v4 = vld [vmem:[%s3610_s5] sm:$0xff] }
 0x101   :  { %v324_v10 = vadd.f32 %v2979_v45, %v2988_v11 }
 0x102   :  { %3727 = vst [vmem:[#allocation54_spill] sm:$0xff] %v3057_v61  ;;  %3728 = vst [vmem:[#allocation55_spill] sm:$0xff] %v3060_v6 }
 0x103   :  { %v541_v2 = vpop.f32.mrf.mxu0  ;;  %v612_v27 = vpop.f32.mrf.mxu1 }
 0x104   :  { %v617_v59 = vadd.f32 %v541_v2, %v211_v1  ;;  %v619_v6 = vadd.f32 %v612_v27, %v324_v10 }
 0x105   :  { %v543_v63 = vpop.f32.mrf.mxu0  ;;  %v614_v18 = vpop.f32.mrf.mxu1 }
 0x106   :  { %v2405_v3 = vmul.f32 -1.442695, %v617_v59  ;;  %v618_v36 = vadd.f32 %v543_v63, %v213_v62  ;;  %v620_v61 = vadd.f32 %v614_v18, %v326_v0 }
 0x108   :  { %2440 = vpow2.f32 %v2405_v3  ;;  %v2406_v54 = vmul.f32 -1.442695, %v618_v36  ;;  %v2407_v60 = vmul.f32 -1.442695, %v620_v61 }
 0x10a   :  { %2442 = vpow2.f32 %v2406_v54 }
 0x10b   :  { %2444 = vpow2.f32 %v2407_v60 }
 0x115   :  { %v2441_v7 = vpop.eup %2440 }
 0x116   :  { %v624_v5 = vadd.f32 1.0, %v2441_v7 }
 0x117   :  { %v2443_v9 = vpop.eup %2442 }
 0x118   :  { %2446 = vrcp.f32 %v624_v5  ;;  %v630_v63 = vadd.f32 1.0, %v2443_v9  ;;  %v2445_v3 = vpop.eup %2444 }
 0x119   :  { %2448 = vtanh.f32 %v619_v6  ;;  %v637_v18 = vadd.f32 1.0, %v2445_v3  ;;  %v3156_v3 = vld [vmem:[#allocation5 + $0x1f8] sm:$0xff] }
 0x11a   :  { %2450 = vrcp.f32 %v630_v63  ;;  %v3154_v63 = vld [vmem:[#allocation5 + $0x1e8] sm:$0xff] }
 0x11b   :  { %2452 = vrcp.f32 %v637_v18  ;;  %v3172_v18 = vld [vmem:[#allocation5 + $0x1c0] sm:$0xff] }
 0x125   :  { %v2447_v2 = vpop.eup %2446 }
 0x126   :  { %v2449_v8 = vpop.eup %2448 }
 0x127   :  { %v2451_v59 = vpop.eup %2450  ;;  %v641_v45 = vmul.f32 %v2449_v8, %v2447_v2  ;;  %v3160_v2 = vld [vmem:[#allocation5 + $0x1e0] sm:$0xff]  ;;  %v3166_v8 = vld [vmem:[#allocation5 + $0x1c8] sm:$0xff] }
 0x128   :  { %v640_v61 = vmul.f32 %v2451_v59, %v79_v4  ;;  %v2453_v27 = vpop.eup %2452  ;;  %v3162_v4 = vld [vmem:[#allocation5 + $0x1f0] sm:$0xff]  ;;  %v3168_v59 = vld [vmem:[#allocation5 + $0x1d8] sm:$0xff] }
 0x12a   :  { %v3071_v11 = vadd.f32 %v641_v45, %v640_v61  ;;  %v3174_v45 = vld [vmem:[#allocation5 + $0x1d0] sm:$0xff]  ;;  %v3178_v61 = vld [vmem:[#allocation5 + $0x1a8] sm:$0xff] }
 0x12c   :  { %2454 = vtanh.f32 %v3071_v11 }
 0x139   :  { %v2455_v1 = vpop.eup %2454 }
 0x13a   :  { %v644_v6 = vmul.f32 %v2455_v1, %v2453_v27  ;;  %v3184_v27 = vld [vmem:[#allocation5 + $0x1a0] sm:$0xff]  ;;  %v3186_v1 = vld [vmem:[#allocation5 + $0x1b0] sm:$0xff] }
 0x13c   :  { %645 = vst [vmem:[%s3611_s6] sm:$0xff] %v644_v6  ;;  %782 = vmatmul.mubr.f32.vlgmr.msra.gmra.mxu0 %v644_v6  ;;  %853 = vmatmul.mubr.f32.vlgmr.msra.gmra.mxu1 %v644_v6  ;;  %v3190_v6 = vld [vmem:[#allocation5 + $0x188] sm:$0xff] }
 0x13d   :  { %961 = vmatpush1.msra.mxu0 %v2665_v12  ;;  %1032 = vmatpush1.msra.mxu1 %v2667_v13  ;;  %v3729_v12 = vld [vmem:[#allocation8_spill] sm:$0xff]  ;;  %v3730_v13 = vld [vmem:[#allocation9_spill] sm:$0xff] }
 0x13e   :  { %962 = vmatprep.subr.mxu0 %v2671_v14  ;;  %1033 = vmatprep.subr.mxu1 %v2673_v15  ;;  %v3731_v14 = vld [vmem:[#allocation10_spill] sm:$0xff]  ;;  %v3732_v15 = vld [vmem:[#allocation11_spill] sm:$0xff]  ;;  %3754 = vst [vmem:[#allocation8_spill] sm:$0xff] %v3154_v63  ;;  %3755 = vst [vmem:[#allocation9_spill] sm:$0xff] %v3156_v3 }
 0x13f   :  { %963 = vmatpush1.msra.mxu0 %v2679_v16  ;;  %1034 = vmatpush1.msra.mxu1 %v2681_v17  ;;  %v3733_v16 = vld [vmem:[#allocation12_spill] sm:$0xff]  ;;  %v3734_v17 = vld [vmem:[#allocation13_spill] sm:$0xff] }
 0x140   :  { %964 = vmatprep.subr.mxu0 %v2690_v19  ;;  %1035 = vmatprep.subr.mxu1 %v2692_v20  ;;  %v3735_v19 = vld [vmem:[#allocation14_spill] sm:$0xff]  ;;  %v3736_v20 = vld [vmem:[#allocation15_spill] sm:$0xff] }
 0x141   :  { %965 = vmatpush1.msra.mxu0 %v2696_v21  ;;  %1036 = vmatpush1.msra.mxu1 %v2698_v22  ;;  %v3737_v21 = vld [vmem:[#allocation16_spill] sm:$0xff]  ;;  %v3738_v22 = vld [vmem:[#allocation17_spill] sm:$0xff] }
 0x142   :  { %966 = vmatprep.subr.mxu0 %v2702_v23  ;;  %1037 = vmatprep.subr.mxu1 %v2704_v24  ;;  %v3739_v23 = vld [vmem:[#allocation18_spill] sm:$0xff]  ;;  %v3740_v24 = vld [vmem:[#allocation19_spill] sm:$0xff] }
 0x143   :  { %967 = vmatpush1.msra.mxu0 %v2710_v25  ;;  %1038 = vmatpush1.msra.mxu1 %v2712_v26  ;;  %v3741_v25 = vld [vmem:[#allocation20_spill] sm:$0xff]  ;;  %v3742_v26 = vld [vmem:[#allocation21_spill] sm:$0xff] }
 0x144   :  { %968 = vmatprep.subr.mxu0 %v2721_v28  ;;  %1039 = vmatprep.subr.mxu1 %v2723_v29  ;;  %v3743_v28 = vld [vmem:[#allocation22_spill] sm:$0xff]  ;;  %v3744_v29 = vld [vmem:[#allocation23_spill] sm:$0xff] }
 0x145   :  { %969 = vmatpush1.msra.mxu0 %v2727_v30  ;;  %1040 = vmatpush1.msra.mxu1 %v2729_v31  ;;  %v3745_v30 = vld [vmem:[#allocation24_spill] sm:$0xff]  ;;  %v3746_v31 = vld [vmem:[#allocation25_spill] sm:$0xff] }
 0x146   :  { %970 = vmatprep.subr.mxu0 %v2733_v32  ;;  %1041 = vmatprep.subr.mxu1 %v2735_v33  ;;  %v3747_v32 = vld [vmem:[#allocation26_spill] sm:$0xff]  ;;  %v3748_v33 = vmov 0.0  }
 0x147   :  { %971 = vmatpush1.msra.mxu0 %v2741_v34  ;;  %1042 = vmatpush1.msra.mxu1 %v2743_v35  ;;  %v3749_v34 = vld [vmem:[#allocation27_spill] sm:$0xff] }
 0x148   :  { %972 = vmatprep.subr.mxu0 %v2752_v37  ;;  %1043 = vmatprep.subr.mxu1 %v2754_v38  ;;  %v3750_v37 = vld [vmem:[#allocation28_spill] sm:$0xff] }
 0x149   :  { %973 = vmatpush1.msra.mxu0 %v2758_v39  ;;  %1044 = vmatpush1.msra.mxu1 %v2760_v40 }
 0x14a   :  { %974 = vmatprep.subr.mxu0 %v2764_v41  ;;  %1045 = vmatprep.subr.mxu1 %v2766_v42  ;;  %v3751_v41 = vld [vmem:[#allocation30_spill] sm:$0xff] }
 0x14b   :  { %975 = vmatpush1.msra.mxu0 %v2772_v43  ;;  %1046 = vmatpush1.msra.mxu1 %v2774_v44 }
 0x14c   :  { %976 = vmatprep.subr.mxu0 %v2783_v46  ;;  %1047 = vmatprep.subr.mxu1 %v2785_v47  ;;  %v3752_v47 = vld [vmem:[#allocation31_spill] sm:$0xff] }
 0x14d   :  { %977 = vmatpush1.msra.mxu0 %v2789_v48  ;;  %1048 = vmatpush1.msra.mxu1 %v2791_v49  ;;  %v3753_v49 = vld [vmem:[#allocation29_spill] sm:$0xff] }
 0x14e   :  { %978 = vmatprep.subr.mxu0 %v2795_v50  ;;  %1049 = vmatprep.subr.mxu1 %v2797_v51 }
 0x14f   :  { %979 = vmatpush1.msra.mxu0 %v2803_v52  ;;  %1050 = vmatpush1.msra.mxu1 %v2805_v53 }
 0x150   :  { %980 = vmatprep.subr.mxu0 %v2814_v55  ;;  %1051 = vmatprep.subr.mxu1 %v2816_v56 }
 0x151   :  { %981 = vmatpush1.msra.mxu0 %v2820_v57  ;;  %1052 = vmatpush1.msra.mxu1 %v2822_v58 }
 0x152   :  { %982 = vmatprep.subr.mxu0 %v3729_v12  ;;  %1053 = vmatprep.subr.mxu1 %v3730_v13  ;;  %v3192_v12 = vld [vmem:[#allocation5 + $0x198] sm:$0xff]  ;;  %v3196_v13 = vld [vmem:[#allocation5 + $0x180] sm:$0xff] }
 0x153   :  { %983 = vmatpush1.msra.mxu0 %v3731_v14  ;;  %1054 = vmatpush1.msra.mxu1 %v3732_v15  ;;  %v3198_v14 = vld [vmem:[#allocation5 + $0x190] sm:$0xff]  ;;  %v3202_v15 = vld [vmem:[#allocation5 + $0x168] sm:$0xff] }
 0x154   :  { %984 = vmatprep.subr.mxu0 %v3733_v16  ;;  %1055 = vmatprep.subr.mxu1 %v3734_v17  ;;  %v3204_v16 = vld [vmem:[#allocation5 + $0x178] sm:$0xff]  ;;  %v3208_v17 = vld [vmem:[#allocation5 + $0x160] sm:$0xff] }
 0x155   :  { %985 = vmatpush1.msra.mxu0 %v3735_v19  ;;  %1056 = vmatpush1.msra.mxu1 %v3736_v20  ;;  %v3210_v19 = vld [vmem:[#allocation5 + $0x170] sm:$0xff]  ;;  %v3214_v20 = vld [vmem:[#allocation5 + $0x148] sm:$0xff] }
 0x156   :  { %986 = vmatprep.subr.mxu0 %v3737_v21  ;;  %1057 = vmatprep.subr.mxu1 %v3738_v22  ;;  %v3216_v21 = vld [vmem:[#allocation5 + $0x158] sm:$0xff]  ;;  %v3220_v22 = vld [vmem:[#allocation5 + $0x140] sm:$0xff] }
 0x157   :  { %987 = vmatpush1.msra.mxu0 %v3739_v23  ;;  %1058 = vmatpush1.msra.mxu1 %v3740_v24  ;;  %v3222_v23 = vld [vmem:[#allocation5 + $0x150] sm:$0xff]  ;;  %v3226_v24 = vld [vmem:[#allocation5 + $0x128] sm:$0xff] }
 0x158   :  { %988 = vmatprep.subr.mxu0 %v3741_v25  ;;  %1059 = vmatprep.subr.mxu1 %v3742_v26  ;;  %v3228_v25 = vld [vmem:[#allocation5 + $0x138] sm:$0xff]  ;;  %v3232_v26 = vld [vmem:[#allocation5 + $0x120] sm:$0xff] }
 0x159   :  { %989 = vmatpush1.msra.mxu0 %v3743_v28  ;;  %1060 = vmatpush1.msra.mxu1 %v3744_v29  ;;  %v3234_v28 = vld [vmem:[#allocation5 + $0x130] sm:$0xff]  ;;  %v3238_v29 = vld [vmem:[#allocation5 + $0x108] sm:$0xff] }
 0x15a   :  { %990 = vmatprep.subr.mxu0 %v3745_v30  ;;  %1061 = vmatprep.subr.mxu1 %v3746_v31  ;;  %v3240_v30 = vld [vmem:[#allocation5 + $0x118] sm:$0xff]  ;;  %v3242_v31 = vld [vmem:[#allocation5 + $0x100] sm:$0xff] }
 0x15b   :  { %991 = vmatpush1.msra.mxu0 %v3747_v32  ;;  %1024 = vmatprep.mubr.f32.mxu0 %v3748_v33  ;;  %v3246_v32 = vld [vmem:[#allocation5 + $0x110] sm:$0xff] }
 0x15c   :  { %1062 = vmatpush1.msra.mxu1 %v3749_v34  ;;  %1095 = vmatprep.mubr.f32.mxu1 %v3748_v33  ;;  %v3248_v34 = vld [vmem:[#allocation5 + $0xe8] sm:$0xff] }
 0x15d   :  { %1203 = vmatprep.subr.mxu0 %v3154_v63  ;;  %1274 = vmatprep.subr.mxu1 %v3156_v3 }
 0x1fc   :  { %v783_v35 = vpop.f32.mrf.mxu0  ;;  %v854_v43 = vpop.f32.mrf.mxu1 }
 0x1fd   :  { %v859_v38 = vadd.f32 %v783_v35, %v3750_v37  ;;  %v861_v50 = vadd.f32 %v854_v43, %v3753_v49  ;;  %v3250_v35 = vld [vmem:[#allocation5 + $0xf8] sm:$0xff]  ;;  %v3254_v37 = vld [vmem:[#allocation5 + $0xe0] sm:$0xff]  ;;  %v3270_v43 = vld [vmem:[#allocation5 + $0xa8] sm:$0xff] }
 0x1fe   :  { %v785_v39 = vpop.f32.mrf.mxu0  ;;  %v856_v46 = vpop.f32.mrf.mxu1  ;;  %v3284_v49 = vld [vmem:[#allocation5 + $0x98] sm:$0xff] }
 0x1ff   :  { %v2408_v40 = vmul.f32 -1.442695, %v859_v38  ;;  %v860_v42 = vadd.f32 %v785_v39, %v3751_v41  ;;  %v862_v48 = vadd.f32 %v856_v46, %v3752_v47  ;;  %v3256_v38 = vld [vmem:[#allocation5 + $0xf0] sm:$0xff]  ;;  %v3258_v39 = vld [vmem:[#allocation5 + $0xc8] sm:$0xff]  ;;  %v3264_v41 = vld [vmem:[#allocation5 + $0xc0] sm:$0xff] }
 0x200   :  { %v3276_v46 = vld [vmem:[#allocation5 + $0xa0] sm:$0xff]  ;;  %v3278_v47 = vld [vmem:[#allocation5 + $0xb0] sm:$0xff] }
 0x201   :  { %2456 = vpow2.f32 %v2408_v40  ;;  %v2409_v44 = vmul.f32 -1.442695, %v860_v42  ;;  %v2410_v51 = vmul.f32 -1.442695, %v862_v48  ;;  %v3262_v40 = vld [vmem:[#allocation5 + $0xd8] sm:$0xff]  ;;  %v3266_v42 = vld [vmem:[#allocation5 + $0xd0] sm:$0xff] }
 0x202   :  { %v3282_v48 = vld [vmem:[#allocation5 + $0x88] sm:$0xff] }
 0x203   :  { %2458 = vpow2.f32 %v2409_v44  ;;  %v3272_v44 = vld [vmem:[#allocation5 + $0xb8] sm:$0xff] }
 0x204   :  { %2460 = vtanh.f32 %v861_v50  ;;  %v3288_v50 = vld [vmem:[#allocation5 + $0x80] sm:$0xff] }
 0x205   :  { %2462 = vpow2.f32 %v2410_v51  ;;  %v3290_v51 = vld [vmem:[#allocation5 + $0x90] sm:$0xff] }
 0x206   :  { %3756 = vst [vmem:[#allocation10_spill] sm:$0xff] %v3290_v51 }
 0x20e   :  { %v2457_v52 = vpop.eup %2456 }
 0x20f   :  { %v866_v53 = vadd.f32 1.0, %v2457_v52  ;;  %v3294_v52 = vld [vmem:[#allocation5 + $0x68] sm:$0xff] }
 0x210   :  { %v2459_v55 = vpop.eup %2458  ;;  %3757 = vst [vmem:[#allocation11_spill] sm:$0xff] %v3294_v52 }
 0x211   :  { %2464 = vrcp.f32 %v866_v53  ;;  %v872_v56 = vadd.f32 1.0, %v2459_v55  ;;  %v2461_v57 = vpop.eup %2460  ;;  %v3296_v53 = vld [vmem:[#allocation5 + $0x78] sm:$0xff]  ;;  %v3300_v55 = vld [vmem:[#allocation5 + $0x60] sm:$0xff] }
 0x212   :  { %v2463_v58 = vpop.eup %2462  ;;  %3758 = vst [vmem:[#allocation12_spill] sm:$0xff] %v3296_v53  ;;  %3759 = vst [vmem:[#allocation13_spill] sm:$0xff] %v3300_v55 }
 0x213   :  { %2466 = vrcp.f32 %v872_v56  ;;  %v879_v0 = vadd.f32 1.0, %v2463_v58  ;;  %v3302_v56 = vld [vmem:[#allocation5 + $0x70] sm:$0xff]  ;;  %v3308_v58 = vld [vmem:[#allocation5 + $0x58] sm:$0xff] }
 0x214   :  { %3760 = vst [vmem:[#allocation14_spill] sm:$0xff] %v3302_v56  ;;  %3762 = vst [vmem:[#allocation16_spill] sm:$0xff] %v3308_v58 }
 0x215   :  { %2468 = vrcp.f32 %v879_v0  ;;  %v3320_v0 = vld [vmem:[#allocation5 + $0x38] sm:$0xff] }
 0x216   :  { %3766 = vst [vmem:[#allocation20_spill] sm:$0xff] %v3320_v0 }
 0x21e   :  { %v2465_v62 = vpop.eup %2464 }
 0x21f   :  { %v883_v36 = vmul.f32 %v2465_v62, %v2461_v57  ;;  %v3306_v57 = vld [vmem:[#allocation5 + $0x48] sm:$0xff]  ;;  %v3312_v62 = vld [vmem:[#allocation5 + $0x40] sm:$0xff] }
 0x220   :  { %v2467_v54 = vpop.eup %2466  ;;  %3761 = vst [vmem:[#allocation15_spill] sm:$0xff] %v3306_v57  ;;  %3763 = vst [vmem:[#allocation17_spill] sm:$0xff] %v3312_v62 }
 0x221   :  { %v882_v10 = vmul.f32 %v2467_v54, %v3071_v11  ;;  %v3180_v11 = vld [vmem:[#allocation5 + $0x1b8] sm:$0xff]  ;;  %v3318_v54 = vld [vmem:[#allocation5 + $0x28] sm:$0xff] }
 0x222   :  { %v2469_v7 = vpop.eup %2468  ;;  %3765 = vst [vmem:[#allocation19_spill] sm:$0xff] %v3318_v54 }
 0x223   :  { %v3146_v60 = vadd.f32 %v883_v36, %v882_v10  ;;  %v3314_v36 = vld [vmem:[#allocation5 + $0x50] sm:$0xff]  ;;  %v3324_v10 = vld [vmem:[#allocation5 + $0x20] sm:$0xff] }
 0x224   :  { %3764 = vst [vmem:[#allocation18_spill] sm:$0xff] %v3314_v36  ;;  %3767 = vst [vmem:[#allocation21_spill] sm:$0xff] %v3324_v10 }
 0x225   :  { %2470 = vtanh.f32 %v3146_v60 }
 0x232   :  { %v2471_v5 = vpop.eup %2470 }
 0x233   :  { %v886_v9 = vmul.f32 %v2471_v5, %v2469_v7  ;;  %v3326_v7 = vld [vmem:[#allocation5 + $0x30] sm:$0xff]  ;;  %v3330_v5 = vld [vmem:[#allocation5 + $0x8] sm:$0xff] }
 0x234   :  { %3768 = vst [vmem:[#allocation22_spill] sm:$0xff] %v3326_v7  ;;  %3769 = vst [vmem:[#allocation23_spill] sm:$0xff] %v3330_v5 }
 0x235   :  { %2411 = vst [vmem:[%s3611_s6 + $0x8] sm:$0xff] %v886_v9  ;;  %1025 = vmatmul.mubr.f32.vlgmr.msra.gmra.mxu0 %v886_v9  ;;  %1096 = vmatmul.mubr.f32.vlgmr.msra.gmra.mxu1 %v886_v9  ;;  %v3332_v9 = vld [vmem:[#allocation5 + $0x18] sm:$0xff] }
 0x236   :  { %1267 = vmatprep.mubr.f32.mxu0 %v3748_v33  ;;  %1338 = vmatprep.mubr.f32.mxu1 %v3748_v33  ;;  %3770 = vst [vmem:[#allocation24_spill] sm:$0xff] %v3332_v9  ;;  %v3336_v33 = vld [vmem:[#allocation5] sm:$0xff] }
 0x237   :  { %1204 = vmatpush1.msra.mxu0 %v3160_v2  ;;  %1275 = vmatpush1.msra.mxu1 %v3162_v4  ;;  %3771 = vst [vmem:[#allocation25_spill] sm:$0xff] %v3336_v33 }
 0x238   :  { %1205 = vmatprep.subr.mxu0 %v3166_v8  ;;  %1276 = vmatprep.subr.mxu1 %v3168_v59 }
 0x239   :  { %1206 = vmatpush1.msra.mxu0 %v3172_v18  ;;  %1277 = vmatpush1.msra.mxu1 %v3174_v45 }
 0x23a   :  { %1207 = vmatprep.subr.mxu0 %v3178_v61  ;;  %1278 = vmatprep.subr.mxu1 %v3180_v11 }
 0x23b   :  { %1208 = vmatpush1.msra.mxu0 %v3184_v27  ;;  %1279 = vmatpush1.msra.mxu1 %v3186_v1 }
 0x23c   :  { %1209 = vmatprep.subr.mxu0 %v3190_v6  ;;  %1280 = vmatprep.subr.mxu1 %v3192_v12 }
 0x23d   :  { %1210 = vmatpush1.msra.mxu0 %v3196_v13  ;;  %1281 = vmatpush1.msra.mxu1 %v3198_v14 }
 0x23e   :  { %1211 = vmatprep.subr.mxu0 %v3202_v15  ;;  %1282 = vmatprep.subr.mxu1 %v3204_v16 }
 0x23f   :  { %1212 = vmatpush1.msra.mxu0 %v3208_v17  ;;  %1283 = vmatpush1.msra.mxu1 %v3210_v19 }
 0x240   :  { %1213 = vmatprep.subr.mxu0 %v3214_v20  ;;  %1284 = vmatprep.subr.mxu1 %v3216_v21 }
 0x241   :  { %1214 = vmatpush1.msra.mxu0 %v3220_v22  ;;  %1285 = vmatpush1.msra.mxu1 %v3222_v23 }
 0x242   :  { %1215 = vmatprep.subr.mxu0 %v3226_v24  ;;  %1286 = vmatprep.subr.mxu1 %v3228_v25 }
 0x243   :  { %1216 = vmatpush1.msra.mxu0 %v3232_v26  ;;  %1287 = vmatpush1.msra.mxu1 %v3234_v28 }
 0x244   :  { %1217 = vmatprep.subr.mxu0 %v3238_v29  ;;  %1288 = vmatprep.subr.mxu1 %v3240_v30 }
 0x245   :  { %1218 = vmatpush1.msra.mxu0 %v3242_v31  ;;  %1289 = vmatpush1.msra.mxu1 %v3246_v32 }
 0x246   :  { %1219 = vmatprep.subr.mxu0 %v3248_v34  ;;  %1290 = vmatprep.subr.mxu1 %v3250_v35 }
 0x247   :  { %1220 = vmatpush1.msra.mxu0 %v3254_v37  ;;  %1291 = vmatpush1.msra.mxu1 %v3256_v38 }
 0x248   :  { %1221 = vmatprep.subr.mxu0 %v3258_v39  ;;  %1292 = vmatprep.subr.mxu1 %v3262_v40 }
 0x249   :  { %1222 = vmatpush1.msra.mxu0 %v3264_v41  ;;  %1293 = vmatpush1.msra.mxu1 %v3266_v42 }
 0x24a   :  { %1223 = vmatprep.subr.mxu0 %v3270_v43  ;;  %1294 = vmatprep.subr.mxu1 %v3272_v44 }
 0x24b   :  { %1224 = vmatpush1.msra.mxu0 %v3276_v46  ;;  %1295 = vmatpush1.msra.mxu1 %v3278_v47 }
 0x24c   :  { %1225 = vmatprep.subr.mxu0 %v3282_v48  ;;  %1296 = vmatprep.subr.mxu1 %v3284_v49 }
 0x24d   :  { %1226 = vmatpush1.msra.mxu0 %v3288_v50  ;;  %1297 = vmatpush1.msra.mxu1 %v3290_v51 }
 0x24e   :  { %1227 = vmatprep.subr.mxu0 %v3294_v52  ;;  %1298 = vmatprep.subr.mxu1 %v3296_v53  ;;  %v3776_v53 = vld [vmem:[#allocation33_spill] sm:$0xff] }
 0x24f   :  { %1228 = vmatpush1.msra.mxu0 %v3300_v55  ;;  %1299 = vmatpush1.msra.mxu1 %v3302_v56  ;;  %v3775_v55 = vld [vmem:[#allocation35_spill] sm:$0xff] }
 0x250   :  { %1229 = vmatprep.subr.mxu0 %v3306_v57  ;;  %1300 = vmatprep.subr.mxu1 %v3308_v58  ;;  %v3338_v57 = vld [vmem:[#allocation5 + $0x10] sm:$0xff] }
 0x251   :  { %1230 = vmatpush1.msra.mxu0 %v3312_v62  ;;  %1301 = vmatpush1.msra.mxu1 %v3314_v36  ;;  %3772 = vst [vmem:[#allocation26_spill] sm:$0xff] %v3338_v57 }
 0x252   :  { %1231 = vmatprep.subr.mxu0 %v3318_v54  ;;  %1302 = vmatprep.subr.mxu1 %v3320_v0  ;;  %v3773_v54 = vld [vmem:[#allocation32_spill] sm:$0xff] }
 0x253   :  { %1232 = vmatpush1.msra.mxu0 %v3324_v10  ;;  %1303 = vmatpush1.msra.mxu1 %v3326_v7  ;;  %v3774_v10 = vld [vmem:[#allocation34_spill] sm:$0xff] }
 0x254   :  { %1233 = vmatprep.subr.mxu0 %v3330_v5  ;;  %1304 = vmatprep.subr.mxu1 %v3332_v9 }
 0x255   :  { %1234 = vmatpush1.msra.mxu0 %v3336_v33  ;;  %1305 = vmatpush1.msra.mxu1 %v3338_v57 }
 0x256   :  { %1446 = vmatprep.subr.mxu0 %v3154_v63  ;;  %1517 = vmatprep.subr.mxu1 %v3156_v3 }
 0x2f5   :  { %v1026_v0 = vpop.f32.mrf.mxu0  ;;  %v1097_v7 = vpop.f32.mrf.mxu1 }
 0x2f6   :  { %v1102_v36 = vadd.f32 %v1026_v0, %v3773_v54  ;;  %v1104_v57 = vadd.f32 %v1097_v7, %v3776_v53  ;;  %v3782_v7 = vld [vmem:[#allocation15_spill] sm:$0xff] }
 0x2f7   :  { %v1028_v62 = vpop.f32.mrf.mxu0  ;;  %v1099_v9 = vpop.f32.mrf.mxu1 }
 0x2f8   :  { %v2412_v58 = vmul.f32 -1.442695, %v1102_v36  ;;  %v1103_v56 = vadd.f32 %v1028_v62, %v3774_v10  ;;  %v1105_v33 = vadd.f32 %v1099_v9, %v3775_v55  ;;  %v3783_v9 = vld [vmem:[#allocation16_spill] sm:$0xff] }
 0x2fa   :  { %2472 = vpow2.f32 %v2412_v58  ;;  %v2413_v5 = vmul.f32 -1.442695, %v1103_v56  ;;  %v2414_v52 = vmul.f32 -1.442695, %v1105_v33 }
 0x2fc   :  { %2474 = vpow2.f32 %v2413_v5 }
 0x2fd   :  { %2476 = vtanh.f32 %v1104_v57  ;;  %v3781_v57 = vld [vmem:[#allocation14_spill] sm:$0xff] }
 0x2fe   :  { %2478 = vpow2.f32 %v2414_v52  ;;  %v3780_v52 = vld [vmem:[#allocation13_spill] sm:$0xff] }
 0x307   :  { %v2473_v63 = vpop.eup %2472 }
 0x308   :  { %v1109_v51 = vadd.f32 1.0, %v2473_v63 }
 0x309   :  { %v2475_v3 = vpop.eup %2474 }
 0x30a   :  { %2480 = vrcp.f32 %v1109_v51  ;;  %v1115_v54 = vadd.f32 1.0, %v2475_v3  ;;  %v2477_v36 = vpop.eup %2476  ;;  %v3778_v3 = vld [vmem:[#allocation11_spill] sm:$0xff]  ;;  %v3779_v51 = vld [vmem:[#allocation12_spill] sm:$0xff] }
 0x30b   :  { %v2479_v62 = vpop.eup %2478 }
 0x30c   :  { %2482 = vrcp.f32 %v1115_v54  ;;  %v1122_v10 = vadd.f32 1.0, %v2479_v62  ;;  %v3784_v54 = vld [vmem:[#allocation17_spill] sm:$0xff]  ;;  %v3786_v62 = vld [vmem:[#allocation19_spill] sm:$0xff] }
 0x30e   :  { %2484 = vrcp.f32 %v1122_v10  ;;  %v3790_v10 = vld [vmem:[#allocation23_spill] sm:$0xff] }
 0x317   :  { %v2481_v58 = vpop.eup %2480 }
 0x318   :  { %v1126_v0 = vmul.f32 %v2481_v58, %v2477_v36  ;;  %v3785_v36 = vld [vmem:[#allocation18_spill] sm:$0xff]  ;;  %v3787_v58 = vld [vmem:[#allocation20_spill] sm:$0xff] }
 0x319   :  { %v2483_v56 = vpop.eup %2482 }
 0x31a   :  { %v1125_v5 = vmul.f32 %v2483_v56, %v3146_v60  ;;  %v3777_v60 = vld [vmem:[#allocation10_spill] sm:$0xff] }
 0x31b   :  { %v2485_v33 = vpop.eup %2484  ;;  %v3789_v56 = vld [vmem:[#allocation22_spill] sm:$0xff] }
 0x31c   :  { %v3353_v55 = vadd.f32 %v1126_v0, %v1125_v5  ;;  %v3788_v0 = vld [vmem:[#allocation21_spill] sm:$0xff]  ;;  %v3791_v5 = vld [vmem:[#allocation24_spill] sm:$0xff] }
 0x31e   :  { %2486 = vtanh.f32 %v3353_v55 }
 0x32b   :  { %v2487_v63 = vpop.eup %2486 }
 0x32c   :  { %v1129_v53 = vmul.f32 %v2487_v63, %v2485_v33  ;;  %v3792_v33 = vld [vmem:[#allocation25_spill] sm:$0xff]  ;;  %v3793_v63 = vmov 0.0  }
 0x32e   :  { %2415 = vst [vmem:[%s3611_s6 + $0x10] sm:$0xff] %v1129_v53  ;;  %1268 = vmatmul.mubr.f32.vlgmr.msra.gmra.mxu0 %v1129_v53  ;;  %1339 = vmatmul.mubr.f32.vlgmr.msra.gmra.mxu1 %v1129_v53  ;;  %v3794_v53 = vld [vmem:[#allocation26_spill] sm:$0xff] }
 0x32f   :  { %1447 = vmatpush1.msra.mxu0 %v3160_v2  ;;  %1518 = vmatpush1.msra.mxu1 %v3162_v4 }
 0x330   :  { %1448 = vmatprep.subr.mxu0 %v3166_v8  ;;  %1519 = vmatprep.subr.mxu1 %v3168_v59 }
 0x331   :  { %1449 = vmatpush1.msra.mxu0 %v3172_v18  ;;  %1520 = vmatpush1.msra.mxu1 %v3174_v45 }
 0x332   :  { %1450 = vmatprep.subr.mxu0 %v3178_v61  ;;  %1521 = vmatprep.subr.mxu1 %v3180_v11 }
 0x333   :  { %1451 = vmatpush1.msra.mxu0 %v3184_v27  ;;  %1522 = vmatpush1.msra.mxu1 %v3186_v1 }
 0x334   :  { %1452 = vmatprep.subr.mxu0 %v3190_v6  ;;  %1523 = vmatprep.subr.mxu1 %v3192_v12 }
 0x335   :  { %1453 = vmatpush1.msra.mxu0 %v3196_v13  ;;  %1524 = vmatpush1.msra.mxu1 %v3198_v14 }
 0x336   :  { %1454 = vmatprep.subr.mxu0 %v3202_v15  ;;  %1525 = vmatprep.subr.mxu1 %v3204_v16 }
 0x337   :  { %1455 = vmatpush1.msra.mxu0 %v3208_v17  ;;  %1526 = vmatpush1.msra.mxu1 %v3210_v19 }
 0x338   :  { %1456 = vmatprep.subr.mxu0 %v3214_v20  ;;  %1527 = vmatprep.subr.mxu1 %v3216_v21 }
 0x339   :  { %1457 = vmatpush1.msra.mxu0 %v3220_v22  ;;  %1528 = vmatpush1.msra.mxu1 %v3222_v23 }
 0x33a   :  { %1458 = vmatprep.subr.mxu0 %v3226_v24  ;;  %1529 = vmatprep.subr.mxu1 %v3228_v25 }
 0x33b   :  { %1459 = vmatpush1.msra.mxu0 %v3232_v26  ;;  %1530 = vmatpush1.msra.mxu1 %v3234_v28 }
 0x33c   :  { %1460 = vmatprep.subr.mxu0 %v3238_v29  ;;  %1531 = vmatprep.subr.mxu1 %v3240_v30 }
 0x33d   :  { %1461 = vmatpush1.msra.mxu0 %v3242_v31  ;;  %1532 = vmatpush1.msra.mxu1 %v3246_v32 }
 0x33e   :  { %1462 = vmatprep.subr.mxu0 %v3248_v34  ;;  %1533 = vmatprep.subr.mxu1 %v3250_v35 }
 0x33f   :  { %1463 = vmatpush1.msra.mxu0 %v3254_v37  ;;  %1534 = vmatpush1.msra.mxu1 %v3256_v38 }
 0x340   :  { %1464 = vmatprep.subr.mxu0 %v3258_v39  ;;  %1535 = vmatprep.subr.mxu1 %v3262_v40 }
 0x341   :  { %1465 = vmatpush1.msra.mxu0 %v3264_v41  ;;  %1536 = vmatpush1.msra.mxu1 %v3266_v42 }
 0x342   :  { %1466 = vmatprep.subr.mxu0 %v3270_v43  ;;  %1537 = vmatprep.subr.mxu1 %v3272_v44 }
 0x343   :  { %1467 = vmatpush1.msra.mxu0 %v3276_v46  ;;  %1538 = vmatpush1.msra.mxu1 %v3278_v47 }
 0x344   :  { %1468 = vmatprep.subr.mxu0 %v3282_v48  ;;  %1539 = vmatprep.subr.mxu1 %v3284_v49 }
 0x345   :  { %1469 = vmatpush1.msra.mxu0 %v3288_v50  ;;  %1540 = vmatpush1.msra.mxu1 %v3777_v60 }
 0x346   :  { %1470 = vmatprep.subr.mxu0 %v3778_v3  ;;  %1541 = vmatprep.subr.mxu1 %v3779_v51  ;;  %v3800_v51 = vld [vmem:[#allocation37_spill] sm:$0xff] }
 0x347   :  { %1471 = vmatpush1.msra.mxu0 %v3780_v52  ;;  %1542 = vmatpush1.msra.mxu1 %v3781_v57  ;;  %v3799_v52 = vld [vmem:[#allocation39_spill] sm:$0xff] }
 0x348   :  { %1472 = vmatprep.subr.mxu0 %v3782_v7  ;;  %1543 = vmatprep.subr.mxu1 %v3783_v9 }
 0x349   :  { %1473 = vmatpush1.msra.mxu0 %v3784_v54  ;;  %1544 = vmatpush1.msra.mxu1 %v3785_v36  ;;  %v3795_v36 = vld [vmem:[#allocation8_spill] sm:$0xff] }
 0x34a   :  { %1474 = vmatprep.subr.mxu0 %v3786_v62  ;;  %1545 = vmatprep.subr.mxu1 %v3787_v58  ;;  %v3796_v62 = vld [vmem:[#allocation9_spill] sm:$0xff] }
 0x34b   :  { %1475 = vmatpush1.msra.mxu0 %v3788_v0  ;;  %1546 = vmatpush1.msra.mxu1 %v3789_v56  ;;  %v3797_v0 = vld [vmem:[#allocation36_spill] sm:$0xff] }
 0x34c   :  { %1476 = vmatprep.subr.mxu0 %v3790_v10  ;;  %1547 = vmatprep.subr.mxu1 %v3791_v5  ;;  %v3798_v10 = vld [vmem:[#allocation38_spill] sm:$0xff] }
 0x34d   :  { %1477 = vmatpush1.msra.mxu0 %v3792_v33  ;;  %1510 = vmatprep.mubr.f32.mxu0 %v3793_v63 }
 0x34e   :  { %1548 = vmatpush1.msra.mxu1 %v3794_v53  ;;  %1581 = vmatprep.mubr.f32.mxu1 %v3793_v63 }
 0x34f   :  { %1689 = vmatprep.subr.mxu0 %v3795_v36  ;;  %1760 = vmatprep.subr.mxu1 %v3796_v62 }
 0x3ee   :  { %v1269_v58 = vpop.f32.mrf.mxu0  ;;  %v1340_v5 = vpop.f32.mrf.mxu1 }
 0x3ef   :  { %v1345_v54 = vadd.f32 %v1269_v58, %v3797_v0  ;;  %v1347_v63 = vadd.f32 %v1340_v5, %v3800_v51  ;;  %v3805_v5 = vld [vmem:[#allocation14_spill] sm:$0xff] }
 0x3f0   :  { %v1271_v56 = vpop.f32.mrf.mxu0  ;;  %v1342_v57 = vpop.f32.mrf.mxu1 }
 0x3f1   :  { %v2416_v9 = vmul.f32 -1.442695, %v1345_v54  ;;  %v1346_v7 = vadd.f32 %v1271_v56, %v3798_v10  ;;  %v1348_v53 = vadd.f32 %v1342_v57, %v3799_v52 }
 0x3f3   :  { %2488 = vpow2.f32 %v2416_v9  ;;  %v2417_v33 = vmul.f32 -1.442695, %v1346_v7  ;;  %v2418_v3 = vmul.f32 -1.442695, %v1348_v53  ;;  %v3807_v53 = vld [vmem:[#allocation16_spill] sm:$0xff] }
 0x3f5   :  { %2490 = vpow2.f32 %v2417_v33 }
 0x3f6   :  { %2492 = vtanh.f32 %v1347_v63  ;;  %v3806_v63 = vld [vmem:[#allocation15_spill] sm:$0xff] }
 0x3f7   :  { %2494 = vpow2.f32 %v2418_v3  ;;  %v3803_v3 = vld [vmem:[#allocation12_spill] sm:$0xff] }
 0x400   :  { %v2489_v36 = vpop.eup %2488 }
 0x401   :  { %v1352_v60 = vadd.f32 1.0, %v2489_v36 }
 0x402   :  { %v2491_v62 = vpop.eup %2490 }
 0x403   :  { %2496 = vrcp.f32 %v1352_v60  ;;  %v1358_v58 = vadd.f32 1.0, %v2491_v62  ;;  %v2493_v54 = vpop.eup %2492  ;;  %v3802_v60 = vld [vmem:[#allocation11_spill] sm:$0xff]  ;;  %v3804_v62 = vld [vmem:[#allocation13_spill] sm:$0xff] }
 0x404   :  { %v2495_v0 = vpop.eup %2494 }
 0x405   :  { %2498 = vrcp.f32 %v1358_v58  ;;  %v1365_v10 = vadd.f32 1.0, %v2495_v0  ;;  %v3808_v58 = vld [vmem:[#allocation17_spill] sm:$0xff]  ;;  %v3810_v0 = vld [vmem:[#allocation19_spill] sm:$0xff] }
 0x407   :  { %2500 = vrcp.f32 %v1365_v10  ;;  %v3814_v10 = vld [vmem:[#allocation23_spill] sm:$0xff] }
 0x410   :  { %v2497_v9 = vpop.eup %2496 }
 0x411   :  { %v1369_v56 = vmul.f32 %v2497_v9, %v2493_v54  ;;  %v3809_v54 = vld [vmem:[#allocation18_spill] sm:$0xff]  ;;  %v3811_v9 = vld [vmem:[#allocation20_spill] sm:$0xff] }
 0x412   :  { %v2499_v7 = vpop.eup %2498 }
 0x413   :  { %v1368_v33 = vmul.f32 %v2499_v7, %v3353_v55  ;;  %v3801_v55 = vld [vmem:[#allocation10_spill] sm:$0xff] }
 0x414   :  { %v2501_v51 = vpop.eup %2500  ;;  %v3813_v7 = vld [vmem:[#allocation22_spill] sm:$0xff] }
 0x415   :  { %v3430_v52 = vadd.f32 %v1369_v56, %v1368_v33  ;;  %v3812_v56 = vld [vmem:[#allocation21_spill] sm:$0xff]  ;;  %v3815_v33 = vld [vmem:[#allocation24_spill] sm:$0xff] }
 0x417   :  { %2502 = vtanh.f32 %v3430_v52 }
 0x424   :  { %v2503_v57 = vpop.eup %2502 }
 0x425   :  { %v1372_v36 = vmul.f32 %v2503_v57, %v2501_v51  ;;  %v3816_v51 = vld [vmem:[#allocation25_spill] sm:$0xff]  ;;  %v3817_v57 = vmov 0.0  }
 0x427   :  { %2419 = vst [vmem:[%s3611_s6 + $0x18] sm:$0xff] %v1372_v36  ;;  %1511 = vmatmul.mubr.f32.vlgmr.msra.gmra.mxu0 %v1372_v36  ;;  %1582 = vmatmul.mubr.f32.vlgmr.msra.gmra.mxu1 %v1372_v36  ;;  %v3818_v36 = vld [vmem:[#allocation26_spill] sm:$0xff] }
 0x428   :  { %1690 = vmatpush1.msra.mxu0 %v3160_v2  ;;  %1761 = vmatpush1.msra.mxu1 %v3162_v4 }
 0x429   :  { %1691 = vmatprep.subr.mxu0 %v3166_v8  ;;  %1762 = vmatprep.subr.mxu1 %v3168_v59 }
 0x42a   :  { %1692 = vmatpush1.msra.mxu0 %v3172_v18  ;;  %1763 = vmatpush1.msra.mxu1 %v3174_v45 }
 0x42b   :  { %1693 = vmatprep.subr.mxu0 %v3178_v61  ;;  %1764 = vmatprep.subr.mxu1 %v3180_v11 }
 0x42c   :  { %1694 = vmatpush1.msra.mxu0 %v3184_v27  ;;  %1765 = vmatpush1.msra.mxu1 %v3186_v1 }
 0x42d   :  { %1695 = vmatprep.subr.mxu0 %v3190_v6  ;;  %1766 = vmatprep.subr.mxu1 %v3192_v12 }
 0x42e   :  { %1696 = vmatpush1.msra.mxu0 %v3196_v13  ;;  %1767 = vmatpush1.msra.mxu1 %v3198_v14 }
 0x42f   :  { %1697 = vmatprep.subr.mxu0 %v3202_v15  ;;  %1768 = vmatprep.subr.mxu1 %v3204_v16 }
 0x430   :  { %1698 = vmatpush1.msra.mxu0 %v3208_v17  ;;  %1769 = vmatpush1.msra.mxu1 %v3210_v19 }
 0x431   :  { %1699 = vmatprep.subr.mxu0 %v3214_v20  ;;  %1770 = vmatprep.subr.mxu1 %v3216_v21 }
 0x432   :  { %1700 = vmatpush1.msra.mxu0 %v3220_v22  ;;  %1771 = vmatpush1.msra.mxu1 %v3222_v23 }
 0x433   :  { %1701 = vmatprep.subr.mxu0 %v3226_v24  ;;  %1772 = vmatprep.subr.mxu1 %v3228_v25 }
 0x434   :  { %1702 = vmatpush1.msra.mxu0 %v3232_v26  ;;  %1773 = vmatpush1.msra.mxu1 %v3234_v28 }
 0x435   :  { %1703 = vmatprep.subr.mxu0 %v3238_v29  ;;  %1774 = vmatprep.subr.mxu1 %v3240_v30 }
 0x436   :  { %1704 = vmatpush1.msra.mxu0 %v3242_v31  ;;  %1775 = vmatpush1.msra.mxu1 %v3246_v32 }
 0x437   :  { %1705 = vmatprep.subr.mxu0 %v3248_v34  ;;  %1776 = vmatprep.subr.mxu1 %v3250_v35 }
 0x438   :  { %1706 = vmatpush1.msra.mxu0 %v3254_v37  ;;  %1777 = vmatpush1.msra.mxu1 %v3256_v38 }
 0x439   :  { %1707 = vmatprep.subr.mxu0 %v3258_v39  ;;  %1778 = vmatprep.subr.mxu1 %v3262_v40 }
 0x43a   :  { %1708 = vmatpush1.msra.mxu0 %v3264_v41  ;;  %1779 = vmatpush1.msra.mxu1 %v3266_v42 }
 0x43b   :  { %1709 = vmatprep.subr.mxu0 %v3270_v43  ;;  %1780 = vmatprep.subr.mxu1 %v3272_v44 }
 0x43c   :  { %1710 = vmatpush1.msra.mxu0 %v3276_v46  ;;  %1781 = vmatpush1.msra.mxu1 %v3278_v47 }
 0x43d   :  { %1711 = vmatprep.subr.mxu0 %v3282_v48  ;;  %1782 = vmatprep.subr.mxu1 %v3284_v49 }
 0x43e   :  { %1712 = vmatpush1.msra.mxu0 %v3288_v50  ;;  %1783 = vmatpush1.msra.mxu1 %v3801_v55 }
 0x43f   :  { %1713 = vmatprep.subr.mxu0 %v3802_v60  ;;  %1784 = vmatprep.subr.mxu1 %v3803_v3  ;;  %v3824_v3 = vld [vmem:[#allocation41_spill] sm:$0xff] }
 0x440   :  { %1714 = vmatpush1.msra.mxu0 %v3804_v62  ;;  %1785 = vmatpush1.msra.mxu1 %v3805_v5  ;;  %v3823_v62 = vld [vmem:[#allocation43_spill] sm:$0xff] }
 0x441   :  { %1715 = vmatprep.subr.mxu0 %v3806_v63  ;;  %1786 = vmatprep.subr.mxu1 %v3807_v53 }
 0x442   :  { %1716 = vmatpush1.msra.mxu0 %v3808_v58  ;;  %1787 = vmatpush1.msra.mxu1 %v3809_v54  ;;  %v3819_v54 = vld [vmem:[#allocation8_spill] sm:$0xff] }
 0x443   :  { %1717 = vmatprep.subr.mxu0 %v3810_v0  ;;  %1788 = vmatprep.subr.mxu1 %v3811_v9  ;;  %v3820_v0 = vld [vmem:[#allocation9_spill] sm:$0xff] }
 0x444   :  { %1718 = vmatpush1.msra.mxu0 %v3812_v56  ;;  %1789 = vmatpush1.msra.mxu1 %v3813_v7  ;;  %v3821_v56 = vld [vmem:[#allocation40_spill] sm:$0xff] }
 0x445   :  { %1719 = vmatprep.subr.mxu0 %v3814_v10  ;;  %1790 = vmatprep.subr.mxu1 %v3815_v33  ;;  %v3822_v10 = vld [vmem:[#allocation42_spill] sm:$0xff] }
 0x446   :  { %1720 = vmatpush1.msra.mxu0 %v3816_v51  ;;  %1753 = vmatprep.mubr.f32.mxu0 %v3817_v57 }
 0x447   :  { %1791 = vmatpush1.msra.mxu1 %v3818_v36  ;;  %1824 = vmatprep.mubr.f32.mxu1 %v3817_v57 }
 0x448   :  { %1932 = vmatprep.subr.mxu0 %v3819_v54  ;;  %2003 = vmatprep.subr.mxu1 %v3820_v0 }
 0x4e7   :  { %v1512_v9 = vpop.f32.mrf.mxu0  ;;  %v1583_v33 = vpop.f32.mrf.mxu1 }
 0x4e8   :  { %v1588_v58 = vadd.f32 %v1512_v9, %v3821_v56  ;;  %v1590_v57 = vadd.f32 %v1583_v33, %v3824_v3 }
 0x4e9   :  { %v1514_v7 = vpop.f32.mrf.mxu0  ;;  %v1585_v5 = vpop.f32.mrf.mxu1 }
 0x4ea   :  { %v2420_v53 = vmul.f32 -1.442695, %v1588_v58  ;;  %v1589_v63 = vadd.f32 %v1514_v7, %v3822_v10  ;;  %v1591_v36 = vadd.f32 %v1585_v5, %v3823_v62 }
 0x4ec   :  { %2504 = vpow2.f32 %v2420_v53  ;;  %v2421_v51 = vmul.f32 -1.442695, %v1589_v63  ;;  %v2422_v60 = vmul.f32 -1.442695, %v1591_v36  ;;  %v2174_v36 = vld [vmem:[#allocation5 + $0x1f8] sm:$0xff] }
 0x4ee   :  { %2506 = vpow2.f32 %v2421_v51 }
 0x4ef   :  { %2508 = vtanh.f32 %v1590_v57  ;;  %v2172_v57 = vld [vmem:[#allocation5 + $0x1e8] sm:$0xff] }
 0x4f0   :  { %2510 = vpow2.f32 %v2422_v60 }
 0x4f9   :  { %v2505_v54 = vpop.eup %2504 }
 0x4fa   :  { %v1595_v55 = vadd.f32 1.0, %v2505_v54  ;;  %v2171_v54 = vld [vmem:[#allocation5 + $0x1e0] sm:$0xff] }
 0x4fb   :  { %v2507_v0 = vpop.eup %2506 }
 0x4fc   :  { %2512 = vrcp.f32 %v1595_v55  ;;  %v1601_v9 = vadd.f32 1.0, %v2507_v0  ;;  %v2509_v58 = vpop.eup %2508  ;;  %v2173_v0 = vld [vmem:[#allocation5 + $0x1f0] sm:$0xff] }
 0x4fd   :  { %v2511_v56 = vpop.eup %2510 }
 0x4fe   :  { %2514 = vrcp.f32 %v1601_v9  ;;  %v1608_v10 = vadd.f32 1.0, %v2511_v56  ;;  %v2168_v9 = vld [vmem:[#allocation5 + $0x1c8] sm:$0xff]  ;;  %v2167_v56 = vld [vmem:[#allocation5 + $0x1c0] sm:$0xff] }
 0x500   :  { %2516 = vrcp.f32 %v1608_v10  ;;  %v2163_v10 = vld [vmem:[#allocation5 + $0x1a0] sm:$0xff] }
 0x509   :  { %v2513_v53 = vpop.eup %2512 }
 0x50a   :  { %v1612_v7 = vmul.f32 %v2513_v53, %v2509_v58  ;;  %v2170_v58 = vld [vmem:[#allocation5 + $0x1d8] sm:$0xff]  ;;  %v2169_v53 = vld [vmem:[#allocation5 + $0x1d0] sm:$0xff] }
 0x50b   :  { %v2515_v63 = vpop.eup %2514 }
 0x50c   :  { %v1611_v51 = vmul.f32 %v2515_v63, %v3430_v52  ;;  %v2166_v63 = vld [vmem:[#allocation5 + $0x1b8] sm:$0xff] }
 0x50d   :  { %v2517_v3 = vpop.eup %2516 }
 0x50e   :  { %v3507_v62 = vadd.f32 %v1612_v7, %v1611_v51  ;;  %v2164_v7 = vld [vmem:[#allocation5 + $0x1a8] sm:$0xff]  ;;  %v2165_v51 = vld [vmem:[#allocation5 + $0x1b0] sm:$0xff] }
 0x510   :  { %2518 = vtanh.f32 %v3507_v62 }
 0x51d   :  { %v2519_v5 = vpop.eup %2518 }
 0x51e   :  { %v1615_v33 = vmul.f32 %v2519_v5, %v2517_v3  ;;  %v2162_v3 = vld [vmem:[#allocation5 + $0x198] sm:$0xff]  ;;  %v2159_v5 = vld [vmem:[#allocation5 + $0x180] sm:$0xff] }
 0x520   :  { %2423 = vst [vmem:[%s3611_s6 + $0x20] sm:$0xff] %v1615_v33  ;;  %1754 = vmatmul.mubr.f32.vlgmr.msra.gmra.mxu0 %v1615_v33  ;;  %1825 = vmatmul.mubr.f32.vlgmr.msra.gmra.mxu1 %v1615_v33  ;;  %v2161_v33 = vld [vmem:[#allocation5 + $0x190] sm:$0xff] }
 0x521   :  { %1933 = vmatpush1.msra.mxu0 %v3160_v2  ;;  %2004 = vmatpush1.msra.mxu1 %v3162_v4  ;;  %v3825_v2 = vld [vmem:[#allocation10_spill] sm:$0xff]  ;;  %v3826_v4 = vld [vmem:[#allocation11_spill] sm:$0xff] }
 0x522   :  { %1934 = vmatprep.subr.mxu0 %v3166_v8  ;;  %2005 = vmatprep.subr.mxu1 %v3168_v59  ;;  %v3827_v8 = vld [vmem:[#allocation12_spill] sm:$0xff]  ;;  %v3828_v59 = vld [vmem:[#allocation13_spill] sm:$0xff] }
 0x523   :  { %1935 = vmatpush1.msra.mxu0 %v3172_v18  ;;  %2006 = vmatpush1.msra.mxu1 %v3174_v45  ;;  %v3829_v18 = vld [vmem:[#allocation14_spill] sm:$0xff]  ;;  %v3830_v45 = vld [vmem:[#allocation15_spill] sm:$0xff] }
 0x524   :  { %1936 = vmatprep.subr.mxu0 %v3178_v61  ;;  %2007 = vmatprep.subr.mxu1 %v3180_v11  ;;  %v3831_v61 = vld [vmem:[#allocation16_spill] sm:$0xff]  ;;  %v3832_v11 = vld [vmem:[#allocation17_spill] sm:$0xff] }
 0x525   :  { %1937 = vmatpush1.msra.mxu0 %v3184_v27  ;;  %2008 = vmatpush1.msra.mxu1 %v3186_v1  ;;  %v3833_v27 = vld [vmem:[#allocation18_spill] sm:$0xff]  ;;  %v3834_v1 = vld [vmem:[#allocation19_spill] sm:$0xff] }
 0x526   :  { %1938 = vmatprep.subr.mxu0 %v3190_v6  ;;  %2009 = vmatprep.subr.mxu1 %v3192_v12  ;;  %v3835_v6 = vld [vmem:[#allocation20_spill] sm:$0xff]  ;;  %v3836_v12 = vld [vmem:[#allocation21_spill] sm:$0xff] }
 0x527   :  { %1939 = vmatpush1.msra.mxu0 %v3196_v13  ;;  %2010 = vmatpush1.msra.mxu1 %v3198_v14  ;;  %v3837_v13 = vld [vmem:[#allocation22_spill] sm:$0xff]  ;;  %v3838_v14 = vld [vmem:[#allocation23_spill] sm:$0xff] }
 0x528   :  { %1940 = vmatprep.subr.mxu0 %v3202_v15  ;;  %2011 = vmatprep.subr.mxu1 %v3204_v16  ;;  %v3839_v15 = vld [vmem:[#allocation24_spill] sm:$0xff]  ;;  %v3840_v16 = vld [vmem:[#allocation25_spill] sm:$0xff] }
 0x529   :  { %1941 = vmatpush1.msra.mxu0 %v3208_v17  ;;  %2012 = vmatpush1.msra.mxu1 %v3210_v19  ;;  %v3841_v17 = vmov 0.0   ;;  %v3842_v19 = vld [vmem:[#allocation26_spill] sm:$0xff] }
 0x52a   :  { %1942 = vmatprep.subr.mxu0 %v3214_v20  ;;  %2013 = vmatprep.subr.mxu1 %v3216_v21  ;;  %v3843_v21 = vld [vmem:[#allocation44_spill] sm:$0xff] }
 0x52b   :  { %1943 = vmatpush1.msra.mxu0 %v3220_v22  ;;  %2014 = vmatpush1.msra.mxu1 %v3222_v23 }
 0x52c   :  { %1944 = vmatprep.subr.mxu0 %v3226_v24  ;;  %2015 = vmatprep.subr.mxu1 %v3228_v25  ;;  %v3844_v25 = vld [vmem:[#allocation46_spill] sm:$0xff] }
 0x52d   :  { %1945 = vmatpush1.msra.mxu0 %v3232_v26  ;;  %2016 = vmatpush1.msra.mxu1 %v3234_v28 }
 0x52e   :  { %1946 = vmatprep.subr.mxu0 %v3238_v29  ;;  %2017 = vmatprep.subr.mxu1 %v3240_v30 }
 0x52f   :  { %1947 = vmatpush1.msra.mxu0 %v3242_v31  ;;  %2018 = vmatpush1.msra.mxu1 %v3246_v32  ;;  %v3845_v31 = vld [vmem:[#allocation47_spill] sm:$0xff] }
 0x530   :  { %1948 = vmatprep.subr.mxu0 %v3248_v34  ;;  %2019 = vmatprep.subr.mxu1 %v3250_v35  ;;  %v3846_v34 = vld [vmem:[#allocation45_spill] sm:$0xff] }
 0x531   :  { %1949 = vmatpush1.msra.mxu0 %v3254_v37  ;;  %2020 = vmatpush1.msra.mxu1 %v3256_v38 }
 0x532   :  { %1950 = vmatprep.subr.mxu0 %v3258_v39  ;;  %2021 = vmatprep.subr.mxu1 %v3262_v40 }
 0x533   :  { %1951 = vmatpush1.msra.mxu0 %v3264_v41  ;;  %2022 = vmatpush1.msra.mxu1 %v3266_v42 }
 0x534   :  { %1952 = vmatprep.subr.mxu0 %v3270_v43  ;;  %2023 = vmatprep.subr.mxu1 %v3272_v44 }
 0x535   :  { %1953 = vmatpush1.msra.mxu0 %v3276_v46  ;;  %2024 = vmatpush1.msra.mxu1 %v3278_v47 }
 0x536   :  { %1954 = vmatprep.subr.mxu0 %v3282_v48  ;;  %2025 = vmatprep.subr.mxu1 %v3284_v49 }
 0x537   :  { %1955 = vmatpush1.msra.mxu0 %v3288_v50  ;;  %2026 = vmatpush1.msra.mxu1 %v3825_v2  ;;  %v2156_v2 = vld [vmem:[#allocation5 + $0x168] sm:$0xff] }
 0x538   :  { %1956 = vmatprep.subr.mxu0 %v3826_v4  ;;  %2027 = vmatprep.subr.mxu1 %v3827_v8  ;;  %v2158_v4 = vld [vmem:[#allocation5 + $0x178] sm:$0xff]  ;;  %v2155_v8 = vld [vmem:[#allocation5 + $0x160] sm:$0xff] }
 0x539   :  { %1957 = vmatpush1.msra.mxu0 %v3828_v59  ;;  %2028 = vmatpush1.msra.mxu1 %v3829_v18  ;;  %v2157_v59 = vld [vmem:[#allocation5 + $0x170] sm:$0xff]  ;;  %v2152_v18 = vld [vmem:[#allocation5 + $0x148] sm:$0xff] }
 0x53a   :  { %1958 = vmatprep.subr.mxu0 %v3830_v45  ;;  %2029 = vmatprep.subr.mxu1 %v3831_v61  ;;  %v2154_v45 = vld [vmem:[#allocation5 + $0x158] sm:$0xff]  ;;  %v2151_v61 = vld [vmem:[#allocation5 + $0x140] sm:$0xff] }
 0x53b   :  { %1959 = vmatpush1.msra.mxu0 %v3832_v11  ;;  %2030 = vmatpush1.msra.mxu1 %v3833_v27  ;;  %v2153_v11 = vld [vmem:[#allocation5 + $0x150] sm:$0xff]  ;;  %v2148_v27 = vld [vmem:[#allocation5 + $0x128] sm:$0xff] }
 0x53c   :  { %1960 = vmatprep.subr.mxu0 %v3834_v1  ;;  %2031 = vmatprep.subr.mxu1 %v3835_v6  ;;  %v2150_v1 = vld [vmem:[#allocation5 + $0x138] sm:$0xff]  ;;  %v2147_v6 = vld [vmem:[#allocation5 + $0x120] sm:$0xff] }
 0x53d   :  { %1961 = vmatpush1.msra.mxu0 %v3836_v12  ;;  %2032 = vmatpush1.msra.mxu1 %v3837_v13  ;;  %v2149_v12 = vld [vmem:[#allocation5 + $0x130] sm:$0xff]  ;;  %v2144_v13 = vld [vmem:[#allocation5 + $0x108] sm:$0xff] }
 0x53e   :  { %1962 = vmatprep.subr.mxu0 %v3838_v14  ;;  %2033 = vmatprep.subr.mxu1 %v3839_v15  ;;  %v2146_v14 = vld [vmem:[#allocation5 + $0x118] sm:$0xff]  ;;  %v2143_v15 = vld [vmem:[#allocation5 + $0x100] sm:$0xff] }
 0x53f   :  { %1963 = vmatpush1.msra.mxu0 %v3840_v16  ;;  %1996 = vmatprep.mubr.f32.mxu0 %v3841_v17  ;;  %v2145_v16 = vld [vmem:[#allocation5 + $0x110] sm:$0xff] }
 0x540   :  { %2034 = vmatpush1.msra.mxu1 %v3842_v19  ;;  %2067 = vmatprep.mubr.f32.mxu1 %v3841_v17  ;;  %v2142_v19 = vld [vmem:[#allocation5 + $0xf8] sm:$0xff] }
 0x541   :  { %2175 = vmatprep.subr.mxu0 %v2172_v57  ;;  %2246 = vmatprep.subr.mxu1 %v2174_v36  ;;  %v2113_v57 = vld [vmem:[#allocation5 + $0x10] sm:$0xff] }
 0x5e0   :  { %v1755_v20 = vpop.f32.mrf.mxu0  ;;  %v1826_v28 = vpop.f32.mrf.mxu1 }
 0x5e1   :  { %v1831_v22 = vadd.f32 %v1755_v20, %v3843_v21  ;;  %v1833_v35 = vadd.f32 %v1826_v28, %v3846_v34  ;;  %v2139_v20 = vld [vmem:[#allocation5 + $0xe0] sm:$0xff]  ;;  %v2141_v21 = vld [vmem:[#allocation5 + $0xf0] sm:$0xff]  ;;  %v2134_v28 = vld [vmem:[#allocation5 + $0xb8] sm:$0xff] }
 0x5e2   :  { %v1757_v23 = vpop.f32.mrf.mxu0  ;;  %v1828_v30 = vpop.f32.mrf.mxu1  ;;  %v2127_v34 = vld [vmem:[#allocation5 + $0x80] sm:$0xff] }
 0x5e3   :  { %v2424_v24 = vmul.f32 -1.442695, %v1831_v22  ;;  %v1832_v26 = vadd.f32 %v1757_v23, %v3844_v25  ;;  %v1834_v32 = vadd.f32 %v1828_v30, %v3845_v31  ;;  %v2136_v22 = vld [vmem:[#allocation5 + $0xc8] sm:$0xff]  ;;  %v2138_v23 = vld [vmem:[#allocation5 + $0xd8] sm:$0xff]  ;;  %v2137_v25 = vld [vmem:[#allocation5 + $0xd0] sm:$0xff] }
 0x5e4   :  { %v2133_v30 = vld [vmem:[#allocation5 + $0xb0] sm:$0xff]  ;;  %v2128_v31 = vld [vmem:[#allocation5 + $0x88] sm:$0xff] }
 0x5e5   :  { %2520 = vpow2.f32 %v2424_v24  ;;  %v2425_v29 = vmul.f32 -1.442695, %v1832_v26  ;;  %v2426_v37 = vmul.f32 -1.442695, %v1834_v32  ;;  %v2135_v24 = vld [vmem:[#allocation5 + $0xc0] sm:$0xff]  ;;  %v2132_v26 = vld [vmem:[#allocation5 + $0xa8] sm:$0xff] }
 0x5e6   :  { %v2130_v32 = vld [vmem:[#allocation5 + $0x98] sm:$0xff] }
 0x5e7   :  { %2522 = vpow2.f32 %v2425_v29  ;;  %v2131_v29 = vld [vmem:[#allocation5 + $0xa0] sm:$0xff] }
 0x5e8   :  { %2524 = vtanh.f32 %v1833_v35  ;;  %v2129_v35 = vld [vmem:[#allocation5 + $0x90] sm:$0xff] }
 0x5e9   :  { %2526 = vpow2.f32 %v2426_v37  ;;  %v2124_v37 = vld [vmem:[#allocation5 + $0x68] sm:$0xff] }
 0x5f2   :  { %v2521_v38 = vpop.eup %2520 }
 0x5f3   :  { %v1838_v39 = vadd.f32 1.0, %v2521_v38  ;;  %v2126_v38 = vld [vmem:[#allocation5 + $0x78] sm:$0xff] }
 0x5f4   :  { %v2523_v40 = vpop.eup %2522 }
 0x5f5   :  { %2528 = vrcp.f32 %v1838_v39  ;;  %v1844_v41 = vadd.f32 1.0, %v2523_v40  ;;  %v2525_v42 = vpop.eup %2524  ;;  %v2123_v39 = vld [vmem:[#allocation5 + $0x60] sm:$0xff]  ;;  %v2125_v40 = vld [vmem:[#allocation5 + $0x70] sm:$0xff] }
 0x5f6   :  { %v2527_v43 = vpop.eup %2526 }
 0x5f7   :  { %2530 = vrcp.f32 %v1844_v41  ;;  %v1851_v48 = vadd.f32 1.0, %v2527_v43  ;;  %v2120_v41 = vld [vmem:[#allocation5 + $0x48] sm:$0xff]  ;;  %v2119_v43 = vld [vmem:[#allocation5 + $0x40] sm:$0xff] }
 0x5f9   :  { %2532 = vrcp.f32 %v1851_v48  ;;  %v2115_v48 = vld [vmem:[#allocation5 + $0x20] sm:$0xff] }
 0x602   :  { %v2529_v44 = vpop.eup %2528 }
 0x603   :  { %v1855_v46 = vmul.f32 %v2529_v44, %v2525_v42  ;;  %v2122_v42 = vld [vmem:[#allocation5 + $0x58] sm:$0xff]  ;;  %v2121_v44 = vld [vmem:[#allocation5 + $0x50] sm:$0xff] }
 0x604   :  { %v2531_v47 = vpop.eup %2530 }
 0x605   :  { %v1854_v49 = vmul.f32 %v2531_v47, %v3507_v62  ;;  %v2160_v62 = vld [vmem:[#allocation5 + $0x188] sm:$0xff]  ;;  %v2118_v47 = vld [vmem:[#allocation5 + $0x38] sm:$0xff] }
 0x606   :  { %v2533_v52 = vpop.eup %2532 }
 0x607   :  { %v3582_v50 = vadd.f32 %v1855_v46, %v1854_v49  ;;  %v2116_v46 = vld [vmem:[#allocation5 + $0x28] sm:$0xff]  ;;  %v2117_v49 = vld [vmem:[#allocation5 + $0x30] sm:$0xff] }
 0x609   :  { %2534 = vtanh.f32 %v3582_v50 }
 0x616   :  { %v2535_v55 = vpop.eup %2534 }
 0x617   :  { %v1858_v60 = vmul.f32 %v2535_v55, %v2533_v52  ;;  %v2112_v52 = vld [vmem:[#allocation5 + $0x8] sm:$0xff]  ;;  %v2114_v55 = vld [vmem:[#allocation5 + $0x18] sm:$0xff] }
 0x619   :  { %2427 = vst [vmem:[%s3611_s6 + $0x28] sm:$0xff] %v1858_v60  ;;  %1997 = vmatmul.mubr.f32.vlgmr.msra.gmra.mxu0 %v1858_v60  ;;  %2068 = vmatmul.mubr.f32.vlgmr.msra.gmra.mxu1 %v1858_v60  ;;  %v2111_v60 = vld [vmem:[#allocation5] sm:$0xff] }
 0x61a   :  { %2239 = vmatprep.mubr.f32.mxu0 %v3841_v17  ;;  %2310 = vmatprep.mubr.f32.mxu1 %v3841_v17  ;;  %v2140_v17 = vld [vmem:[#allocation5 + $0xe8] sm:$0xff] }
 0x61b   :  { %2176 = vmatpush1.msra.mxu0 %v2171_v54  ;;  %2247 = vmatpush1.msra.mxu1 %v2173_v0  ;;  %v3847_v54 = vld [vmem:[#allocation48_spill] sm:$0xff] }
 0x61c   :  { %2177 = vmatprep.subr.mxu0 %v2168_v9  ;;  %2248 = vmatprep.subr.mxu1 %v2170_v58 }
 0x61d   :  { %2178 = vmatpush1.msra.mxu0 %v2167_v56  ;;  %2249 = vmatpush1.msra.mxu1 %v2169_v53  ;;  %v3848_v56 = vld [vmem:[#allocation50_spill] sm:$0xff] }
 0x61e   :  { %2179 = vmatprep.subr.mxu0 %v2164_v7  ;;  %2250 = vmatprep.subr.mxu1 %v2166_v63 }
 0x61f   :  { %2180 = vmatpush1.msra.mxu0 %v2163_v10  ;;  %2251 = vmatpush1.msra.mxu1 %v2165_v51  ;;  %v3849_v51 = vld [vmem:[#allocation51_spill] sm:$0xff] }
 0x620   :  { %2181 = vmatprep.subr.mxu0 %v2160_v62  ;;  %2252 = vmatprep.subr.mxu1 %v2162_v3  ;;  %v3850_v3 = vld [vmem:[#allocation49_spill] sm:$0xff] }
 0x621   :  { %2182 = vmatpush1.msra.mxu0 %v2159_v5  ;;  %2253 = vmatpush1.msra.mxu1 %v2161_v33 }
 0x622   :  { %2183 = vmatprep.subr.mxu0 %v2156_v2  ;;  %2254 = vmatprep.subr.mxu1 %v2158_v4 }
 0x623   :  { %2184 = vmatpush1.msra.mxu0 %v2155_v8  ;;  %2255 = vmatpush1.msra.mxu1 %v2157_v59 }
 0x624   :  { %2185 = vmatprep.subr.mxu0 %v2152_v18  ;;  %2256 = vmatprep.subr.mxu1 %v2154_v45 }
 0x625   :  { %2186 = vmatpush1.msra.mxu0 %v2151_v61  ;;  %2257 = vmatpush1.msra.mxu1 %v2153_v11 }
 0x626   :  { %2187 = vmatprep.subr.mxu0 %v2148_v27  ;;  %2258 = vmatprep.subr.mxu1 %v2150_v1 }
 0x627   :  { %2188 = vmatpush1.msra.mxu0 %v2147_v6  ;;  %2259 = vmatpush1.msra.mxu1 %v2149_v12 }
 0x628   :  { %2189 = vmatprep.subr.mxu0 %v2144_v13  ;;  %2260 = vmatprep.subr.mxu1 %v2146_v14 }
 0x629   :  { %2190 = vmatpush1.msra.mxu0 %v2143_v15  ;;  %2261 = vmatpush1.msra.mxu1 %v2145_v16 }
 0x62a   :  { %2191 = vmatprep.subr.mxu0 %v2140_v17  ;;  %2262 = vmatprep.subr.mxu1 %v2142_v19  ;;  %v3851_v17 = vld [vmem:[#allocation52_spill] sm:$0xff] }
 0x62b   :  { %2192 = vmatpush1.msra.mxu0 %v2139_v20  ;;  %2263 = vmatpush1.msra.mxu1 %v2141_v21 }
 0x62c   :  { %2193 = vmatprep.subr.mxu0 %v2136_v22  ;;  %2264 = vmatprep.subr.mxu1 %v2138_v23  ;;  %v3852_v22 = vld [vmem:[#allocation54_spill] sm:$0xff] }
 0x62d   :  { %2194 = vmatpush1.msra.mxu0 %v2135_v24  ;;  %2265 = vmatpush1.msra.mxu1 %v2137_v25 }
 0x62e   :  { %2195 = vmatprep.subr.mxu0 %v2132_v26  ;;  %2266 = vmatprep.subr.mxu1 %v2134_v28  ;;  %v3853_v26 = vld [vmem:[#allocation55_spill] sm:$0xff] }
 0x62f   :  { %2196 = vmatpush1.msra.mxu0 %v2131_v29  ;;  %2267 = vmatpush1.msra.mxu1 %v2133_v30  ;;  %v3854_v29 = vld [vmem:[#allocation53_spill] sm:$0xff] }
 0x630   :  { %2197 = vmatprep.subr.mxu0 %v2128_v31  ;;  %2268 = vmatprep.subr.mxu1 %v2130_v32 }
 0x631   :  { %2198 = vmatpush1.msra.mxu0 %v2127_v34  ;;  %2269 = vmatpush1.msra.mxu1 %v2129_v35 }
 0x632   :  { %2199 = vmatprep.subr.mxu0 %v2124_v37  ;;  %2270 = vmatprep.subr.mxu1 %v2126_v38 }
 0x633   :  { %2200 = vmatpush1.msra.mxu0 %v2123_v39  ;;  %2271 = vmatpush1.msra.mxu1 %v2125_v40 }
 0x634   :  { %2201 = vmatprep.subr.mxu0 %v2120_v41  ;;  %2272 = vmatprep.subr.mxu1 %v2122_v42 }
 0x635   :  { %2202 = vmatpush1.msra.mxu0 %v2119_v43  ;;  %2273 = vmatpush1.msra.mxu1 %v2121_v44 }
 0x636   :  { %2203 = vmatprep.subr.mxu0 %v2116_v46  ;;  %2274 = vmatprep.subr.mxu1 %v2118_v47 }
 0x637   :  { %2204 = vmatpush1.msra.mxu0 %v2115_v48  ;;  %2275 = vmatpush1.msra.mxu1 %v2117_v49 }
 0x638   :  { %2205 = vmatprep.subr.mxu0 %v2112_v52  ;;  %2276 = vmatprep.subr.mxu1 %v2114_v55 }
 0x639   :  { %2206 = vmatpush1.msra.mxu0 %v2111_v60  ;;  %2277 = vmatpush1.msra.mxu1 %v2113_v57 }
 0x6d9   :  { %v1998_v36 = vpop.f32.mrf.mxu0  ;;  %v2069_v7 = vpop.f32.mrf.mxu1 }
 0x6da   :  { %v2074_v0 = vadd.f32 %v1998_v36, %v3847_v54  ;;  %v2076_v5 = vadd.f32 %v2069_v7, %v3850_v3 }
 0x6db   :  { %v2000_v9 = vpop.f32.mrf.mxu0  ;;  %v2071_v10 = vpop.f32.mrf.mxu1 }
 0x6dc   :  { %v2428_v58 = vmul.f32 -1.442695, %v2074_v0  ;;  %v2075_v53 = vadd.f32 %v2000_v9, %v3848_v56  ;;  %v2077_v62 = vadd.f32 %v2071_v10, %v3849_v51 }
 0x6de   :  { %2536 = vpow2.f32 %v2428_v58  ;;  %v2429_v63 = vmul.f32 -1.442695, %v2075_v53  ;;  %v2430_v33 = vmul.f32 -1.442695, %v2077_v62 }
 0x6e0   :  { %2538 = vpow2.f32 %v2429_v63 }
 0x6e1   :  { %2540 = vtanh.f32 %v2076_v5 }
 0x6e2   :  { %2542 = vpow2.f32 %v2430_v33 }
 0x6eb   :  { %v2537_v2 = vpop.eup %2536 }
 0x6ec   :  { %v2081_v4 = vadd.f32 1.0, %v2537_v2 }
 0x6ed   :  { %v2539_v8 = vpop.eup %2538 }
 0x6ee   :  { %2544 = vrcp.f32 %v2081_v4  ;;  %v2087_v59 = vadd.f32 1.0, %v2539_v8  ;;  %v2541_v18 = vpop.eup %2540 }
 0x6ef   :  { %v2543_v45 = vpop.eup %2542 }
 0x6f0   :  { %2546 = vrcp.f32 %v2087_v59  ;;  %v2094_v1 = vadd.f32 1.0, %v2543_v45 }
 0x6f2   :  { %2548 = vrcp.f32 %v2094_v1 }
 0x6fb   :  { %v2545_v61 = vpop.eup %2544 }
 0x6fc   :  { %v2098_v11 = vmul.f32 %v2545_v61, %v2541_v18 }
 0x6fd   :  { %v2547_v27 = vpop.eup %2546 }
 0x6fe   :  { %v2097_v6 = vmul.f32 %v2547_v27, %v3582_v50 }
 0x6ff   :  { %v2549_v13 = vpop.eup %2548 }
 0x700   :  { %v2099_v12 = vadd.f32 %v2098_v11, %v2097_v6 }
 0x702   :  { %2550 = vtanh.f32 %v2099_v12 }
 0x70f   :  { %v2551_v14 = vpop.eup %2550 }
 0x710   :  { %v2101_v15 = vmul.f32 %v2551_v14, %v2549_v13 }
 0x712   :  { %2431 = vst [vmem:[%s3611_s6 + $0x30] sm:$0xff] %v2101_v15  ;;  %2240 = vmatmul.mubr.f32.vlgmr.msra.gmra.mxu0 %v2101_v15  ;;  %2311 = vmatmul.mubr.f32.vlgmr.msra.gmra.mxu1 %v2101_v15 }
 0x7d2   :  { %v2241_v16 = vpop.f32.mrf.mxu0  ;;  %v2312_v50 = vpop.f32.mrf.mxu1 }
 0x7d3   :  { %v2317_v19 = vadd.f32 %v2241_v16, %v3851_v17  ;;  %v2319_v30 = vadd.f32 %v2312_v50, %v3854_v29 }
 0x7d4   :  { %v2243_v20 = vpop.f32.mrf.mxu0  ;;  %v2314_v25 = vpop.f32.mrf.mxu1 }
 0x7d5   :  { %v2432_v21 = vmul.f32 -1.442695, %v2317_v19  ;;  %v2318_v23 = vadd.f32 %v2243_v20, %v3852_v22  ;;  %v2320_v28 = vadd.f32 %v2314_v25, %v3853_v26 }
 0x7d7   :  { %2552 = vpow2.f32 %v2432_v21  ;;  %v2433_v24 = vmul.f32 -1.442695, %v2318_v23  ;;  %v2434_v31 = vmul.f32 -1.442695, %v2320_v28 }
 0x7d9   :  { %2554 = vpow2.f32 %v2433_v24 }
 0x7da   :  { %2556 = vtanh.f32 %v2319_v30 }
 0x7db   :  { %2558 = vpow2.f32 %v2434_v31 }
 0x7e4   :  { %v2553_v32 = vpop.eup %2552 }
 0x7e5   :  { %v2324_v34 = vadd.f32 1.0, %v2553_v32 }
 0x7e6   :  { %v2555_v35 = vpop.eup %2554 }
 0x7e7   :  { %2560 = vrcp.f32 %v2324_v34  ;;  %v2330_v37 = vadd.f32 1.0, %v2555_v35  ;;  %v2557_v38 = vpop.eup %2556 }
 0x7e8   :  { %v2559_v39 = vpop.eup %2558 }
 0x7e9   :  { %2562 = vrcp.f32 %v2330_v37  ;;  %v2337_v43 = vadd.f32 1.0, %v2559_v39 }
 0x7eb   :  { %2564 = vrcp.f32 %v2337_v43 }
 0x7f4   :  { %v2561_v40 = vpop.eup %2560 }
 0x7f5   :  { %v2341_v41 = vmul.f32 %v2561_v40, %v2557_v38 }
 0x7f6   :  { %v2563_v42 = vpop.eup %2562 }
 0x7f7   :  { %v2340_v44 = vmul.f32 %v2563_v42, %v2099_v12 }
 0x7f8   :  { %v2565_v47 = vpop.eup %2564 }
 0x7f9   :  { %v2342_v46 = vadd.f32 %v2341_v41, %v2340_v44 }
 0x7fb   :  { %2566 = vtanh.f32 %v2342_v46 }
 0x808   :  { %v2567_v48 = vpop.eup %2566 }
 0x809   :  { %v2344_v49 = vmul.f32 %v2567_v48, %v2565_v47 }
 0x80b   :  { %2435 = vst [vmem:[%s3611_s6 + $0x38] sm:$0xff] %v2344_v49 }
 0x80c   :  { %2367 = vsyncpa [#allocation6], 1 }

</bundles_post_ra>
